<compile_context>
chip_gen: v7x
topology: tpu7x:2x2x1
jax: 0.10.0
libtpu: 0.0.40
codegen_flags: <defaults>
</compile_context>

<pallas_src>
import functools

import jax
import jax.numpy as jnp
from jax import lax
from jax.experimental import pallas as pl
from jax.experimental.pallas import tpu as pltpu


_LP = 8  # left W halo width -> sublane-aligned interior start column


def _round_up(x, m):
    return ((x + m - 1) // m) * m


# ----------------------------- fused kernel ---------------------------------

def _basic_block_kernel(alpha_ref, x_hbm, w1_ref, b1_ref, w2_ref, b2_ref,
                        out_ref, xbuf, y1buf, sem):
    """One grid step = one (image, row-block)."""
    n = pl.program_id(0)            # image index
    hb = pl.program_id(1)           # row-block index within the image
    n_hb = pl.num_programs(1)

    _, th, w_img, cp = out_ref.shape            # rows/block, real width, padded channels
    r1, wp, _ = y1buf.shape                     # th + 2 conv1 rows, padded width
    th4 = xbuf.shape[1]                         # th + 4 input rows (2-row halo)

    def x_window_copy(row_start, slot_):
        return pltpu.make_async_copy(
            x_hbm.at[n, pl.ds(row_start, th4)],
            xbuf.at[slot_],
            sem.at[slot_],
        )

    slot = lax.rem(hb, 2)

    # Prime the double buffer at the first row-block of each image.
    @pl.when(hb == 0)
    def _():
        x_window_copy(0, 0).start()

    # Wait for the current input window, then immediately prefetch the next one.
    x_window_copy(hb * th, slot).wait()

    @pl.when(hb + 1 < n_hb)
    def _():
        x_window_copy((hb + 1) * th, 1 - slot).start()

    xb = xbuf.at[slot]
    alpha1 = alpha_ref[0]
    alpha2 = alpha_ref[1]

    # Zero y1buf's W halo once per image (hoisted out of the steady state): the
    # interior store below never touches these columns, and conv2 only needs
    # columns _LP-1 and _LP+w_img to be zero (SAME padding in W).
    @pl.when(hb == 0)
    def _():
        y1buf[:, 0:_LP, :] = jnp.zeros((r1, _LP, cp), y1buf.dtype)
        y1buf[:, _LP + w_img:wp, :] = jnp.zeros((r1, wp - _LP - w_img, cp), y1buf.dtype)

    # --- conv1 (3x3 SAME) over th+2 rows (1-row halo for conv2) -----------------
    # 9 bf16 MXU matmuls (K = N = cp), one full-width f32 accumulator per kw tap:
    # clean `acc += dot` chains, no per-tap sublane-offset slicing.
    acc1_0 = acc1_1 = acc1_2 = None
    for dh in range(3):
        rows = xb[dh:dh + r1, :, :].reshape(r1 * wp, cp)          # bf16
        t0 = jnp.dot(rows, w1_ref[3 * dh + 0], preferred_element_type=jnp.float32)
        t1 = jnp.dot(rows, w1_ref[3 * dh + 1], preferred_element_type=jnp.float32)
        t2 = jnp.dot(rows, w1_ref[3 * dh + 2], preferred_element_type=jnp.float32)
        if dh == 0:
            acc1_0, acc1_1, acc1_2 = t0, t1, t2
        else:
            acc1_0 += t0
            acc1_1 += t1
            acc1_2 += t2

    a1_0 = acc1_0.reshape(r1, wp, cp)
    a1_1 = acc1_1.reshape(r1, wp, cp)
    a1_2 = acc1_2.reshape(r1, wp, cp)
    # Resolve the +/-1 column shift once, on the reduced accumulators; the center
    # tap and the interior start at the sublane-aligned column _LP.
    pre1 = (a1_1[:, _LP:_LP + w_img, :]
            + a1_0[:, _LP - 1:_LP - 1 + w_img, :]
            + a1_2[:, _LP + 1:_LP + 1 + w_img, :]
            + b1_ref[...])
    y1 = jnp.where(pre1 > 0, pre1, alpha1 * pre1)

    # Stage conv1 output in VMEM (never round-trips HBM); interior store is
    # sublane-aligned, W-halo columns stay zero.
    y1buf[:, _LP:_LP + w_img, :] = y1.astype(y1buf.dtype)

    # y1 rows that fall outside the image are conv2's zero padding in H.
    @pl.when(hb == 0)
    def _():
        y1buf[0, :, :] = jnp.zeros((wp, cp), y1buf.dtype)

    @pl.when(hb == n_hb - 1)
    def _():
        y1buf[r1 - 1, :, :] = jnp.zeros((wp, cp), y1buf.dtype)

    # --- conv2 (3x3 SAME) + bias + residual + PReLU ------------------------------
    acc2_0 = acc2_1 = acc2_2 = None
    for dh in range(3):
        rows = y1buf[dh:dh + th, :, :].reshape(th * wp, cp)       # bf16
        t0 = jnp.dot(rows, w2_ref[3 * dh + 0], preferred_element_type=jnp.float32)
        t1 = jnp.dot(rows, w2_ref[3 * dh + 1], preferred_element_type=jnp.float32)
        t2 = jnp.dot(rows, w2_ref[3 * dh + 2], preferred_element_type=jnp.float32)
        if dh == 0:
            acc2_0, acc2_1, acc2_2 = t0, t1, t2
        else:
            acc2_0 += t0
            acc2_1 += t1
            acc2_2 += t2

    c_0 = acc2_0.reshape(th, wp, cp)
    c_1 = acc2_1.reshape(th, wp, cp)
    c_2 = acc2_2.reshape(th, wp, cp)
    res = xb[2:2 + th, _LP:_LP + w_img, :].astype(jnp.float32)    # residual (aligned read)
    pre2 = (c_1[:, _LP:_LP + w_img, :]
            + c_0[:, _LP - 1:_LP - 1 + w_img, :]
            + c_2[:, _LP + 1:_LP + 1 + w_img, :]
            + b2_ref[...]
            + res)
    out_ref[0] = jnp.where(pre2 > 0, pre2, alpha2 * pre2).astype(out_ref.dtype)


# ----------------------------- host wrapper ---------------------------------

def _pack_weight(w_oihw, cp):
    """PyTorch conv weight (Cout, Cin, 3, 3) -> bf16 (9, Cp, Cp), tap k = kh*3 + kw."""
    cout, cin, kh, kw = w_oihw.shape
    w = jnp.transpose(w_oihw.astype(jnp.float32), (2, 3, 1, 0)).reshape(kh * kw, cin, cout)
    w = jnp.pad(w, ((0, 0), (0, cp - cin), (0, cp - cout)))
    return w.astype(jnp.bfloat16)


def _pick_block_rows(h, w, wp, cp, budget_bytes=36 << 20):
    """Largest divisor of h whose per-step VMEM footprint stays under budget."""
    # Per extra row: 2x bf16 input window + bf16 y1buf + 3 f32 tap accumulators
    # (compiler temporaries) + double-buffered f32 output block.
    per_row = (2 * 2 + 2 + 3 * 4) * wp * cp + 2 * 4 * w * cp
    # Fixed: double-buffered bf16 weights + the 4/2 halo rows' share of the scratch.
    fixed = 2 * 2 * 9 * cp * cp * 2 + 10 * (2 * 2 + 2 + 3 * 4) * wp * cp
    cap = max(1, (budget_bytes - fixed) // per_row)
    cap = int(min(cap, h, 256))
    for th in range(cap, 0, -1):
        if h % th == 0:
            return th
    # TODO(synk): prime H degrades to th == 1; use cdiv + masking for ragged H.
    return h


def basic_block_forward(x_nchw, params, *, block_rows=None):
    """Pallas TPU implementation of BasicBlock.forward (stride=1, Cin == Cout)."""
    w1, b1, a1, w2, b2, a2 = params
    n, c, h, w = x_nchw.shape
    cout = w1.shape[0]
    assert cout == c, "residual path requires in_channels == out_channels"

    cp = _round_up(max(c, cout, 128), 128)      # lane-dense channel padding
    # 8-column (sublane-aligned) left W halo + >=1 zero column on the right; keep wp
    # a multiple of 16 so bf16 (rows, W) reshapes stay layout-preserving.
    wp = _round_up(_LP + w + 1, 16)
    th = block_rows if block_rows is not None else _pick_block_rows(h, w, wp, cp)
    assert h % th == 0, "block_rows must divide H"
    n_hb = h // th

    x_nhwc = jnp.transpose(x_nchw, (0, 2, 3, 1)).astype(jnp.float32)
    # Zero-pad: 2 rows top/bottom (halo for both convs), _LP cols left, rest right,
    # channels up to cp; then bf16 (MXU-native, halves the window DMA).
    x_pad = jnp.pad(x_nhwc, ((0, 0), (2, 2), (_LP, wp - w - _LP), (0, cp - c)))
    x_pad = x_pad.astype(jnp.bfloat16)

    w1p = _pack_weight(w1, cp)
    w2p = _pack_weight(w2, cp)
    b1p = jnp.pad(jnp.ravel(b1).astype(jnp.float32), (0, cp - cout)).reshape(1, cp)
    b2p = jnp.pad(jnp.ravel(b2).astype(jnp.float32), (0, cp - cout)).reshape(1, cp)
    alphas = jnp.concatenate([jnp.ravel(jnp.asarray(a1, jnp.float32)),
                              jnp.ravel(jnp.asarray(a2, jnp.float32))])

    out_padded = pl.pallas_call(
        _basic_block_kernel,
        out_shape=jax.ShapeDtypeStruct((n, h, w, cp), jnp.float32),
        grid=(n, n_hb),
        in_specs=[
            pl.BlockSpec(memory_space=pltpu.MemorySpace.SMEM),          # PReLU alphas
            pl.BlockSpec(memory_space=pl.ANY),                          # x_pad stays in HBM
            pl.BlockSpec((9, cp, cp), lambda i, j: (0, 0, 0)),          # w1 (resident)
            pl.BlockSpec((1, cp), lambda i, j: (0, 0)),                 # b1
            pl.BlockSpec((9, cp, cp), lambda i, j: (0, 0, 0)),          # w2
            pl.BlockSpec((1, cp), lambda i, j: (0, 0)),                 # b2
        ],
        out_specs=pl.BlockSpec((1, th, w, cp), lambda i, j: (i, j, 0, 0)),
        scratch_shapes=[
            pltpu.VMEM((2, th + 4, wp, cp), jnp.bfloat16),   # double-buffered x window
            pltpu.VMEM((th + 2, wp, cp), jnp.bfloat16),      # staged conv1 output
            pltpu.SemaphoreType.DMA((2,)),
        ],
        compiler_params=pltpu.CompilerParams(
            dimension_semantics=("parallel", "arbitrary"),
            vmem_limit_bytes=48 * 1024 * 1024),
    )(alphas, x_pad, w1p, b1p, w2p, b2p)

    out = out_padded[:, :, :, :cout]
    return jnp.transpose(out, (0, 3, 1, 2))      # back to NCHW


# ---------------- Pure-JAX reference for sanity checking ----------------

def _reference(x, params):
    w1, b1, a1, w2, b2, a2 = params
    dn = ('NCHW', 'OIHW', 'NCHW')
    y = jax.lax.conv_general_dilated(x, w1, (1, 1), 'SAME', dimension_numbers=dn)
    y = y + b1[None, :, None, None]
    y = jnp.where(y > 0, y, a1 * y)
    y = jax.lax.conv_general_dilated(y, w2, (1, 1), 'SAME', dimension_numbers=dn)
    y = y + b2[None, :, None, None]
    y = y + x
    y = jnp.where(y > 0, y, a2 * y)
    return y


if __name__ == "__main__":
    # Small shapes: batch=2, in_channels=out_channels=4, spatial=16, stride=1.
    N, C, H, W = 2, 4, 16, 16
    Cout = C

    key = jax.random.PRNGKey(0)
    kx, kw1, kb1, kw2, kb2 = jax.random.split(key, 5)

    x = jax.random.normal(kx, (N, C, H, W), dtype=jnp.float32)

    # Deterministic synthetic params (PReLU alpha = PyTorch default 0.25).
    w1 = 0.1 * jax.random.normal(kw1, (Cout, C, 3, 3), dtype=jnp.float32)
    b1 = 0.1 * jax.random.normal(kb1, (Cout,), dtype=jnp.float32)
    a1 = jnp.float32(0.25)
    w2 = 0.1 * jax.random.normal(kw2, (Cout, Cout, 3, 3), dtype=jnp.float32)
    b2 = 0.1 * jax.random.normal(kb2, (Cout,), dtype=jnp.float32)
    a2 = jnp.float32(0.25)

    params = (w1, b1, a1, w2, b2, a2)

    # block_rows=8 -> grid (2, 2): exercises both the interior and boundary halo paths.
    fwd = jax.jit(functools.partial(basic_block_forward, block_rows=8))
    out = jax.block_until_ready(fwd(x, params))

    # Reference with the same bf16 input/weight quantization the kernel applies
    # (activations/weights are bf16 on the MXU; accumulation stays f32).
    def _q(t):
        return t.astype(jnp.bfloat16).astype(jnp.float32)

    ref = jax.block_until_ready(_reference(_q(x), (_q(w1), b1, a1, _q(w2), b2, a2)))
    assert out.shape == (N, Cout, H, W)
    assert jnp.allclose(out, ref, atol=2e-2, rtol=2e-2), "Pallas output mismatch vs reference"

    print("KERNEL_OK")
</pallas_src>

<mosaic_0001>
module attributes {stable_mosaic.version = 11 : i64} {
  func.func @_basic_block_kernel(%arg0: i32, %arg1: i32, %arg2: memref<2xf32, #tpu.memory_space<smem>>, %arg3: memref<2x20x32x128xbf16, #tpu.memory_space<any>>, %arg4: memref<9x128x128xbf16, #tpu.memory_space<vmem>>, %arg5: memref<1x128xf32, #tpu.memory_space<vmem>>, %arg6: memref<9x128x128xbf16, #tpu.memory_space<vmem>>, %arg7: memref<1x128xf32, #tpu.memory_space<vmem>>, %arg8: memref<1x8x16x128xf32, #tpu.memory_space<vmem>>, %arg9: memref<2x12x32x128xbf16, #tpu.memory_space<vmem>>, %arg10: memref<10x32x128xbf16, #tpu.memory_space<vmem>>, %arg11: memref<2x!tpu.dma_semaphore, #tpu.memory_space<semaphore_mem>>) attributes {dimension_semantics = [#tpu.dimension_semantics<parallel>, #tpu.dimension_semantics<arbitrary>], iteration_bounds = array<i64: 2, 2>, scalar_prefetch = 0 : i64, scratch_operands = 3 : i64, tpu.core_type = #tpu.core_type<tc>, window_params = [{transform_indices = @transform_0, window_bounds = array<i64: 2>}, {}, {pipeline_mode = #tpu.pipeline_mode<synchronous>, transform_indices = @transform_2, window_bounds = array<i64: 9, 128, 128>}, {pipeline_mode = #tpu.pipeline_mode<synchronous>, transform_indices = @transform_3, window_bounds = array<i64: 1, 128>}, {pipeline_mode = #tpu.pipeline_mode<synchronous>, transform_indices = @transform_4, window_bounds = array<i64: 9, 128, 128>}, {pipeline_mode = #tpu.pipeline_mode<synchronous>, transform_indices = @transform_5, window_bounds = array<i64: 1, 128>}, {transform_indices = @transform_6, window_bounds = array<i64: 1, 8, 16, 128>}]} {
    %c2_i32 = arith.constant 2 : i32
    %0 = arith.remsi %arg1, %c2_i32 : i32
    %c0_i32 = arith.constant 0 : i32
    %1 = arith.cmpi eq, %arg1, %c0_i32 : i32
    %2 = arith.extui %1 : i1 to i32
    %c0_i32_0 = arith.constant 0 : i32
    %3 = arith.cmpi ne, %2, %c0_i32_0 : i32
    scf.if %3 {
      %c0_i32_124 = arith.constant 0 : i32
      %c0_i32_125 = arith.constant 0 : i32
      %c0_i32_126 = arith.constant 0 : i32
      %c0_i32_127 = arith.constant 0 : i32
      %c0_i32_128 = arith.constant 0 : i32
      %154 = tpu.memref_slice %arg3[%arg0, %c0_i32_126, %c0_i32_127, %c0_i32_128] : memref<2x20x32x128xbf16, #tpu.memory_space<any>> -> memref<1x12x32x128xbf16, #tpu.memory_space<any>>
      %155 = tpu.memref_squeeze %154 : memref<1x12x32x128xbf16, #tpu.memory_space<any>> -> memref<12x32x128xbf16, #tpu.memory_space<any>>
      %c0_i32_129 = arith.constant 0 : i32
      %c0_i32_130 = arith.constant 0 : i32
      %c0_i32_131 = arith.constant 0 : i32
      %156 = tpu.memref_slice %arg9[%c0_i32_124, %c0_i32_129, %c0_i32_130, %c0_i32_131] : memref<2x12x32x128xbf16, #tpu.memory_space<vmem>> -> memref<1x12x32x128xbf16, #tpu.memory_space<vmem>>
      %157 = tpu.memref_squeeze %156 : memref<1x12x32x128xbf16, #tpu.memory_space<vmem>> -> memref<12x32x128xbf16, #tpu.memory_space<vmem>>
      %158 = tpu.memref_slice %arg11[%c0_i32_125] : memref<2x!tpu.dma_semaphore, #tpu.memory_space<semaphore_mem>> -> memref<1x!tpu.dma_semaphore, #tpu.memory_space<semaphore_mem>>
      %159 = tpu.memref_squeeze %158 : memref<1x!tpu.dma_semaphore, #tpu.memory_space<semaphore_mem>> -> memref<!tpu.dma_semaphore, #tpu.memory_space<semaphore_mem>>
      tpu.enqueue_dma source(%155 : memref<12x32x128xbf16, #tpu.memory_space<any>>) target(%157 : memref<12x32x128xbf16, #tpu.memory_space<vmem>>) target_semaphore(%159 : memref<!tpu.dma_semaphore, #tpu.memory_space<semaphore_mem>>)
    } else {
    }
    %c8_i32 = arith.constant 8 : i32
    %4 = arith.muli %arg1, %c8_i32 : i32
    %c0_i32_1 = arith.constant 0 : i32
    %c0_i32_2 = arith.constant 0 : i32
    %5 = tpu.memref_slice %arg3[%arg0, %4, %c0_i32_1, %c0_i32_2] : memref<2x20x32x128xbf16, #tpu.memory_space<any>> -> memref<1x12x32x128xbf16, #tpu.memory_space<any>>
    %6 = tpu.memref_squeeze %5 : memref<1x12x32x128xbf16, #tpu.memory_space<any>> -> memref<12x32x128xbf16, #tpu.memory_space<any>>
    %c0_i32_3 = arith.constant 0 : i32
    %c0_i32_4 = arith.constant 0 : i32
    %c0_i32_5 = arith.constant 0 : i32
    %7 = tpu.memref_slice %arg9[%0, %c0_i32_3, %c0_i32_4, %c0_i32_5] : memref<2x12x32x128xbf16, #tpu.memory_space<vmem>> -> memref<1x12x32x128xbf16, #tpu.memory_space<vmem>>
    %8 = tpu.memref_squeeze %7 : memref<1x12x32x128xbf16, #tpu.memory_space<vmem>> -> memref<12x32x128xbf16, #tpu.memory_space<vmem>>
    %9 = tpu.memref_slice %arg11[%0] : memref<2x!tpu.dma_semaphore, #tpu.memory_space<semaphore_mem>> -> memref<1x!tpu.dma_semaphore, #tpu.memory_space<semaphore_mem>>
    %10 = tpu.memref_squeeze %9 : memref<1x!tpu.dma_semaphore, #tpu.memory_space<semaphore_mem>> -> memref<!tpu.dma_semaphore, #tpu.memory_space<semaphore_mem>>
    tpu.wait_dma2 semaphore(%10 : memref<!tpu.dma_semaphore, #tpu.memory_space<semaphore_mem>>) src(%6 : memref<12x32x128xbf16, #tpu.memory_space<any>>) dst(%8 : memref<12x32x128xbf16, #tpu.memory_space<vmem>>)
    %c1_i32 = arith.constant 1 : i32
    %11 = arith.addi %arg1, %c1_i32 : i32
    %c2_i32_6 = arith.constant 2 : i32
    %12 = arith.cmpi slt, %11, %c2_i32_6 : i32
    %13 = arith.extui %12 : i1 to i32
    %c0_i32_7 = arith.constant 0 : i32
    %14 = arith.cmpi ne, %13, %c0_i32_7 : i32
    scf.if %14 {
      %c1_i32_124 = arith.constant 1 : i32
      %154 = arith.addi %arg1, %c1_i32_124 : i32
      %c8_i32_125 = arith.constant 8 : i32
      %155 = arith.muli %154, %c8_i32_125 : i32
      %c1_i32_126 = arith.constant 1 : i32
      %156 = arith.subi %c1_i32_126, %0 : i32
      %c0_i32_127 = arith.constant 0 : i32
      %c0_i32_128 = arith.constant 0 : i32
      %157 = tpu.memref_slice %arg3[%arg0, %155, %c0_i32_127, %c0_i32_128] : memref<2x20x32x128xbf16, #tpu.memory_space<any>> -> memref<1x12x32x128xbf16, #tpu.memory_space<any>>
      %158 = tpu.memref_squeeze %157 : memref<1x12x32x128xbf16, #tpu.memory_space<any>> -> memref<12x32x128xbf16, #tpu.memory_space<any>>
      %c0_i32_129 = arith.constant 0 : i32
      %c0_i32_130 = arith.constant 0 : i32
      %c0_i32_131 = arith.constant 0 : i32
      %159 = tpu.memref_slice %arg9[%156, %c0_i32_129, %c0_i32_130, %c0_i32_131] : memref<2x12x32x128xbf16, #tpu.memory_space<vmem>> -> memref<1x12x32x128xbf16, #tpu.memory_space<vmem>>
      %160 = tpu.memref_squeeze %159 : memref<1x12x32x128xbf16, #tpu.memory_space<vmem>> -> memref<12x32x128xbf16, #tpu.memory_space<vmem>>
      %161 = tpu.memref_slice %arg11[%156] : memref<2x!tpu.dma_semaphore, #tpu.memory_space<semaphore_mem>> -> memref<1x!tpu.dma_semaphore, #tpu.memory_space<semaphore_mem>>
      %162 = tpu.memref_squeeze %161 : memref<1x!tpu.dma_semaphore, #tpu.memory_space<semaphore_mem>> -> memref<!tpu.dma_semaphore, #tpu.memory_space<semaphore_mem>>
      tpu.enqueue_dma source(%158 : memref<12x32x128xbf16, #tpu.memory_space<any>>) target(%160 : memref<12x32x128xbf16, #tpu.memory_space<vmem>>) target_semaphore(%162 : memref<!tpu.dma_semaphore, #tpu.memory_space<semaphore_mem>>)
    } else {
    }
    %c0 = arith.constant 0 : index
    %15 = memref.load %arg2[%c0] : memref<2xf32, #tpu.memory_space<smem>>
    %c1 = arith.constant 1 : index
    %16 = memref.load %arg2[%c1] : memref<2xf32, #tpu.memory_space<smem>>
    %c0_i32_8 = arith.constant 0 : i32
    %17 = arith.cmpi eq, %arg1, %c0_i32_8 : i32
    %18 = arith.extui %17 : i1 to i32
    %c0_i32_9 = arith.constant 0 : i32
    %19 = arith.cmpi ne, %18, %c0_i32_9 : i32
    scf.if %19 {
      %cst_124 = arith.constant 0.000000e+00 : bf16
      %154 = vector.broadcast %cst_124 : bf16 to vector<10x8x128xbf16>
      %c0_125 = arith.constant 0 : index
      %c0_126 = arith.constant 0 : index
      %c0_127 = arith.constant 0 : index
      %155 = vector.load %arg10[%c0_125, %c0_126, %c0_127] : memref<10x32x128xbf16, #tpu.memory_space<vmem>>, vector<10x8x128xbf16>
      tpu.vector_store %arg10[%c0_125, %c0_126, %c0_127], %154 {strides = array<i32>} : memref<10x32x128xbf16, #tpu.memory_space<vmem>>, vector<10x8x128xbf16>,
      %cst_128 = arith.constant 0.000000e+00 : bf16
      %156 = vector.broadcast %cst_128 : bf16 to vector<10x8x128xbf16>
      %c0_129 = arith.constant 0 : index
      %c24 = arith.constant 24 : index
      %c0_130 = arith.constant 0 : index
      %157 = vector.load %arg10[%c0_129, %c24, %c0_130] : memref<10x32x128xbf16, #tpu.memory_space<vmem>>, vector<10x8x128xbf16>
      tpu.vector_store %arg10[%c0_129, %c24, %c0_130], %156 {strides = array<i32>} : memref<10x32x128xbf16, #tpu.memory_space<vmem>>, vector<10x8x128xbf16>,
    } else {
    }
    %c0_i32_10 = arith.constant 0 : i32
    %c0_i32_11 = arith.constant 0 : i32
    %c0_i32_12 = arith.constant 0 : i32
    %20 = tpu.memref_slice %arg9[%0, %c0_i32_10, %c0_i32_11, %c0_i32_12] : memref<2x12x32x128xbf16, #tpu.memory_space<vmem>> -> memref<1x12x32x128xbf16, #tpu.memory_space<vmem>>
    %21 = tpu.memref_squeeze %20 : memref<1x12x32x128xbf16, #tpu.memory_space<vmem>> -> memref<12x32x128xbf16, #tpu.memory_space<vmem>>
    %c0_13 = arith.constant 0 : index
    %c0_14 = arith.constant 0 : index
    %c0_15 = arith.constant 0 : index
    %22 = vector.load %21[%c0_13, %c0_14, %c0_15] : memref<12x32x128xbf16, #tpu.memory_space<vmem>>, vector<10x32x128xbf16>
    %23 = vector.shape_cast %22 : vector<10x32x128xbf16> to vector<320x128xbf16>
    %c0_16 = arith.constant 0 : index
    %c0_17 = arith.constant 0 : index
    %c0_18 = arith.constant 0 : index
    %24 = vector.load %arg4[%c0_16, %c0_17, %c0_18] : memref<9x128x128xbf16, #tpu.memory_space<vmem>>, vector<1x128x128xbf16>
    %25 = vector.shape_cast %24 : vector<1x128x128xbf16> to vector<128x128xbf16>
    %cst = arith.constant dense<0.000000e+00> : vector<320x128xf32>
    %26 = tpu.matmul %23, %25, %cst {dimension_numbers = #tpu.dot_dimension_numbers<[1], [0], [0], [1], [0, 0, 1, 1], [], []>} : vector<320x128xbf16>, vector<128x128xbf16>, vector<320x128xf32> -> vector<320x128xf32>
    %c1_19 = arith.constant 1 : index
    %c0_20 = arith.constant 0 : index
    %c0_21 = arith.constant 0 : index
    %27 = vector.load %arg4[%c1_19, %c0_20, %c0_21] : memref<9x128x128xbf16, #tpu.memory_space<vmem>>, vector<1x128x128xbf16>
    %28 = vector.shape_cast %27 : vector<1x128x128xbf16> to vector<128x128xbf16>
    %cst_22 = arith.constant dense<0.000000e+00> : vector<320x128xf32>
    %29 = tpu.matmul %23, %28, %cst_22 {dimension_numbers = #tpu.dot_dimension_numbers<[1], [0], [0], [1], [0, 0, 1, 1], [], []>} : vector<320x128xbf16>, vector<128x128xbf16>, vector<320x128xf32> -> vector<320x128xf32>
    %c2 = arith.constant 2 : index
    %c0_23 = arith.constant 0 : index
    %c0_24 = arith.constant 0 : index
    %30 = vector.load %arg4[%c2, %c0_23, %c0_24] : memref<9x128x128xbf16, #tpu.memory_space<vmem>>, vector<1x128x128xbf16>
    %31 = vector.shape_cast %30 : vector<1x128x128xbf16> to vector<128x128xbf16>
    %cst_25 = arith.constant dense<0.000000e+00> : vector<320x128xf32>
    %32 = tpu.matmul %23, %31, %cst_25 {dimension_numbers = #tpu.dot_dimension_numbers<[1], [0], [0], [1], [0, 0, 1, 1], [], []>} : vector<320x128xbf16>, vector<128x128xbf16>, vector<320x128xf32> -> vector<320x128xf32>
    %c0_i32_26 = arith.constant 0 : i32
    %c0_i32_27 = arith.constant 0 : i32
    %c0_i32_28 = arith.constant 0 : i32
    %33 = tpu.memref_slice %arg9[%0, %c0_i32_26, %c0_i32_27, %c0_i32_28] : memref<2x12x32x128xbf16, #tpu.memory_space<vmem>> -> memref<1x12x32x128xbf16, #tpu.memory_space<vmem>>
    %34 = tpu.memref_squeeze %33 : memref<1x12x32x128xbf16, #tpu.memory_space<vmem>> -> memref<12x32x128xbf16, #tpu.memory_space<vmem>>
    %c1_29 = arith.constant 1 : index
    %c0_30 = arith.constant 0 : index
    %c0_31 = arith.constant 0 : index
    %35 = vector.load %34[%c1_29, %c0_30, %c0_31] : memref<12x32x128xbf16, #tpu.memory_space<vmem>>, vector<10x32x128xbf16>
    %36 = vector.shape_cast %35 : vector<10x32x128xbf16> to vector<320x128xbf16>
    %c3 = arith.constant 3 : index
    %c0_32 = arith.constant 0 : index
    %c0_33 = arith.constant 0 : index
    %37 = vector.load %arg4[%c3, %c0_32, %c0_33] : memref<9x128x128xbf16, #tpu.memory_space<vmem>>, vector<1x128x128xbf16>
    %38 = vector.shape_cast %37 : vector<1x128x128xbf16> to vector<128x128xbf16>
    %cst_34 = arith.constant dense<0.000000e+00> : vector<320x128xf32>
    %39 = tpu.matmul %36, %38, %cst_34 {dimension_numbers = #tpu.dot_dimension_numbers<[1], [0], [0], [1], [0, 0, 1, 1], [], []>} : vector<320x128xbf16>, vector<128x128xbf16>, vector<320x128xf32> -> vector<320x128xf32>
    %c4 = arith.constant 4 : index
    %c0_35 = arith.constant 0 : index
    %c0_36 = arith.constant 0 : index
    %40 = vector.load %arg4[%c4, %c0_35, %c0_36] : memref<9x128x128xbf16, #tpu.memory_space<vmem>>, vector<1x128x128xbf16>
    %41 = vector.shape_cast %40 : vector<1x128x128xbf16> to vector<128x128xbf16>
    %cst_37 = arith.constant dense<0.000000e+00> : vector<320x128xf32>
    %42 = tpu.matmul %36, %41, %cst_37 {dimension_numbers = #tpu.dot_dimension_numbers<[1], [0], [0], [1], [0, 0, 1, 1], [], []>} : vector<320x128xbf16>, vector<128x128xbf16>, vector<320x128xf32> -> vector<320x128xf32>
    %c5 = arith.constant 5 : index
    %c0_38 = arith.constant 0 : index
    %c0_39 = arith.constant 0 : index
    %43 = vector.load %arg4[%c5, %c0_38, %c0_39] : memref<9x128x128xbf16, #tpu.memory_space<vmem>>, vector<1x128x128xbf16>
    %44 = vector.shape_cast %43 : vector<1x128x128xbf16> to vector<128x128xbf16>
    %cst_40 = arith.constant dense<0.000000e+00> : vector<320x128xf32>
    %45 = tpu.matmul %36, %44, %cst_40 {dimension_numbers = #tpu.dot_dimension_numbers<[1], [0], [0], [1], [0, 0, 1, 1], [], []>} : vector<320x128xbf16>, vector<128x128xbf16>, vector<320x128xf32> -> vector<320x128xf32>
    %46 = arith.addf %26, %39 : vector<320x128xf32>
    %47 = arith.addf %29, %42 : vector<320x128xf32>
    %48 = arith.addf %32, %45 : vector<320x128xf32>
    %c0_i32_41 = arith.constant 0 : i32
    %c0_i32_42 = arith.constant 0 : i32
    %c0_i32_43 = arith.constant 0 : i32
    %49 = tpu.memref_slice %arg9[%0, %c0_i32_41, %c0_i32_42, %c0_i32_43] : memref<2x12x32x128xbf16, #tpu.memory_space<vmem>> -> memref<1x12x32x128xbf16, #tpu.memory_space<vmem>>
    %50 = tpu.memref_squeeze %49 : memref<1x12x32x128xbf16, #tpu.memory_space<vmem>> -> memref<12x32x128xbf16, #tpu.memory_space<vmem>>
    %c2_44 = arith.constant 2 : index
    %c0_45 = arith.constant 0 : index
    %c0_46 = arith.constant 0 : index
    %51 = vector.load %50[%c2_44, %c0_45, %c0_46] : memref<12x32x128xbf16, #tpu.memory_space<vmem>>, vector<10x32x128xbf16>
    %52 = vector.shape_cast %51 : vector<10x32x128xbf16> to vector<320x128xbf16>
    %c6 = arith.constant 6 : index
    %c0_47 = arith.constant 0 : index
    %c0_48 = arith.constant 0 : index
    %53 = vector.load %arg4[%c6, %c0_47, %c0_48] : memref<9x128x128xbf16, #tpu.memory_space<vmem>>, vector<1x128x128xbf16>
    %54 = vector.shape_cast %53 : vector<1x128x128xbf16> to vector<128x128xbf16>
    %cst_49 = arith.constant dense<0.000000e+00> : vector<320x128xf32>
    %55 = tpu.matmul %52, %54, %cst_49 {dimension_numbers = #tpu.dot_dimension_numbers<[1], [0], [0], [1], [0, 0, 1, 1], [], []>} : vector<320x128xbf16>, vector<128x128xbf16>, vector<320x128xf32> -> vector<320x128xf32>
    %c7 = arith.constant 7 : index
    %c0_50 = arith.constant 0 : index
    %c0_51 = arith.constant 0 : index
    %56 = vector.load %arg4[%c7, %c0_50, %c0_51] : memref<9x128x128xbf16, #tpu.memory_space<vmem>>, vector<1x128x128xbf16>
    %57 = vector.shape_cast %56 : vector<1x128x128xbf16> to vector<128x128xbf16>
    %cst_52 = arith.constant dense<0.000000e+00> : vector<320x128xf32>
    %58 = tpu.matmul %52, %57, %cst_52 {dimension_numbers = #tpu.dot_dimension_numbers<[1], [0], [0], [1], [0, 0, 1, 1], [], []>} : vector<320x128xbf16>, vector<128x128xbf16>, vector<320x128xf32> -> vector<320x128xf32>
    %c8 = arith.constant 8 : index
    %c0_53 = arith.constant 0 : index
    %c0_54 = arith.constant 0 : index
    %59 = vector.load %arg4[%c8, %c0_53, %c0_54] : memref<9x128x128xbf16, #tpu.memory_space<vmem>>, vector<1x128x128xbf16>
    %60 = vector.shape_cast %59 : vector<1x128x128xbf16> to vector<128x128xbf16>
    %cst_55 = arith.constant dense<0.000000e+00> : vector<320x128xf32>
    %61 = tpu.matmul %52, %60, %cst_55 {dimension_numbers = #tpu.dot_dimension_numbers<[1], [0], [0], [1], [0, 0, 1, 1], [], []>} : vector<320x128xbf16>, vector<128x128xbf16>, vector<320x128xf32> -> vector<320x128xf32>
    %62 = arith.addf %46, %55 : vector<320x128xf32>
    %63 = arith.addf %47, %58 : vector<320x128xf32>
    %64 = arith.addf %48, %61 : vector<320x128xf32>
    %65 = vector.shape_cast %62 : vector<320x128xf32> to vector<10x32x128xf32>
    %66 = vector.shape_cast %63 : vector<320x128xf32> to vector<10x32x128xf32>
    %67 = vector.shape_cast %64 : vector<320x128xf32> to vector<10x32x128xf32>
    %68 = vector.extract_strided_slice %66 {offsets = [0, 8, 0], sizes = [10, 16, 128], strides = [1, 1, 1]} : vector<10x32x128xf32> to vector<10x16x128xf32>
    %69 = vector.extract_strided_slice %65 {offsets = [0, 7, 0], sizes = [10, 16, 128], strides = [1, 1, 1]} : vector<10x32x128xf32> to vector<10x16x128xf32>
    %70 = arith.addf %68, %69 : vector<10x16x128xf32>
    %71 = vector.extract_strided_slice %67 {offsets = [0, 9, 0], sizes = [10, 16, 128], strides = [1, 1, 1]} : vector<10x32x128xf32> to vector<10x16x128xf32>
    %72 = arith.addf %70, %71 : vector<10x16x128xf32>
    %c0_56 = arith.constant 0 : index
    %c0_57 = arith.constant 0 : index
    %73 = vector.load %arg5[%c0_56, %c0_57] : memref<1x128xf32, #tpu.memory_space<vmem>>, vector<1x128xf32>
    %74 = vector.shape_cast %73 : vector<1x128xf32> to vector<1x1x128xf32>
    %75 = vector.broadcast %74 : vector<1x1x128xf32> to vector<10x16x128xf32>
    %76 = arith.addf %72, %75 : vector<10x16x128xf32>
    %cst_58 = arith.constant 0.000000e+00 : f32
    %77 = vector.broadcast %cst_58 : f32 to vector<10x16x128xf32>
    %78 = arith.cmpf ogt, %76, %77 : vector<10x16x128xf32>
    %79 = vector.broadcast %15 : f32 to vector<10x16x128xf32>
    %80 = arith.mulf %79, %76 : vector<10x16x128xf32>
    %81 = arith.select %78, %76, %80 : vector<10x16x128xi1>, vector<10x16x128xf32>
    %82 = arith.truncf %81 : vector<10x16x128xf32> to vector<10x16x128xbf16>
    %c0_59 = arith.constant 0 : index
    %c8_60 = arith.constant 8 : index
    %c0_61 = arith.constant 0 : index
    %83 = vector.load %arg10[%c0_59, %c8_60, %c0_61] : memref<10x32x128xbf16, #tpu.memory_space<vmem>>, vector<10x16x128xbf16>
    tpu.vector_store %arg10[%c0_59, %c8_60, %c0_61], %82 {strides = array<i32>} : memref<10x32x128xbf16, #tpu.memory_space<vmem>>, vector<10x16x128xbf16>,
    %c0_i32_62 = arith.constant 0 : i32
    %84 = arith.cmpi eq, %arg1, %c0_i32_62 : i32
    %85 = arith.extui %84 : i1 to i32
    %c0_i32_63 = arith.constant 0 : i32
    %86 = arith.cmpi ne, %85, %c0_i32_63 : i32
    scf.if %86 {
      %cst_124 = arith.constant 0.000000e+00 : bf16
      %154 = vector.broadcast %cst_124 : bf16 to vector<32x128xbf16>
      %c0_125 = arith.constant 0 : index
      %c0_126 = arith.constant 0 : index
      %c0_127 = arith.constant 0 : index
      %155 = vector.load %arg10[%c0_125, %c0_126, %c0_127] : memref<10x32x128xbf16, #tpu.memory_space<vmem>>, vector<1x32x128xbf16>
      %156 = vector.shape_cast %155 : vector<1x32x128xbf16> to vector<32x128xbf16>
      %157 = vector.shape_cast %154 : vector<32x128xbf16> to vector<1x32x128xbf16>
      tpu.vector_store %arg10[%c0_125, %c0_126, %c0_127], %157 {strides = array<i32>} : memref<10x32x128xbf16, #tpu.memory_space<vmem>>, vector<1x32x128xbf16>,
    } else {
    }
    %c1_i32_64 = arith.constant 1 : i32
    %87 = arith.cmpi eq, %arg1, %c1_i32_64 : i32
    %88 = arith.extui %87 : i1 to i32
    %c0_i32_65 = arith.constant 0 : i32
    %89 = arith.cmpi ne, %88, %c0_i32_65 : i32
    scf.if %89 {
      %cst_124 = arith.constant 0.000000e+00 : bf16
      %154 = vector.broadcast %cst_124 : bf16 to vector<32x128xbf16>
      %c9 = arith.constant 9 : index
      %c0_125 = arith.constant 0 : index
      %c0_126 = arith.constant 0 : index
      %155 = vector.load %arg10[%c9, %c0_125, %c0_126] : memref<10x32x128xbf16, #tpu.memory_space<vmem>>, vector<1x32x128xbf16>
      %156 = vector.shape_cast %155 : vector<1x32x128xbf16> to vector<32x128xbf16>
      %157 = vector.shape_cast %154 : vector<32x128xbf16> to vector<1x32x128xbf16>
      tpu.vector_store %arg10[%c9, %c0_125, %c0_126], %157 {strides = array<i32>} : memref<10x32x128xbf16, #tpu.memory_space<vmem>>, vector<1x32x128xbf16>,
    } else {
    }
    %c0_66 = arith.constant 0 : index
    %c0_67 = arith.constant 0 : index
    %c0_68 = arith.constant 0 : index
    %90 = vector.load %arg10[%c0_66, %c0_67, %c0_68] : memref<10x32x128xbf16, #tpu.memory_space<vmem>>, vector<8x32x128xbf16>
    %91 = vector.shape_cast %90 : vector<8x32x128xbf16> to vector<256x128xbf16>
    %c0_69 = arith.constant 0 : index
    %c0_70 = arith.constant 0 : index
    %c0_71 = arith.constant 0 : index
    %92 = vector.load %arg6[%c0_69, %c0_70, %c0_71] : memref<9x128x128xbf16, #tpu.memory_space<vmem>>, vector<1x128x128xbf16>
    %93 = vector.shape_cast %92 : vector<1x128x128xbf16> to vector<128x128xbf16>
    %cst_72 = arith.constant dense<0.000000e+00> : vector<256x128xf32>
    %94 = tpu.matmul %91, %93, %cst_72 {dimension_numbers = #tpu.dot_dimension_numbers<[1], [0], [0], [1], [0, 0, 1, 1], [], []>} : vector<256x128xbf16>, vector<128x128xbf16>, vector<256x128xf32> -> vector<256x128xf32>
    %c1_73 = arith.constant 1 : index
    %c0_74 = arith.constant 0 : index
    %c0_75 = arith.constant 0 : index
    %95 = vector.load %arg6[%c1_73, %c0_74, %c0_75] : memref<9x128x128xbf16, #tpu.memory_space<vmem>>, vector<1x128x128xbf16>
    %96 = vector.shape_cast %95 : vector<1x128x128xbf16> to vector<128x128xbf16>
    %cst_76 = arith.constant dense<0.000000e+00> : vector<256x128xf32>
    %97 = tpu.matmul %91, %96, %cst_76 {dimension_numbers = #tpu.dot_dimension_numbers<[1], [0], [0], [1], [0, 0, 1, 1], [], []>} : vector<256x128xbf16>, vector<128x128xbf16>, vector<256x128xf32> -> vector<256x128xf32>
    %c2_77 = arith.constant 2 : index
    %c0_78 = arith.constant 0 : index
    %c0_79 = arith.constant 0 : index
    %98 = vector.load %arg6[%c2_77, %c0_78, %c0_79] : memref<9x128x128xbf16, #tpu.memory_space<vmem>>, vector<1x128x128xbf16>
    %99 = vector.shape_cast %98 : vector<1x128x128xbf16> to vector<128x128xbf16>
    %cst_80 = arith.constant dense<0.000000e+00> : vector<256x128xf32>
    %100 = tpu.matmul %91, %99, %cst_80 {dimension_numbers = #tpu.dot_dimension_numbers<[1], [0], [0], [1], [0, 0, 1, 1], [], []>} : vector<256x128xbf16>, vector<128x128xbf16>, vector<256x128xf32> -> vector<256x128xf32>
    %c1_81 = arith.constant 1 : index
    %c0_82 = arith.constant 0 : index
    %c0_83 = arith.constant 0 : index
    %101 = vector.load %arg10[%c1_81, %c0_82, %c0_83] : memref<10x32x128xbf16, #tpu.memory_space<vmem>>, vector<8x32x128xbf16>
    %102 = vector.shape_cast %101 : vector<8x32x128xbf16> to vector<256x128xbf16>
    %c3_84 = arith.constant 3 : index
    %c0_85 = arith.constant 0 : index
    %c0_86 = arith.constant 0 : index
    %103 = vector.load %arg6[%c3_84, %c0_85, %c0_86] : memref<9x128x128xbf16, #tpu.memory_space<vmem>>, vector<1x128x128xbf16>
    %104 = vector.shape_cast %103 : vector<1x128x128xbf16> to vector<128x128xbf16>
    %cst_87 = arith.constant dense<0.000000e+00> : vector<256x128xf32>
    %105 = tpu.matmul %102, %104, %cst_87 {dimension_numbers = #tpu.dot_dimension_numbers<[1], [0], [0], [1], [0, 0, 1, 1], [], []>} : vector<256x128xbf16>, vector<128x128xbf16>, vector<256x128xf32> -> vector<256x128xf32>
    %c4_88 = arith.constant 4 : index
    %c0_89 = arith.constant 0 : index
    %c0_90 = arith.constant 0 : index
    %106 = vector.load %arg6[%c4_88, %c0_89, %c0_90] : memref<9x128x128xbf16, #tpu.memory_space<vmem>>, vector<1x128x128xbf16>
    %107 = vector.shape_cast %106 : vector<1x128x128xbf16> to vector<128x128xbf16>
    %cst_91 = arith.constant dense<0.000000e+00> : vector<256x128xf32>
    %108 = tpu.matmul %102, %107, %cst_91 {dimension_numbers = #tpu.dot_dimension_numbers<[1], [0], [0], [1], [0, 0, 1, 1], [], []>} : vector<256x128xbf16>, vector<128x128xbf16>, vector<256x128xf32> -> vector<256x128xf32>
    %c5_92 = arith.constant 5 : index
    %c0_93 = arith.constant 0 : index
    %c0_94 = arith.constant 0 : index
    %109 = vector.load %arg6[%c5_92, %c0_93, %c0_94] : memref<9x128x128xbf16, #tpu.memory_space<vmem>>, vector<1x128x128xbf16>
    %110 = vector.shape_cast %109 : vector<1x128x128xbf16> to vector<128x128xbf16>
    %cst_95 = arith.constant dense<0.000000e+00> : vector<256x128xf32>
    %111 = tpu.matmul %102, %110, %cst_95 {dimension_numbers = #tpu.dot_dimension_numbers<[1], [0], [0], [1], [0, 0, 1, 1], [], []>} : vector<256x128xbf16>, vector<128x128xbf16>, vector<256x128xf32> -> vector<256x128xf32>
    %112 = arith.addf %94, %105 : vector<256x128xf32>
    %113 = arith.addf %97, %108 : vector<256x128xf32>
    %114 = arith.addf %100, %111 : vector<256x128xf32>
    %c2_96 = arith.constant 2 : index
    %c0_97 = arith.constant 0 : index
    %c0_98 = arith.constant 0 : index
    %115 = vector.load %arg10[%c2_96, %c0_97, %c0_98] : memref<10x32x128xbf16, #tpu.memory_space<vmem>>, vector<8x32x128xbf16>
    %116 = vector.shape_cast %115 : vector<8x32x128xbf16> to vector<256x128xbf16>
    %c6_99 = arith.constant 6 : index
    %c0_100 = arith.constant 0 : index
    %c0_101 = arith.constant 0 : index
    %117 = vector.load %arg6[%c6_99, %c0_100, %c0_101] : memref<9x128x128xbf16, #tpu.memory_space<vmem>>, vector<1x128x128xbf16>
    %118 = vector.shape_cast %117 : vector<1x128x128xbf16> to vector<128x128xbf16>
    %cst_102 = arith.constant dense<0.000000e+00> : vector<256x128xf32>
    %119 = tpu.matmul %116, %118, %cst_102 {dimension_numbers = #tpu.dot_dimension_numbers<[1], [0], [0], [1], [0, 0, 1, 1], [], []>} : vector<256x128xbf16>, vector<128x128xbf16>, vector<256x128xf32> -> vector<256x128xf32>
    %c7_103 = arith.constant 7 : index
    %c0_104 = arith.constant 0 : index
    %c0_105 = arith.constant 0 : index
    %120 = vector.load %arg6[%c7_103, %c0_104, %c0_105] : memref<9x128x128xbf16, #tpu.memory_space<vmem>>, vector<1x128x128xbf16>
    %121 = vector.shape_cast %120 : vector<1x128x128xbf16> to vector<128x128xbf16>
    %cst_106 = arith.constant dense<0.000000e+00> : vector<256x128xf32>
    %122 = tpu.matmul %116, %121, %cst_106 {dimension_numbers = #tpu.dot_dimension_numbers<[1], [0], [0], [1], [0, 0, 1, 1], [], []>} : vector<256x128xbf16>, vector<128x128xbf16>, vector<256x128xf32> -> vector<256x128xf32>
    %c8_107 = arith.constant 8 : index
    %c0_108 = arith.constant 0 : index
    %c0_109 = arith.constant 0 : index
    %123 = vector.load %arg6[%c8_107, %c0_108, %c0_109] : memref<9x128x128xbf16, #tpu.memory_space<vmem>>, vector<1x128x128xbf16>
    %124 = vector.shape_cast %123 : vector<1x128x128xbf16> to vector<128x128xbf16>
    %cst_110 = arith.constant dense<0.000000e+00> : vector<256x128xf32>
    %125 = tpu.matmul %116, %124, %cst_110 {dimension_numbers = #tpu.dot_dimension_numbers<[1], [0], [0], [1], [0, 0, 1, 1], [], []>} : vector<256x128xbf16>, vector<128x128xbf16>, vector<256x128xf32> -> vector<256x128xf32>
    %126 = arith.addf %112, %119 : vector<256x128xf32>
    %127 = arith.addf %113, %122 : vector<256x128xf32>
    %128 = arith.addf %114, %125 : vector<256x128xf32>
    %129 = vector.shape_cast %126 : vector<256x128xf32> to vector<8x32x128xf32>
    %130 = vector.shape_cast %127 : vector<256x128xf32> to vector<8x32x128xf32>
    %131 = vector.shape_cast %128 : vector<256x128xf32> to vector<8x32x128xf32>
    %c0_i32_111 = arith.constant 0 : i32
    %c0_i32_112 = arith.constant 0 : i32
    %c0_i32_113 = arith.constant 0 : i32
    %132 = tpu.memref_slice %arg9[%0, %c0_i32_111, %c0_i32_112, %c0_i32_113] : memref<2x12x32x128xbf16, #tpu.memory_space<vmem>> -> memref<1x12x32x128xbf16, #tpu.memory_space<vmem>>
    %133 = tpu.memref_squeeze %132 : memref<1x12x32x128xbf16, #tpu.memory_space<vmem>> -> memref<12x32x128xbf16, #tpu.memory_space<vmem>>
    %c2_114 = arith.constant 2 : index
    %c8_115 = arith.constant 8 : index
    %c0_116 = arith.constant 0 : index
    %134 = vector.load %133[%c2_114, %c8_115, %c0_116] : memref<12x32x128xbf16, #tpu.memory_space<vmem>>, vector<8x16x128xbf16>
    %135 = arith.extf %134 : vector<8x16x128xbf16> to vector<8x16x128xf32>
    %136 = vector.extract_strided_slice %130 {offsets = [0, 8, 0], sizes = [8, 16, 128], strides = [1, 1, 1]} : vector<8x32x128xf32> to vector<8x16x128xf32>
    %137 = vector.extract_strided_slice %129 {offsets = [0, 7, 0], sizes = [8, 16, 128], strides = [1, 1, 1]} : vector<8x32x128xf32> to vector<8x16x128xf32>
    %138 = arith.addf %136, %137 : vector<8x16x128xf32>
    %139 = vector.extract_strided_slice %131 {offsets = [0, 9, 0], sizes = [8, 16, 128], strides = [1, 1, 1]} : vector<8x32x128xf32> to vector<8x16x128xf32>
    %140 = arith.addf %138, %139 : vector<8x16x128xf32>
    %c0_117 = arith.constant 0 : index
    %c0_118 = arith.constant 0 : index
    %141 = vector.load %arg7[%c0_117, %c0_118] : memref<1x128xf32, #tpu.memory_space<vmem>>, vector<1x128xf32>
    %142 = vector.shape_cast %141 : vector<1x128xf32> to vector<1x1x128xf32>
    %143 = vector.broadcast %142 : vector<1x1x128xf32> to vector<8x16x128xf32>
    %144 = arith.addf %140, %143 : vector<8x16x128xf32>
    %145 = arith.addf %144, %135 : vector<8x16x128xf32>
    %cst_119 = arith.constant 0.000000e+00 : f32
    %146 = vector.broadcast %cst_119 : f32 to vector<8x16x128xf32>
    %147 = arith.cmpf ogt, %145, %146 : vector<8x16x128xf32>
    %148 = vector.broadcast %16 : f32 to vector<8x16x128xf32>
    %149 = arith.mulf %148, %145 : vector<8x16x128xf32>
    %150 = arith.select %147, %145, %149 : vector<8x16x128xi1>, vector<8x16x128xf32>
    %c0_120 = arith.constant 0 : index
    %c0_121 = arith.constant 0 : index
    %c0_122 = arith.constant 0 : index
    %c0_123 = arith.constant 0 : index
    %151 = vector.load %arg8[%c0_120, %c0_121, %c0_122, %c0_123] : memref<1x8x16x128xf32, #tpu.memory_space<vmem>>, vector<1x8x16x128xf32>
    %152 = vector.shape_cast %151 : vector<1x8x16x128xf32> to vector<8x16x128xf32>
    %153 = vector.shape_cast %150 : vector<8x16x128xf32> to vector<1x8x16x128xf32>
    tpu.vector_store %arg8[%c0_120, %c0_121, %c0_122, %c0_123], %153 {strides = array<i32>} : memref<1x8x16x128xf32, #tpu.memory_space<vmem>>, vector<1x8x16x128xf32>,
    return
  }
  func.func @transform_0(%arg0: i32, %arg1: i32) -> i32 {
    %c0_i32 = arith.constant 0 : i32
    %c0_i32_0 = arith.constant 0 : i32
    return %c0_i32 : i32
  }
  func.func @transform_2(%arg0: i32, %arg1: i32) -> (i32, i32, i32) {
    %c0_i32 = arith.constant 0 : i32
    %c0_i32_0 = arith.constant 0 : i32
    %c0_i32_1 = arith.constant 0 : i32
    %c0_i32_2 = arith.constant 0 : i32
    return %c0_i32, %c0_i32_0, %c0_i32_1 : i32, i32, i32
  }
  func.func @transform_3(%arg0: i32, %arg1: i32) -> (i32, i32) {
    %c0_i32 = arith.constant 0 : i32
    %c0_i32_0 = arith.constant 0 : i32
    %c0_i32_1 = arith.constant 0 : i32
    return %c0_i32, %c0_i32_0 : i32, i32
  }
  func.func @transform_4(%arg0: i32, %arg1: i32) -> (i32, i32, i32) {
    %c0_i32 = arith.constant 0 : i32
    %c0_i32_0 = arith.constant 0 : i32
    %c0_i32_1 = arith.constant 0 : i32
    %c0_i32_2 = arith.constant 0 : i32
    return %c0_i32, %c0_i32_0, %c0_i32_1 : i32, i32, i32
  }
  func.func @transform_5(%arg0: i32, %arg1: i32) -> (i32, i32) {
    %c0_i32 = arith.constant 0 : i32
    %c0_i32_0 = arith.constant 0 : i32
    %c0_i32_1 = arith.constant 0 : i32
    return %c0_i32, %c0_i32_0 : i32, i32
  }
  func.func @transform_6(%arg0: i32, %arg1: i32) -> (i32, i32, i32, i32) {
    %c0_i32 = arith.constant 0 : i32
    %c0_i32_0 = arith.constant 0 : i32
    %c0_i32_1 = arith.constant 0 : i32
    return %arg0, %arg1, %c0_i32, %c0_i32_0 : i32, i32, i32, i32
  }
}

</mosaic_0001>

<bundles_post_ra>
// kernel: basic_block_forward.1
= control target key start
LH: loop header
LB: loop body
LE: loop exit
PB: predicated region body
PF: predicated region fallthrough
CT: control target
= control target key end

     0   :  { %11 = vsyncpa [#allocation6], 0  ;;  %s8326_s21 = smov 0   ;;  %s8328_s22 = smov 0   ;;  %s10000_s0 = inlined_call_operand.vmem [shape: f32[2], index: 0, kind: input, shape index: {}]   ;;  %s10001_s1 = inlined_call_operand.vmem [shape: bf16[2,20,32,128], index: 1, kind: input, shape index: {}]   ;;  %s10002_s2 = inlined_call_operand.vmem [shape: bf16[9,128,128], index: 2, kind: input, shape index: {}]   ;;  %s10003_s3 = inlined_call_operand.vmem [shape: f32[1,128], index: 3, kind: input, shape index: {}]   ;;  %s10004_s4 = inlined_call_operand.vmem [shape: bf16[9,128,128], index: 4, kind: input, shape index: {}]   ;;  %s10005_s5 = inlined_call_operand.vmem [shape: f32[1,128], index: 5, kind: input, shape index: {}]   ;;  %s10006_s6 = inlined_call_operand.vmem [shape: f32[2,16,16,128], index: 6, kind: output, shape index: {}]  }
   0x1   :  { %s8330_s23 = smov 0   ;;  %s8332_s24 = smov 0  }
   0x2   :  { %s8334_s25 = smov 0  }
   0x3 LB: > { %s5791_s26 = sadd.s32 4294967295, %s8285_s25   ;;  %s26_s27 = sadd.s32 1, %s8277_s23  ;;  %s8285_s25 = sphi %s8334_s25, %s17_s25   ;;  %s8281_s24 = sphi %s8332_s24, %s10012_s24   ;;  %s8277_s23 = sphi %s8330_s23, %s10011_s23   ;;  %s8273_s22 = sphi %s8328_s22, %s10010_s22   ;;  %s8269_s21 = sphi %s8326_s21, %s10009_s21  }
   0x4   : > { %p27_p0 = scmp.ge.s32.totalorder %s26_s27, 2  ;;  %s29_s28 = sadd.s32 1, %s8281_s24 }
   0x5   : > { %p5793_p1 = scmp.ge.s32.totalorder %s8285_s25, 1  ;;  %p167_p2 = scmp.lt.s32.totalorder %s8285_s25, 5 }
   0x6   : > { %s10014_s27 = smov (%p27_p0, %s26_s27), 0  ;;  %s10016_s28 = smov (!%p27_p0, %s29_s28), %s8281_s24 }
   0x7   : > { %p8359_p3 = pnand %p5793_p1, %p167_p2  ;;  %p31_p4 = scmp.ge.s32.totalorder %s10016_s28, 2 }
   0x8   : > { %p8363_p5 = scmp.eq.s32.totalorder %s5791_s26, 0  ;;  %s180_s9 = sshll.u32 %s10000_s0, 4  ;;  %s181_s9 = int_to_ptr.vmem [resolvable:$true] %s180_s9 }
   0x9   : > { %p8015_p6 = pneg %p8359_p3  ;;  %s10018_s28 = smov (%p31_p4, %s10016_s28), 0 }
   0xa   : > { %s8226_s10 = scalar_lea.vmem %s181_s9, 16  ;;  %p8234_p12 = scmp.lt.s32.totalorder %s181_s9, %s181_s9 }
   0xb   : > { %p8016_p7 = pnand %p8363_p5, %p8015_p6  ;;  %p8227_p8 = scmp.ne.s32.totalorder %s181_s9, %s8226_s10 }
   0xc   : > { %p8235_p13 = scmp.lt.s32.totalorder %s8226_s10, %s8226_s10 }
   0xd   : > { %p8228_p9 = pneg %p8016_p7 }
   0xe   : > { %p8236_p0 = por %p8235_p13, %p8234_p12 }
   0xf   : > { %p8229_p10 = pnand %p8228_p9, %p8227_p8 }
  0x11   : > { %p8230_p11 = pneg %p8229_p10 }
  0x13   : > { %p8237_p1 = pnand %p8236_p0, %p8230_p11 }
  0x15   : > { %8240 = shalt.err (!%p8237_p1)
}
  0x16   : > { %s8287_s11 = smov [#allocation5]   ;;  %205 = sbr.rel (%p8359_p3) target bundleno = 1581 (0x62d), region = 40 }
  0x17   : > { %8018 = dma.vmem_to_smem (!%p8016_p7), %s181_s9, 16, %s8287_s11, [#allocation6]  }
  0x1d   : > { %8262 = dma.done.wait (%p8363_p5), [#allocation6], 16  }
  0x1e   : > { %8264 = vsyncadd (%p8363_p5), [#allocation6], 4294967280 }
  0x1f   : > { %211 = sfence }
  0x20   : > { %s5797_s12 = sshll.u32 %s8269_s21, 3  ;;  %p235_p2 = scmp.lt.s32.totalorder %s8273_s22, 1 }
  0x21   : > { %p237_p4 = scmp.lt.s32.totalorder %s5797_s12, 15  ;;  %p246_p6 = scmp.lt.s32.totalorder %s8269_s21, 0 }
  0x22   : > { %s236_s13 = scalar_select %p235_p2, %s8273_s22, 1 }
  0x23   : > { %s10020_s12 = smov (!%p237_p4, %s5797_s12), 15  ;;  %s247_s15 = ssub.s32 0, %s8269_s21 }
  0x24   : > { %s5799_s14 = sshll.u32 %s236_s13, 5  ;;  %s5798_s16 = sshll.u32 %s10020_s12, 1 }
  0x25   : > { %s5801_s17 = smin.u32 %s8269_s21, %s247_s15  ;;  %s241_s18 = sadd.s32 %s5799_s14, %s5798_s16 }
  0x26   : > { %s249_s19 = sand.u32 1, %s5801_s17   ;;  %s5800_s20 = sshll.u32 %s241_s18, 3 }
  0x27   : > { %s250_s26 = ssub.s32 0, %s249_s19  ;;  %s8391_s7 = scalar_lea.vmem %s10006_s6, %s5800_s20 }
  0x28   : > { %s10022_s26 = smov (!%p246_p6, %s250_s26), %s249_s19  ;;  %p5802_p3 = scmp.ne.s32.totalorder %s8269_s21, 0 }
  0x29   : > { %s6300_s8 = smul.u32 (!%p5802_p3), 320, %s8273_s22 }
  0x2a   : > { %255 = sbr.rel (%p5802_p3) target bundleno = 58 (0x3a), region = 48 }
  0x2b   : > { %s8402_s11 = scalar_lea.vmem (!%p5802_p3), %s10001_s1, %s6300_s8 }
  0x2c   : > { %v291_v0 = vld [vmem:[%s8402_s11] sm:$0xff] (!%p5802_p3)  ;;  %v293_v1 = vld [vmem:[%s8402_s11 + $0x8] sm:$0xff] (!%p5802_p3)  ;;  %v295_v2 = vld [vmem:[%s8402_s11 + $0x10] sm:$0xff] (!%p5802_p3) }
  0x2d   : > { %292 = vst [vmem:[#allocation2] sm:$0xff] (!%p5802_p3), %v291_v0  ;;  %294 = vst [vmem:[#allocation2 + $0x8] sm:$0xff] (!%p5802_p3), %v293_v1  ;;  %v297_v3 = vld [vmem:[%s8402_s11 + $0x18] sm:$0xff] (!%p5802_p3)  ;;  %v299_v4 = vld [vmem:[%s8402_s11 + $0x20] sm:$0xff] (!%p5802_p3) }
  0x2e   : > { %296 = vst [vmem:[#allocation2 + $0x10] sm:$0xff] (!%p5802_p3), %v295_v2  ;;  %v301_v5 = vld [vmem:[%s8402_s11 + $0x28] sm:$0xff] (!%p5802_p3)  ;;  %298 = vst [vmem:[#allocation2 + $0x18] sm:$0xff] (!%p5802_p3), %v297_v3  ;;  %v303_v6 = vld [vmem:[%s8402_s11 + $0x30] sm:$0xff] (!%p5802_p3) }
  0x2f   : > { %300 = vst [vmem:[#allocation2 + $0x20] sm:$0xff] (!%p5802_p3), %v299_v4  ;;  %302 = vst [vmem:[#allocation2 + $0x28] sm:$0xff] (!%p5802_p3), %v301_v5  ;;  %v305_v7 = vld [vmem:[%s8402_s11 + $0x38] sm:$0xff] (!%p5802_p3)  ;;  %v307_v8 = vld [vmem:[%s8402_s11 + $0x40] sm:$0xff] (!%p5802_p3) }
  0x30   : > { %304 = vst [vmem:[#allocation2 + $0x30] sm:$0xff] (!%p5802_p3), %v303_v6  ;;  %306 = vst [vmem:[#allocation2 + $0x38] sm:$0xff] (!%p5802_p3), %v305_v7  ;;  %v309_v9 = vld [vmem:[%s8402_s11 + $0x48] sm:$0xff] (!%p5802_p3)  ;;  %v311_v10 = vld [vmem:[%s8402_s11 + $0x50] sm:$0xff] (!%p5802_p3) }
  0x31   : > { %308 = vst [vmem:[#allocation2 + $0x40] sm:$0xff] %v307_v8  ;;  %v313_v11 = vld [vmem:[%s8402_s11 + $0x58] sm:$0xff]  ;;  %310 = vst [vmem:[#allocation2 + $0x48] sm:$0xff] %v309_v9  ;;  %v315_v12 = vld [vmem:[%s8402_s11 + $0x60] sm:$0xff] }
  0x32   : > { %312 = vst [vmem:[#allocation2 + $0x50] sm:$0xff] %v311_v10  ;;  %314 = vst [vmem:[#allocation2 + $0x58] sm:$0xff] %v313_v11  ;;  %v317_v13 = vld [vmem:[%s8402_s11 + $0x68] sm:$0xff]  ;;  %v319_v14 = vld [vmem:[%s8402_s11 + $0x70] sm:$0xff] }
  0x33   : > { %316 = vst [vmem:[#allocation2 + $0x60] sm:$0xff] %v315_v12  ;;  %318 = vst [vmem:[#allocation2 + $0x68] sm:$0xff] %v317_v13  ;;  %v321_v15 = vld [vmem:[%s8402_s11 + $0x78] sm:$0xff]  ;;  %v323_v16 = vld [vmem:[%s8402_s11 + $0x80] sm:$0xff] }
  0x34   : > { %320 = vst [vmem:[#allocation2 + $0x70] sm:$0xff] %v319_v14  ;;  %v325_v17 = vld [vmem:[%s8402_s11 + $0x88] sm:$0xff]  ;;  %322 = vst [vmem:[#allocation2 + $0x78] sm:$0xff] %v321_v15  ;;  %v327_v18 = vld [vmem:[%s8402_s11 + $0x90] sm:$0xff] }
  0x35   : > { %324 = vst [vmem:[#allocation2 + $0x80] sm:$0xff] %v323_v16  ;;  %326 = vst [vmem:[#allocation2 + $0x88] sm:$0xff] %v325_v17  ;;  %v329_v19 = vld [vmem:[%s8402_s11 + $0x98] sm:$0xff]  ;;  %v331_v20 = vld [vmem:[%s8402_s11 + $0xa0] sm:$0xff] }
  0x36   : > { %328 = vst [vmem:[#allocation2 + $0x90] sm:$0xff] %v327_v18  ;;  %330 = vst [vmem:[#allocation2 + $0x98] sm:$0xff] %v329_v19  ;;  %v333_v21 = vld [vmem:[%s8402_s11 + $0xa8] sm:$0xff]  ;;  %v335_v22 = vld [vmem:[%s8402_s11 + $0xb0] sm:$0xff] }
  0x37   : > { %332 = vst [vmem:[#allocation2 + $0xa0] sm:$0xff] %v331_v20  ;;  %v337_v23 = vld [vmem:[%s8402_s11 + $0xb8] sm:$0xff]  ;;  %334 = vst [vmem:[#allocation2 + $0xa8] sm:$0xff] %v333_v21 }
  0x38   : > { %336 = vst [vmem:[#allocation2 + $0xb0] sm:$0xff] %v335_v22  ;;  %338 = vst [vmem:[#allocation2 + $0xb8] sm:$0xff] %v337_v23 }
  0x39   : > { %346 = vsyncadd [#allocation4], 3072 }
  0x3a PF: > { %s6301_s12 = smul.u32 192, %s10022_s26  ;;  %s350_s14 = scalar_lea.sflag [#allocation4], %s10022_s26 }
  0x3c   : > { %s8429_s13 = scalar_lea.vmem [#allocation2], %s6301_s12 }
  0x3d   : > { %8265 = dma.done.wait %s350_s14, 3072 }
  0x3e   : > { %8266 = vsyncadd %s350_s14, 4294964224  ;;  %s356_s15 = sadd.s32 1, %s8269_s21 }
  0x3f   : > { %p5805_p5 = scmp.ge.s32.totalorder %s356_s15, 2 }
  0x40   : > { %s362_s16 = ssub.s32 (!%p5805_p5), 1, %s10022_s26  ;;  %s5806_s17 = sshll.u32 (!%p5805_p5), %s8269_s21, 5 }
  0x41   : > { %360 = sbr.rel (%p5805_p5) target bundleno = 85 (0x55), region = 86  ;;  %s371_s10 = scalar_lea.sflag (!%p5805_p5), [#allocation4], %s362_s16 }
  0x42   : > { %s5722_s18 = smul.u32 (!%p5805_p5), 80, %s8273_s22 }
  0x43   : > { %s6302_s19 = smul.u32 (!%p5805_p5), 192, %s362_s16 }
  0x44   : > { %s5723_s20 = sadd.s32 (!%p5805_p5), %s5806_s17, %s5722_s18 }
  0x45   : > { %s5807_s29 = sshll.u32 (!%p5805_p5), %s5723_s20, 2  ;;  %s8446_s22 = scalar_lea.vmem (!%p5805_p5), [#allocation2], %s6302_s19 }
  0x46   : > { %s8441_s9 = scalar_lea.vmem (!%p5805_p5), %s10001_s1, %s5807_s29 }
  0x47   : > { %v5809_v24 = vld [vmem:[%s8441_s9 + $0x80] sm:$0xff] (!%p5805_p5)  ;;  %v5810_v25 = vld [vmem:[%s8441_s9 + $0x88] sm:$0xff] (!%p5805_p5)  ;;  %v5811_v26 = vld [vmem:[%s8441_s9 + $0x90] sm:$0xff] (!%p5805_p5) }
  0x48   : > { %405 = vst [vmem:[%s8446_s22] sm:$0xff] %v5809_v24  ;;  %407 = vst [vmem:[%s8446_s22 + $0x8] sm:$0xff] %v5810_v25  ;;  %v5812_v27 = vld [vmem:[%s8441_s9 + $0x98] sm:$0xff]  ;;  %v5813_v28 = vld [vmem:[%s8441_s9 + $0xa0] sm:$0xff] }
  0x49   : > { %409 = vst [vmem:[%s8446_s22 + $0x10] sm:$0xff] %v5811_v26  ;;  %v5814_v29 = vld [vmem:[%s8441_s9 + $0xa8] sm:$0xff]  ;;  %411 = vst [vmem:[%s8446_s22 + $0x18] sm:$0xff] %v5812_v27  ;;  %v5815_v30 = vld [vmem:[%s8441_s9 + $0xb0] sm:$0xff] }
  0x4a   : > { %413 = vst [vmem:[%s8446_s22 + $0x20] sm:$0xff] %v5813_v28  ;;  %415 = vst [vmem:[%s8446_s22 + $0x28] sm:$0xff] %v5814_v29  ;;  %v5816_v31 = vld [vmem:[%s8441_s9 + $0xb8] sm:$0xff]  ;;  %v5817_v32 = vld [vmem:[%s8441_s9 + $0xc0] sm:$0xff] }
  0x4b   : > { %417 = vst [vmem:[%s8446_s22 + $0x30] sm:$0xff] %v5815_v30  ;;  %419 = vst [vmem:[%s8446_s22 + $0x38] sm:$0xff] %v5816_v31  ;;  %v5818_v33 = vld [vmem:[%s8441_s9 + $0xc8] sm:$0xff]  ;;  %v5819_v34 = vld [vmem:[%s8441_s9 + $0xd0] sm:$0xff] }
  0x4c   : > { %421 = vst [vmem:[%s8446_s22 + $0x40] sm:$0xff] %v5817_v32  ;;  %v5820_v35 = vld [vmem:[%s8441_s9 + $0xd8] sm:$0xff]  ;;  %423 = vst [vmem:[%s8446_s22 + $0x48] sm:$0xff] %v5818_v33  ;;  %v5821_v36 = vld [vmem:[%s8441_s9 + $0xe0] sm:$0xff] }
  0x4d   : > { %425 = vst [vmem:[%s8446_s22 + $0x50] sm:$0xff] %v5819_v34  ;;  %427 = vst [vmem:[%s8446_s22 + $0x58] sm:$0xff] %v5820_v35  ;;  %v5822_v37 = vld [vmem:[%s8441_s9 + $0xe8] sm:$0xff]  ;;  %v5823_v38 = vld [vmem:[%s8441_s9 + $0xf0] sm:$0xff] }
  0x4e   : > { %429 = vst [vmem:[%s8446_s22 + $0x60] sm:$0xff] %v5821_v36  ;;  %431 = vst [vmem:[%s8446_s22 + $0x68] sm:$0xff] %v5822_v37  ;;  %v5824_v39 = vld [vmem:[%s8441_s9 + $0xf8] sm:$0xff]  ;;  %v5825_v40 = vld [vmem:[%s8441_s9 + $0x100] sm:$0xff] }
  0x4f   : > { %433 = vst [vmem:[%s8446_s22 + $0x70] sm:$0xff] %v5823_v38  ;;  %v5826_v41 = vld [vmem:[%s8441_s9 + $0x108] sm:$0xff]  ;;  %435 = vst [vmem:[%s8446_s22 + $0x78] sm:$0xff] %v5824_v39  ;;  %v5827_v42 = vld [vmem:[%s8441_s9 + $0x110] sm:$0xff] }
  0x50   : > { %437 = vst [vmem:[%s8446_s22 + $0x80] sm:$0xff] %v5825_v40  ;;  %439 = vst [vmem:[%s8446_s22 + $0x88] sm:$0xff] %v5826_v41  ;;  %v5828_v43 = vld [vmem:[%s8441_s9 + $0x118] sm:$0xff]  ;;  %v5829_v44 = vld [vmem:[%s8441_s9 + $0x120] sm:$0xff] }
  0x51   : > { %441 = vst [vmem:[%s8446_s22 + $0x90] sm:$0xff] %v5827_v42  ;;  %443 = vst [vmem:[%s8446_s22 + $0x98] sm:$0xff] %v5828_v43  ;;  %v5830_v45 = vld [vmem:[%s8441_s9 + $0x128] sm:$0xff]  ;;  %v5831_v46 = vld [vmem:[%s8441_s9 + $0x130] sm:$0xff] }
  0x52   : > { %445 = vst [vmem:[%s8446_s22 + $0xa0] sm:$0xff] %v5829_v44  ;;  %v5832_v47 = vld [vmem:[%s8441_s9 + $0x138] sm:$0xff]  ;;  %447 = vst [vmem:[%s8446_s22 + $0xa8] sm:$0xff] %v5830_v45 }
  0x53   : > { %449 = vst [vmem:[%s8446_s22 + $0xb0] sm:$0xff] %v5831_v46  ;;  %451 = vst [vmem:[%s8446_s22 + $0xb8] sm:$0xff] %v5832_v47 }
  0x54   : > { %459 = vsyncadd %s371_s10, 3072 }
  0x55 PF: > { %s8495_s11 = sld [smem:[#allocation5]]  ;;  %s8497_s12 = sld [smem:[#allocation5 + $0x1]]  ;;  %v8288_v48 = vmov (!%p5802_p3), 0  }
  0x56   : > { %464 = sbr.rel (%p5802_p3) target bundleno = 96 (0x60), region = 124  ;;  %465 = vst [vmem:[#allocation3] sm:$0xf] (!%p5802_p3), %v8288_v48  ;;  %466 = vst [vmem:[#allocation3 + $0x10] sm:$0xf] (!%p5802_p3), %v8288_v48 }
  0x57   : > { %467 = vst [vmem:[#allocation3 + $0x20] sm:$0xf] (!%p5802_p3), %v8288_v48  ;;  %468 = vst [vmem:[#allocation3 + $0x30] sm:$0xf] (!%p5802_p3), %v8288_v48 }
  0x58   : > { %469 = vst [vmem:[#allocation3 + $0x40] sm:$0xf] (!%p5802_p3), %v8288_v48  ;;  %470 = vst [vmem:[#allocation3 + $0x50] sm:$0xf] (!%p5802_p3), %v8288_v48 }
  0x59   : > { %471 = vst [vmem:[#allocation3 + $0x60] sm:$0xf] (!%p5802_p3), %v8288_v48  ;;  %472 = vst [vmem:[#allocation3 + $0x70] sm:$0xf] (!%p5802_p3), %v8288_v48 }
  0x5a   : > { %473 = vst [vmem:[#allocation3 + $0x80] sm:$0xf] (!%p5802_p3), %v8288_v48  ;;  %474 = vst [vmem:[#allocation3 + $0x90] sm:$0xf] (!%p5802_p3), %v8288_v48 }
  0x5b   : > { %475 = vst [vmem:[#allocation3 + $0x8] sm:$0xf0] (!%p5802_p3), %v8288_v48  ;;  %476 = vst [vmem:[#allocation3 + $0x18] sm:$0xf0] (!%p5802_p3), %v8288_v48 }
  0x5c   : > { %477 = vst [vmem:[#allocation3 + $0x28] sm:$0xf0] (!%p5802_p3), %v8288_v48  ;;  %478 = vst [vmem:[#allocation3 + $0x38] sm:$0xf0] (!%p5802_p3), %v8288_v48 }
  0x5d   : > { %479 = vst [vmem:[#allocation3 + $0x48] sm:$0xf0] %v8288_v48  ;;  %480 = vst [vmem:[#allocation3 + $0x58] sm:$0xf0] %v8288_v48 }
  0x5e   : > { %481 = vst [vmem:[#allocation3 + $0x68] sm:$0xf0] %v8288_v48  ;;  %482 = vst [vmem:[#allocation3 + $0x78] sm:$0xf0] %v8288_v48 }
  0x5f   : > { %483 = vst [vmem:[#allocation3 + $0x88] sm:$0xf0] %v8288_v48  ;;  %484 = vst [vmem:[#allocation3 + $0x98] sm:$0xf0] %v8288_v48 }
  0x60 PF: > { %v8065_v49 = vld [vmem:[%s10002_s2 + $0xc0] sm:$0xff]   ;;  %v8067_v51 = vld [vmem:[%s10002_s2 + $0xc8] sm:$0xff]   ;;  %v8069_v53 = vld [vmem:[%s10002_s2 + $0xd0] sm:$0xff]   ;;  %vm2858_vm0 = vcmask 1040384   ;;  %vm2979_vm1 = vcmask 1046528  }
  0x61   : > { %v8066_v50 = vld [vmem:[%s10002_s2 + $0x100] sm:$0xff]   ;;  %6771 = vmatprep.subr.bf16.mxu0 %v8065_v49  ;;  %v8513_v52 = vld [vmem:[%s10002_s2 + $0x108] sm:$0xff]   ;;  %v8522_v54 = vld [vmem:[%s10002_s2 + $0x110] sm:$0xff]  }
  0x62   : > { %7707 = vmatprep.subr.bf16.mxu1 %v8066_v50  ;;  %6772 = vmatpush3.bf16.msra.mxu0 %v8065_v49  ;;  %v8071_v55 = vld [vmem:[%s10002_s2 + $0xd8] sm:$0xff]   ;;  %v8073_v57 = vld [vmem:[%s10002_s2 + $0xe0] sm:$0xff]   ;;  %v8075_v59 = vld [vmem:[%s10002_s2 + $0xe8] sm:$0xff]  }
  0x63   : > { %7715 = vmatpush3.bf16.msra.mxu1 %v8066_v50  ;;  %6773 = vmatprep.subr.bf16.mxu0 %v8067_v51  ;;  %v8532_v56 = vld [vmem:[%s10002_s2 + $0x118] sm:$0xff]   ;;  %v8542_v58 = vld [vmem:[%s10002_s2 + $0x120] sm:$0xff]   ;;  %v8549_v60 = vld [vmem:[%s8429_s13 + $0x10] sm:$0xff] }
  0x64   : > { %7708 = vmatprep.subr.bf16.mxu1 %v8513_v52  ;;  %v8552_v61 = vld [vmem:[%s8429_s13 + $0x60] sm:$0xff]  ;;  %v8558_v62 = vld [vmem:[%s10002_s2 + $0x128] sm:$0xff]   ;;  %6787 = vmatprep.mubr.bf16.mxu0 %v8549_v60  ;;  %v8077_v63 = vld [vmem:[%s10002_s2 + $0xf0] sm:$0xff]  }
  0x65   : > { %6863 = vmatprep.mubr.bf16.mxu1 %v8552_v61  ;;  %v8570_v0 = vld [vmem:[%s10002_s2 + $0x130] sm:$0xff]   ;;  %v8079_v1 = vld [vmem:[%s10002_s2 + $0xf8] sm:$0xff]   ;;  %v8081_v3 = vld [vmem:[%s10002_s2 + $0x40] sm:$0xff]  }
  0x66   : > { %6774 = vmatpush3.bf16.msra.mxu0 %v8067_v51  ;;  %v8580_v2 = vld [vmem:[%s10002_s2 + $0x138] sm:$0xff]   ;;  %v8591_v5 = vld [vmem:[%s8429_s13 + $0x68] sm:$0xff]  ;;  %v8595_v6 = vld [vmem:[%s8429_s13 + $0x20] sm:$0xff] }
  0x67   : > { %7716 = vmatpush3.bf16.msra.mxu1 %v8513_v52  ;;  %6775 = vmatprep.subr.bf16.mxu0 %v8069_v53  ;;  %v8588_v4 = vld [vmem:[%s8429_s13 + $0x18] sm:$0xff]  ;;  %v8598_v7 = vld [vmem:[%s8429_s13 + $0x70] sm:$0xff]  ;;  %v8082_v8 = vld [vmem:[%s10002_s2 + $0x48] sm:$0xff]  }
  0x68   : > { %7709 = vmatprep.subr.bf16.mxu1 %v8522_v54  ;;  %v8608_v9 = vld [vmem:[%s8429_s13 + $0x28] sm:$0xff]  ;;  %v8083_v10 = vld [vmem:[%s10002_s2 + $0x50] sm:$0xff]   ;;  %v8615_v11 = vld [vmem:[%s8429_s13 + $0x78] sm:$0xff] }
  0x69   : > { %v8619_v12 = vld [vmem:[%s8429_s13 + $0x30] sm:$0xff]  ;;  %v8623_v13 = vld [vmem:[%s8429_s13 + $0x80] sm:$0xff]  ;;  %v8084_v14 = vld [vmem:[%s10002_s2 + $0x58] sm:$0xff]  }
  0x6a   : > { %6776 = vmatpush3.bf16.msra.mxu0 %v8069_v53  ;;  %v8634_v15 = vld [vmem:[%s8429_s13 + $0x38] sm:$0xff]  ;;  %v8085_v16 = vld [vmem:[%s10002_s2 + $0x60] sm:$0xff]   ;;  %v8641_v17 = vld [vmem:[%s8429_s13 + $0x88] sm:$0xff] }
  0x6b   : > { %7717 = vmatpush3.bf16.msra.mxu1 %v8522_v54  ;;  %6777 = vmatprep.subr.bf16.mxu0 %v8071_v55  ;;  %v8644_v18 = vld [vmem:[%s8429_s13 + $0x40] sm:$0xff]  ;;  %v8648_v19 = vld [vmem:[%s8429_s13 + $0x90] sm:$0xff]  ;;  %v8086_v20 = vld [vmem:[%s10002_s2 + $0x68] sm:$0xff]  }
  0x6c   : > { %7710 = vmatprep.subr.bf16.mxu1 %v8532_v56  ;;  %v8087_v21 = vld [vmem:[%s10002_s2 + $0x70] sm:$0xff]   ;;  %v8663_v22 = vld [vmem:[%s8429_s13 + $0x48] sm:$0xff]  ;;  %v8667_v23 = vld [vmem:[%s8429_s13 + $0x98] sm:$0xff] }
  0x6d   : > { %v8670_v24 = vld [vmem:[%s8429_s13 + $0x50] sm:$0xff]  ;;  %v8673_v25 = vld [vmem:[%s8429_s13 + $0xa0] sm:$0xff]  ;;  %v8088_v26 = vld [vmem:[%s10002_s2 + $0x78] sm:$0xff]  }
  0x6e   : > { %6778 = vmatpush3.bf16.msra.mxu0 %v8071_v55  ;;  %v8686_v27 = vld [vmem:[%s10002_s2 + $0x140] sm:$0xff]   ;;  %v8694_v29 = vld [vmem:[%s8429_s13 + $0x58] sm:$0xff]  ;;  %v8698_v30 = vld [vmem:[%s8429_s13 + $0xa8] sm:$0xff] }
  0x6f   : > { %7718 = vmatpush3.bf16.msra.mxu1 %v8532_v56  ;;  %6779 = vmatprep.subr.bf16.mxu0 %v8073_v57  ;;  %v8091_v28 = vld [vmem:[%s10002_s2 + $0x1c0] sm:$0xff]   ;;  %v8710_v32 = vld [vmem:[%s8429_s13 + $0x8] sm:$0xff]  ;;  %v8095_v34 = vld [vmem:[%s10002_s2 + $0x1d0] sm:$0xff]  }
  0x70   : > { %7711 = vmatprep.subr.bf16.mxu1 %v8542_v58  ;;  %v8701_v31 = vld [vmem:[%s8429_s13] sm:$0xff]  ;;  %v8093_v33 = vld [vmem:[%s10002_s2 + $0x1c8] sm:$0xff]   ;;  %v8097_v35 = vld [vmem:[%s10002_s2 + $0x1d8] sm:$0xff]  }
  0x71   : > { %v8098_v36 = vld [vmem:[%s10002_s2 + $0x1e0] sm:$0xff]   ;;  %v8100_v37 = vld [vmem:[%s10002_s2 + $0x1e8] sm:$0xff]   ;;  %v8102_v38 = vld [vmem:[%s10002_s2 + $0x1f0] sm:$0xff]  }
  0x72   : > { %6780 = vmatpush3.bf16.msra.mxu0 %v8073_v57  ;;  %v8104_v39 = vld [vmem:[%s10002_s2 + $0x1f8] sm:$0xff]   ;;  %v8090_v40 = vld [vmem:[%s10002_s2 + $0x148] sm:$0xff]   ;;  %v8092_v41 = vld [vmem:[%s10002_s2 + $0x150] sm:$0xff]  }
  0x73   : > { %7719 = vmatpush3.bf16.msra.mxu1 %v8542_v58  ;;  %6781 = vmatprep.subr.bf16.mxu0 %v8075_v59  ;;  %v8094_v42 = vld [vmem:[%s10002_s2 + $0x158] sm:$0xff]   ;;  %v8096_v43 = vld [vmem:[%s10002_s2 + $0x160] sm:$0xff]   ;;  %v8099_v44 = vld [vmem:[%s10002_s2 + $0x168] sm:$0xff]  }
  0x74   : > { %7712 = vmatprep.subr.bf16.mxu1 %v8558_v62  ;;  %v8101_v45 = vld [vmem:[%s10002_s2 + $0x170] sm:$0xff]   ;;  %v8103_v46 = vld [vmem:[%s10002_s2 + $0x178] sm:$0xff]   ;;  %v8105_v47 = vld [vmem:[%s10002_s2] sm:$0xff]  }
  0x75   : > { %v8106_v48 = vld [vmem:[%s10002_s2 + $0x8] sm:$0xff]   ;;  %v8107_v49 = vld [vmem:[%s10002_s2 + $0x10] sm:$0xff]   ;;  %v8109_v51 = vld [vmem:[%s10002_s2 + $0x20] sm:$0xff]  }
  0x76   : > { %6782 = vmatpush3.bf16.msra.mxu0 %v8075_v59  ;;  %v8111_v53 = vld [vmem:[%s10002_s2 + $0x30] sm:$0xff]   ;;  %v8113_v55 = vld [vmem:[%s10002_s2 + $0x80] sm:$0xff]  }
  0x77   : > { %7720 = vmatpush3.bf16.msra.mxu1 %v8558_v62  ;;  %6783 = vmatprep.subr.bf16.mxu0 %v8077_v63  ;;  %v8115_v57 = vld [vmem:[%s10002_s2 + $0x90] sm:$0xff]   ;;  %v8117_v59 = vld [vmem:[%s10002_s2 + $0xa0] sm:$0xff]  }
  0x78   : > { %7713 = vmatprep.subr.bf16.mxu1 %v8570_v0 }
  0x7a   : > { %6784 = vmatpush3.bf16.msra.mxu0 %v8077_v63 }
  0x7b   : > { %7721 = vmatpush3.bf16.msra.mxu1 %v8570_v0  ;;  %6785 = vmatprep.subr.bf16.mxu0 %v8079_v1 }
  0x7c   : > { %7714 = vmatprep.subr.bf16.mxu1 %v8580_v2 }
  0x7e   : > { %6786 = vmatpush3.bf16.msra.mxu0 %v8079_v1 }
  0x7f   : > { %7722 = vmatpush3.bf16.msra.mxu1 %v8580_v2  ;;  %6827 = vmatprep.subr.bf16.mxu0 %v8066_v50 }
  0x80   : > { %6995 = vmatprep.subr.bf16.mxu1 %v8081_v3 }
  0x81   : > { %6788 = vmatmul.mubr.bf16.vlgmr.msra.gmra.mrb[0].mxu0 %v8588_v4 }
  0x82   : > { %6864 = vmatmul.mubr.bf16.vlgmr.msra.gmra.mrb[0].mxu1 %v8591_v5  ;;  %6828 = vmatpush3.bf16.msra.mxu0 %v8066_v50  ;;  %v8108_v50 = vld [vmem:[%s10002_s2 + $0x18] sm:$0xff]  }
  0x83   : > { %6791 = vmatprep.mubr.bf16.mxu0 %v8595_v6  ;;  %6867 = vmatprep.mubr.bf16.mxu1 %v8598_v7 }
  0x84   : > { %6996 = vmatpush3.bf16.msra.mxu1 %v8081_v3  ;;  %6829 = vmatprep.subr.bf16.mxu0 %v8513_v52  ;;  %v8119_v3 = vld [vmem:[%s10002_s2 + $0xb0] sm:$0xff]  }
  0x85   : > { %6997 = vmatprep.subr.bf16.mxu1 %v8082_v8 }
  0x86   : > { %6830 = vmatpush3.bf16.msra.mxu0 %v8513_v52  ;;  %v8110_v52 = vld [vmem:[%s10002_s2 + $0x28] sm:$0xff]  }
  0x87   : > { %6831 = vmatprep.subr.bf16.mxu0 %v8522_v54 }
  0x88   : > { %6998 = vmatpush3.bf16.msra.mxu1 %v8082_v8 }
  0x89   : > { %6792 = vmatmul.mubr.bf16.gmra.mrb[4].mxu0 %v8608_v9  ;;  %6999 = vmatprep.subr.bf16.mxu1 %v8083_v10 }
  0x8a   : > { %6868 = vmatmul.mubr.bf16.gmra.mrb[4].mxu1 %v8615_v11  ;;  %6795 = vmatprep.mubr.bf16.mxu0 %v8619_v12 }
  0x8b   : > { %6871 = vmatprep.mubr.bf16.mxu1 %v8623_v13  ;;  %6832 = vmatpush3.bf16.msra.mxu0 %v8522_v54  ;;  %v8112_v54 = vld [vmem:[%s10002_s2 + $0x38] sm:$0xff]  }
  0x8c   : > { %7000 = vmatpush3.bf16.msra.mxu1 %v8083_v10  ;;  %6833 = vmatprep.subr.bf16.mxu0 %v8532_v56 }
  0x8d   : > { %7001 = vmatprep.subr.bf16.mxu1 %v8084_v14 }
  0x8f   : > { %6834 = vmatpush3.bf16.msra.mxu0 %v8532_v56  ;;  %v8114_v56 = vld [vmem:[%s10002_s2 + $0x88] sm:$0xff]  }
  0x90   : > { %7002 = vmatpush3.bf16.msra.mxu1 %v8084_v14  ;;  %6835 = vmatprep.subr.bf16.mxu0 %v8542_v58  ;;  %v8890_v14 = vld [vmem:[%s8429_s13 + $0xb0] sm:$0xff] }
  0x91   : > { %6796 = vmatmul.mubr.bf16.gmra.mrb[8].mxu0 %v8634_v15  ;;  %7003 = vmatprep.subr.bf16.mxu1 %v8085_v16 }
  0x92   : > { %6872 = vmatmul.mubr.bf16.gmra.mrb[8].mxu1 %v8641_v17  ;;  %6799 = vmatprep.mubr.bf16.mxu0 %v8644_v18 }
  0x93   : > { %6875 = vmatprep.mubr.bf16.mxu1 %v8648_v19  ;;  %6836 = vmatpush3.bf16.msra.mxu0 %v8542_v58  ;;  %v8116_v58 = vld [vmem:[%s10002_s2 + $0x98] sm:$0xff]  }
  0x94   : > { %7004 = vmatpush3.bf16.msra.mxu1 %v8085_v16  ;;  %6837 = vmatprep.subr.bf16.mxu0 %v8558_v62  ;;  %v8120_v16 = vld [vmem:[%s10002_s2 + $0xb8] sm:$0xff]  }
  0x95   : > { %7005 = vmatprep.subr.bf16.mxu1 %v8086_v20 }
  0x97   : > { %6838 = vmatpush3.bf16.msra.mxu0 %v8558_v62 }
  0x98   : > { %7006 = vmatpush3.bf16.msra.mxu1 %v8086_v20  ;;  %6839 = vmatprep.subr.bf16.mxu0 %v8570_v0 }
  0x99   : > { %6800 = vmatmul.mubr.bf16.gmra.mrb[12].mxu0 %v8663_v22  ;;  %7007 = vmatprep.subr.bf16.mxu1 %v8087_v21 }
  0x9a   : > { %6876 = vmatmul.mubr.bf16.gmra.mrb[12].mxu1 %v8667_v23  ;;  %6803 = vmatprep.mubr.bf16.mxu0 %v8670_v24 }
  0x9b   : > { %6879 = vmatprep.mubr.bf16.mxu1 %v8673_v25  ;;  %6840 = vmatpush3.bf16.msra.mxu0 %v8570_v0  ;;  %v8118_v0 = vld [vmem:[%s10002_s2 + $0xa8] sm:$0xff]  }
  0x9c   : > { %7008 = vmatpush3.bf16.msra.mxu1 %v8087_v21  ;;  %6841 = vmatprep.subr.bf16.mxu0 %v8580_v2  ;;  %v8897_v21 = vld [vmem:[%s8429_s13 + $0xb8] sm:$0xff] }
  0x9d   : > { %7009 = vmatprep.subr.bf16.mxu1 %v8088_v26 }
  0x9f   : > { %6842 = vmatpush3.bf16.msra.mxu0 %v8580_v2 }
  0xa0   : > { %7010 = vmatpush3.bf16.msra.mxu1 %v8088_v26  ;;  %6883 = vmatprep.subr.bf16.mxu0 %v8686_v27 }
  0xa1   : > { %6804 = vmatmul.mubr.bf16.gmra.mrb[16].mxu0 %v8694_v29  ;;  %7163 = vmatprep.subr.bf16.mxu1 %v8091_v28 }
  0xa2   : > { %6880 = vmatmul.mubr.bf16.gmra.mrb[16].mxu1 %v8698_v30  ;;  %6807 = vmatprep.mubr.bf16.mxu0 %v8552_v61 }
  0xa3   : > { %7011 = vmatprep.mubr.bf16.mxu1 %v8701_v31 }
  0xa9   : > { %6808 = vmatmul.mubr.bf16.gmra.mrb[20].mxu0 %v8591_v5 }
  0xaa   : > { %7012 = vmatmul.mubr.bf16.vlgmr.msra.gmra.mrb[20].mxu1 %v8710_v32  ;;  %6811 = vmatprep.mubr.bf16.mxu0 %v8598_v7 }
  0xab   : > { %7015 = vmatprep.mubr.bf16.mxu1 %v8549_v60  ;;  %7164 = vmatpush3.bf16.msra.mxu1 %v8091_v28 }
  0xac   : > { %7165 = vmatprep.subr.bf16.mxu1 %v8093_v33 }
  0xaf   : > { %7166 = vmatpush3.bf16.msra.mxu1 %v8093_v33 }
  0xb0   : > { %7167 = vmatprep.subr.bf16.mxu1 %v8095_v34 }
  0xb1   : > { %6812 = vmatmul.mubr.bf16.gmra.mrb[24].mxu0 %v8615_v11 }
  0xb2   : > { %7016 = vmatmul.mubr.bf16.gmra.mrb[24].mxu1 %v8588_v4  ;;  %6815 = vmatprep.mubr.bf16.mxu0 %v8623_v13 }
  0xb3   : > { %7019 = vmatprep.mubr.bf16.mxu1 %v8595_v6  ;;  %7168 = vmatpush3.bf16.msra.mxu1 %v8095_v34 }
  0xb4   : > { %7169 = vmatprep.subr.bf16.mxu1 %v8097_v35 }
  0xb7   : > { %7170 = vmatpush3.bf16.msra.mxu1 %v8097_v35 }
  0xb8   : > { %7171 = vmatprep.subr.bf16.mxu1 %v8098_v36 }
  0xb9   : > { %6816 = vmatmul.mubr.bf16.gmra.mrb[28].mxu0 %v8641_v17 }
  0xba   : > { %7020 = vmatmul.mubr.bf16.gmra.mrb[28].mxu1 %v8608_v9  ;;  %6819 = vmatprep.mubr.bf16.mxu0 %v8648_v19 }
  0xbb   : > { %7023 = vmatprep.mubr.bf16.mxu1 %v8619_v12  ;;  %7172 = vmatpush3.bf16.msra.mxu1 %v8098_v36 }
  0xbc   : > { %7173 = vmatprep.subr.bf16.mxu1 %v8100_v37 }
  0xbf   : > { %7174 = vmatpush3.bf16.msra.mxu1 %v8100_v37 }
  0xc0   : > { %7175 = vmatprep.subr.bf16.mxu1 %v8102_v38 }
  0xc1   : > { %6820 = vmatmul.mubr.bf16.gmra.mrb[32].mxu0 %v8667_v23 }
  0xc2   : > { %7024 = vmatmul.mubr.bf16.gmra.mrb[32].mxu1 %v8634_v15  ;;  %6823 = vmatprep.mubr.bf16.mxu0 %v8673_v25 }
  0xc3   : > { %7027 = vmatprep.mubr.bf16.mxu1 %v8644_v18  ;;  %7176 = vmatpush3.bf16.msra.mxu1 %v8102_v38 }
  0xc4   : > { %7177 = vmatprep.subr.bf16.mxu1 %v8104_v39 }
  0xc7   : > { %7178 = vmatpush3.bf16.msra.mxu1 %v8104_v39 }
  0xc9   : > { %6824 = vmatmul.mubr.bf16.gmra.mrb[36].mxu0 %v8698_v30 }
  0xca   : > { %7028 = vmatmul.mubr.bf16.gmra.mrb[36].mxu1 %v8663_v22  ;;  %6843 = vmatprep.mubr.bf16.mxu0 %v8549_v60 }
  0xcb   : > { %7031 = vmatprep.mubr.bf16.mxu1 %v8670_v24 }
  0xd1   : > { %6844 = vmatmul.mubr.bf16.vlgmr.msra.gmra.mrb[40].mxu0 %v8588_v4 }
  0xd2   : > { %7032 = vmatmul.mubr.bf16.gmra.mrb[40].mxu1 %v8694_v29  ;;  %6884 = vmatpush3.bf16.msra.mxu0 %v8686_v27  ;;  %v8121_v27 = vld [vmem:[%s10002_s2 + $0x180] sm:$0xff]  }
  0xd3   : > { %6885 = vmatprep.subr.bf16.mxu0 %v8090_v40  ;;  %6847 = vmatprep.mubr.bf16.mxu0 %v8595_v6 }
  0xd4   : > { %7035 = vmatprep.mubr.bf16.mxu1 %v8552_v61 }
  0xd6   : > { %6886 = vmatpush3.bf16.msra.mxu0 %v8090_v40 }
  0xd7   : > { %6887 = vmatprep.subr.bf16.mxu0 %v8092_v41 }
  0xd9   : > { %6848 = vmatmul.mubr.bf16.gmra.mrb[44].mxu0 %v8608_v9 }
  0xda   : > { %7036 = vmatmul.mubr.bf16.gmra.mrb[44].mxu1 %v8591_v5  ;;  %6888 = vmatpush3.bf16.msra.mxu0 %v8092_v41 }
  0xdb   : > { %6851 = vmatprep.mubr.bf16.mxu0 %v8619_v12  ;;  %6889 = vmatprep.subr.bf16.mxu0 %v8094_v42 }
  0xdc   : > { %7039 = vmatprep.mubr.bf16.mxu1 %v8598_v7 }
  0xde   : > { %6890 = vmatpush3.bf16.msra.mxu0 %v8094_v42 }
  0xdf   : > { %6891 = vmatprep.subr.bf16.mxu0 %v8096_v43 }
  0xe1   : > { %6852 = vmatmul.mubr.bf16.gmra.mrb[48].mxu0 %v8634_v15 }
  0xe2   : > { %7040 = vmatmul.mubr.bf16.gmra.mrb[48].mxu1 %v8615_v11  ;;  %6892 = vmatpush3.bf16.msra.mxu0 %v8096_v43 }
  0xe3   : > { %6855 = vmatprep.mubr.bf16.mxu0 %v8644_v18  ;;  %7043 = vmatprep.mubr.bf16.mxu1 %v8623_v13 }
  0xe4   : > { %6893 = vmatprep.subr.bf16.mxu0 %v8099_v44 }
  0xe6   : > { %6894 = vmatpush3.bf16.msra.mxu0 %v8099_v44 }
  0xe7   : > { %6895 = vmatprep.subr.bf16.mxu0 %v8101_v45 }
  0xe9   : > { %6856 = vmatmul.mubr.bf16.gmra.mrb[52].mxu0 %v8663_v22 }
  0xea   : > { %7044 = vmatmul.mubr.bf16.gmra.mrb[52].mxu1 %v8641_v17  ;;  %6859 = vmatprep.mubr.bf16.mxu0 %v8670_v24 }
  0xeb   : > { %6896 = vmatpush3.bf16.msra.mxu0 %v8101_v45  ;;  %7047 = vmatprep.mubr.bf16.mxu1 %v8648_v19 }
  0xec   : > { %6897 = vmatprep.subr.bf16.mxu0 %v8103_v46 }
  0xef   : > { %6898 = vmatpush3.bf16.msra.mxu0 %v8103_v46 }
  0xf0   : > { %6939 = vmatprep.subr.bf16.mxu0 %v8105_v47 }
  0xf1   : > { %6860 = vmatmul.mubr.bf16.gmra.mrb[56].mxu0 %v8694_v29 }
  0xf2   : > { %7048 = vmatmul.mubr.bf16.gmra.mrb[56].mxu1 %v8667_v23  ;;  %6899 = vmatprep.mubr.bf16.mxu0 %v8549_v60 }
  0xf3   : > { %7179 = vmatprep.mubr.bf16.mxu1 %v8595_v6 }
  0xf9   : > { %6900 = vmatmul.mubr.bf16.vlgmr.msra.gmra.mrb[60].mxu0 %v8588_v4 }
  0xfa   : > { %7180 = vmatmul.mubr.bf16.vlgmr.msra.gmra.mrb[60].mxu1 %v8608_v9  ;;  %6940 = vmatpush3.bf16.msra.mxu0 %v8105_v47 }
  0xfb   : > { %6903 = vmatprep.mubr.bf16.mxu0 %v8595_v6  ;;  %7183 = vmatprep.mubr.bf16.mxu1 %v8619_v12 }
  0xfc   : > { %6941 = vmatprep.subr.bf16.mxu0 %v8106_v48 }
  0xfe   : > { %6942 = vmatpush3.bf16.msra.mxu0 %v8106_v48 }
  0xff   : > { %6943 = vmatprep.subr.bf16.mxu0 %v8107_v49 }
 0x101   : > { %6904 = vmatmul.mubr.bf16.gmra.mrb[64].mxu0 %v8608_v9 }
 0x102   : > { %7184 = vmatmul.mubr.bf16.gmra.mrb[64].mxu1 %v8634_v15  ;;  %6907 = vmatprep.mubr.bf16.mxu0 %v8619_v12 }
 0x103   : > { %7187 = vmatprep.mubr.bf16.mxu1 %v8644_v18  ;;  %6944 = vmatpush3.bf16.msra.mxu0 %v8107_v49 }
 0x104   : > { %6945 = vmatprep.subr.bf16.mxu0 %v8108_v50 }
 0x107   : > { %6946 = vmatpush3.bf16.msra.mxu0 %v8108_v50 }
 0x108   : > { %6947 = vmatprep.subr.bf16.mxu0 %v8109_v51 }
 0x109   : > { %6908 = vmatmul.mubr.bf16.gmra.mrb[68].mxu0 %v8634_v15 }
 0x10a   : > { %7188 = vmatmul.mubr.bf16.gmra.mrb[68].mxu1 %v8663_v22  ;;  %6911 = vmatprep.mubr.bf16.mxu0 %v8644_v18 }
 0x10b   : > { %7191 = vmatprep.mubr.bf16.mxu1 %v8670_v24  ;;  %6948 = vmatpush3.bf16.msra.mxu0 %v8109_v51 }
 0x10c   : > { %6949 = vmatprep.subr.bf16.mxu0 %v8110_v52 }
 0x10f   : > { %6950 = vmatpush3.bf16.msra.mxu0 %v8110_v52 }
 0x110   : > { %6951 = vmatprep.subr.bf16.mxu0 %v8111_v53 }
 0x111   : > { %6912 = vmatmul.mubr.bf16.gmra.mrb[72].mxu0 %v8663_v22 }
 0x112   : > { %7192 = vmatmul.mubr.bf16.gmra.mrb[72].mxu1 %v8694_v29  ;;  %6915 = vmatprep.mubr.bf16.mxu0 %v8670_v24 }
 0x113   : > { %7195 = vmatprep.mubr.bf16.mxu1 %v8552_v61  ;;  %6952 = vmatpush3.bf16.msra.mxu0 %v8111_v53 }
 0x114   : > { %6953 = vmatprep.subr.bf16.mxu0 %v8112_v54 }
 0x117   : > { %6954 = vmatpush3.bf16.msra.mxu0 %v8112_v54 }
 0x118   : > { %7051 = vmatprep.subr.bf16.mxu0 %v8113_v55 }
 0x119   : > { %6916 = vmatmul.mubr.bf16.gmra.mrb[76].mxu0 %v8694_v29 }
 0x11a   : > { %7196 = vmatmul.mubr.bf16.gmra.mrb[76].mxu1 %v8591_v5  ;;  %6919 = vmatprep.mubr.bf16.mxu0 %v8552_v61 }
 0x11b   : > { %7199 = vmatprep.mubr.bf16.mxu1 %v8598_v7 }
 0x121   : > { %6920 = vmatmul.mubr.bf16.gmra.mrb[80].mxu0 %v8591_v5 }
 0x122   : > { %6923 = vmatprep.mubr.bf16.mxu0 %v8598_v7  ;;  %7200 = vmatmul.mubr.bf16.gmra.mrb[80].mxu1 %v8615_v11 }
 0x123   : > { %7203 = vmatprep.mubr.bf16.mxu1 %v8623_v13 }
 0x129   : > { %6924 = vmatmul.mubr.bf16.gmra.mrb[84].mxu0 %v8615_v11 }
 0x12a   : > { %6927 = vmatprep.mubr.bf16.mxu0 %v8623_v13  ;;  %7204 = vmatmul.mubr.bf16.gmra.mrb[84].mxu1 %v8641_v17 }
 0x12b   : > { %7207 = vmatprep.mubr.bf16.mxu1 %v8648_v19 }
 0x131   : > { %6928 = vmatmul.mubr.bf16.gmra.mrb[88].mxu0 %v8641_v17 }
 0x132   : > { %6931 = vmatprep.mubr.bf16.mxu0 %v8648_v19  ;;  %7208 = vmatmul.mubr.bf16.gmra.mrb[88].mxu1 %v8667_v23 }
 0x133   : > { %7211 = vmatprep.mubr.bf16.mxu1 %v8673_v25 }
 0x139   : > { %6932 = vmatmul.mubr.bf16.gmra.mrb[92].mxu0 %v8667_v23 }
 0x13a   : > { %6935 = vmatprep.mubr.bf16.mxu0 %v8673_v25  ;;  %7212 = vmatmul.mubr.bf16.gmra.mrb[92].mxu1 %v8698_v30 }
 0x13b   : > { %7215 = vmatprep.mubr.bf16.mxu1 %v8890_v14 }
 0x141   : > { %6936 = vmatmul.mubr.bf16.gmra.mrb[96].mxu0 %v8698_v30 }
 0x142   : > { %6955 = vmatprep.mubr.bf16.mxu0 %v8701_v31  ;;  %7216 = vmatmul.mubr.bf16.gmra.mrb[96].mxu1 %v8897_v21 }
 0x149   : > { %6956 = vmatmul.mubr.bf16.vlgmr.msra.gmra.mrb[0].mxu0 %v8710_v32 }
 0x14a   : > { %7052 = vmatpush3.bf16.msra.mxu0 %v8113_v55  ;;  %6959 = vmatprep.mubr.bf16.mxu0 %v8549_v60 }
 0x14b   : > { %7053 = vmatprep.subr.bf16.mxu0 %v8114_v56 }
 0x14e   : > { %7054 = vmatpush3.bf16.msra.mxu0 %v8114_v56 }
 0x14f   : > { %7055 = vmatprep.subr.bf16.mxu0 %v8115_v57 }
 0x151   : > { %6960 = vmatmul.mubr.bf16.gmra.mrb[4].mxu0 %v8588_v4 }
 0x152   : > { %6963 = vmatprep.mubr.bf16.mxu0 %v8595_v6  ;;  %7056 = vmatpush3.bf16.msra.mxu0 %v8115_v57  ;;  %v8122_v57 = vld [vmem:[%s10002_s2 + $0x188] sm:$0xff]  }
 0x153   : > { %7057 = vmatprep.subr.bf16.mxu0 %v8116_v58 }
 0x155   : > { %v8875_v62 = vpop.f32.mrb[0].mxu1 }
 0x156   : > { %7058 = vmatpush3.bf16.msra.mxu0 %v8116_v58  ;;  %v993_v63 = vpop.f32.mrb[1].mxu1 }
 0x157   : > { %7059 = vmatprep.subr.bf16.mxu0 %v8117_v59  ;;  %v6866_v1 = vpop.f32.mrb[2].mxu1 }
 0x158   : > { %v8880_v2 = vpop.f32.mrb[3].mxu1 }
 0x159   : > { %6964 = vmatmul.mubr.bf16.gmra.mrb[8].mxu0 %v8608_v9 }
 0x15a   : > { %6967 = vmatprep.mubr.bf16.mxu0 %v8619_v12  ;;  %7060 = vmatpush3.bf16.msra.mxu0 %v8117_v59 }
 0x15b   : > { %7061 = vmatprep.subr.bf16.mxu0 %v8118_v0 }
 0x15d   : > { %v8887_v8 = vpop.f32.mrb[4].mxu1 }
 0x15e   : > { %7062 = vmatpush3.bf16.msra.mxu0 %v8118_v0  ;;  %v1007_v10 = vpop.f32.mrb[5].mxu1 }
 0x15f   : > { %7063 = vmatprep.subr.bf16.mxu0 %v8119_v3  ;;  %v6870_v20 = vpop.f32.mrb[6].mxu1 }
 0x160   : > { %v8899_v26 = vpop.f32.mrb[7].mxu1 }
 0x161   : > { %6968 = vmatmul.mubr.bf16.gmra.mrb[12].mxu0 %v8634_v15 }
 0x162   : > { %6971 = vmatprep.mubr.bf16.mxu0 %v8644_v18  ;;  %7064 = vmatpush3.bf16.msra.mxu0 %v8119_v3  ;;  %v8124_v3 = vld [vmem:[%s10002_s2 + $0x198] sm:$0xff]  }
 0x163   : > { %7065 = vmatprep.subr.bf16.mxu0 %v8120_v16 }
 0x165   : > { %v8907_v28 = vpop.f32.mrb[8].mxu1 }
 0x166   : > { %7066 = vmatpush3.bf16.msra.mxu0 %v8120_v16  ;;  %v1021_v33 = vpop.f32.mrb[9].mxu1 }
 0x167   : > { %7107 = vmatprep.subr.bf16.mxu0 %v8121_v27  ;;  %v6874_v34 = vpop.f32.mrb[10].mxu1 }
 0x168   : > { %v8909_v35 = vpop.f32.mrb[11].mxu1 }
 0x169   : > { %6972 = vmatmul.mubr.bf16.gmra.mrb[16].mxu0 %v8663_v22 }
 0x16a   : > { %6975 = vmatprep.mubr.bf16.mxu0 %v8670_v24 }
 0x16d   : > { %v8913_v36 = vpop.f32.mrb[12].mxu1 }
 0x16e   : > { %v1035_v37 = vpop.f32.mrb[13].mxu1 }
 0x16f   : > { %v6878_v38 = vpop.f32.mrb[14].mxu1 }
 0x170   : > { %v8915_v39 = vpop.f32.mrb[15].mxu1 }
 0x171   : > { %6976 = vmatmul.mubr.bf16.gmra.mrb[20].mxu0 %v8694_v29 }
 0x172   : > { %6979 = vmatprep.mubr.bf16.mxu0 %v8552_v61 }
 0x175   : > { %v8919_v40 = vpop.f32.mrb[16].mxu1 }
 0x176   : > { %v1049_v41 = vpop.f32.mrb[17].mxu1 }
 0x177   : > { %v6882_v42 = vpop.f32.mrb[18].mxu1 }
 0x178   : > { %v8921_v43 = vpop.f32.mrb[19].mxu1 }
 0x179   : > { %6980 = vmatmul.mubr.bf16.gmra.mrb[24].mxu0 %v8591_v5 }
 0x17a   : > { %6983 = vmatprep.mubr.bf16.mxu0 %v8598_v7 }
 0x17d   : > { %v7013_v44 = vpop.f32.mrb[20].mxu1 }
 0x17e   : > { %v1623_v45 = vpop.f32.mrb[21].mxu1 }
 0x17f   : > { %v7014_v46 = vpop.f32.mrb[22].mxu1 }
 0x180   : > { %v1625_v47 = vpop.f32.mrb[23].mxu1 }
 0x181   : > { %6984 = vmatmul.mubr.bf16.gmra.mrb[28].mxu0 %v8615_v11 }
 0x182   : > { %6987 = vmatprep.mubr.bf16.mxu0 %v8623_v13 }
 0x185   : > { %v7017_v48 = vpop.f32.mrb[24].mxu1 }
 0x186   : > { %v1637_v61 = vpop.f32.mrb[25].mxu1 }
 0x187   : > { %v7018_v49 = vpop.f32.mrb[26].mxu1 }
 0x188   : > { %v8927_v50 = vpop.f32.mrb[27].mxu1 }
 0x189   : > { %6988 = vmatmul.mubr.bf16.gmra.mrb[32].mxu0 %v8641_v17 }
 0x18a   : > { %6991 = vmatprep.mubr.bf16.mxu0 %v8648_v19 }
 0x18d   : > { %v8931_v51 = vpop.f32.mrb[28].mxu1 }
 0x18e   : > { %v1651_v52 = vpop.f32.mrb[29].mxu1 }
 0x18f   : > { %v7022_v53 = vpop.f32.mrb[30].mxu1 }
 0x190   : > { %v8933_v54 = vpop.f32.mrb[31].mxu1 }
 0x191   : > { %6992 = vmatmul.mubr.bf16.gmra.mrb[36].mxu0 %v8667_v23 }
 0x192   : > { %7067 = vmatprep.mubr.bf16.mxu0 %v8701_v31  ;;  %v8123_v31 = vld [vmem:[%s10002_s2 + $0x190] sm:$0xff]  }
 0x195   : > { %v8937_v55 = vpop.f32.mrb[32].mxu1 }
 0x196   : > { %v1665_v56 = vpop.f32.mrb[33].mxu1 }
 0x197   : > { %v7026_v58 = vpop.f32.mrb[34].mxu1  ;;  %v8128_v56 = vld [vmem:[%s10002_s2 + $0x1b8] sm:$0xff]  }
 0x198   : > { %v8942_v59 = vpop.f32.mrb[35].mxu1 }
 0x199   : > { %7068 = vmatmul.mubr.bf16.vlgmr.msra.gmra.mrb[60].mxu0 %v8710_v32 }
 0x19a   : > { %7108 = vmatpush3.bf16.msra.mxu0 %v8121_v27  ;;  %7071 = vmatprep.mubr.bf16.mxu0 %v8549_v60  ;;  %v8125_v60 = vld [vmem:[%s10002_s2 + $0x1a0] sm:$0xff]  }
 0x19b   : > { %7109 = vmatprep.subr.bf16.mxu0 %v8122_v57 }
 0x19d   : > { %v8949_v63 = vpop.f32.mrb[36].mxu1 }
 0x19e   : > { %7110 = vmatpush3.bf16.msra.mxu0 %v8122_v57  ;;  %v1679_v0 = vpop.f32.mrb[37].mxu1 }
 0x19f   : > { %7111 = vmatprep.subr.bf16.mxu0 %v8123_v31  ;;  %v7030_v1 = vpop.f32.mrb[38].mxu1 }
 0x1a0   : > { %v8954_v10 = vpop.f32.mrb[39].mxu1 }
 0x1a1   : > { %7072 = vmatmul.mubr.bf16.gmra.mrb[64].mxu0 %v8588_v4 }
 0x1a2   : > { %7075 = vmatprep.mubr.bf16.mxu0 %v8595_v6  ;;  %7112 = vmatpush3.bf16.msra.mxu0 %v8123_v31  ;;  %v8126_v6 = vld [vmem:[%s10002_s2 + $0x1a8] sm:$0xff]  }
 0x1a3   : > { %7113 = vmatprep.subr.bf16.mxu0 %v8124_v3 }
 0x1a4   : > { %v6845_v32 = vpop.f32.mrb[40].mxu0 }
 0x1a5   : > { %v8961_v16 = vadd.f32 %v7013_v44, %v6845_v32  ;;  %v923_v20 = vpop.f32.mrb[41].mxu0  ;;  %v7033_v27 = vpop.f32.mrb[40].mxu1 }
 0x1a6   : > { %v6846_v33 = vpop.f32.mrb[42].mxu0  ;;  %v8964_v34 = vadd.f32 %v7033_v27, %v8875_v62  ;;  %7114 = vmatpush3.bf16.msra.mxu0 %v8124_v3  ;;  %v1693_v37 = vpop.f32.mrb[41].mxu1  ;;  %v8127_v62 = vld [vmem:[%s10002_s2 + $0x1b0] sm:$0xff]  }
 0x1a7   : > { %v925_v4 = vpop.f32.mrb[43].mxu0  ;;  %v7034_v38 = vpop.f32.mrb[42].mxu1  ;;  %7115 = vmatprep.subr.bf16.mxu0 %v8125_v60 }
 0x1a8   : > { %v8969_v41 = vadd.f32 %v1625_v47, %v925_v4  ;;  %v1695_v42 = vpop.f32.mrb[43].mxu1 }
 0x1a9   : > { %7076 = vmatmul.mubr.bf16.gmra.mrb[68].mxu0 %v8608_v9  ;;  %v8973_v44 = vadd.f32 %v1695_v42, %v8880_v2 }
 0x1aa   : > { %7079 = vmatprep.mubr.bf16.mxu0 %v8619_v12  ;;  %7116 = vmatpush3.bf16.msra.mxu0 %v8125_v60 }
 0x1ab   : > { %7117 = vmatprep.subr.bf16.mxu0 %v8126_v6 }
 0x1ac   : > { %v6849_v45 = vpop.f32.mrb[44].mxu0 }
 0x1ad   : > { %v8979_v46 = vadd.f32 %v7017_v48, %v6849_v45  ;;  %v937_v61 = vpop.f32.mrb[45].mxu0  ;;  %v7037_v47 = vpop.f32.mrb[44].mxu1 }
 0x1ae   : > { %v6850_v49 = vpop.f32.mrb[46].mxu0  ;;  %v8982_v52 = vadd.f32 %v7037_v47, %v8887_v8  ;;  %v1707_v9 = vpop.f32.mrb[45].mxu1  ;;  %7118 = vmatpush3.bf16.msra.mxu0 %v8126_v6  ;;  %v8998_v8 = vld [vmem:[%s10002_s2 + $0x200] sm:$0xff]  }
 0x1af   : > { %v939_v2 = vpop.f32.mrb[47].mxu0  ;;  %v7038_v53 = vpop.f32.mrb[46].mxu1  ;;  %7119 = vmatprep.subr.bf16.mxu0 %v8127_v62  ;;  %v9021_v49 = vld [vmem:[%s8429_s13 + $0x60] sm:$0xff] }
 0x1b0   : > { %v8988_v57 = vadd.f32 %v8927_v50, %v939_v2  ;;  %v1709_v48 = vpop.f32.mrb[47].mxu1 }
 0x1b1   : > { %7080 = vmatmul.mubr.bf16.gmra.mrb[72].mxu0 %v8634_v15  ;;  %v8992_v58 = vadd.f32 %v1709_v48, %v8899_v26 }
 0x1b2   : > { %7083 = vmatprep.mubr.bf16.mxu0 %v8644_v18  ;;  %7120 = vmatpush3.bf16.msra.mxu0 %v8127_v62 }
 0x1b3   : > { %7121 = vmatprep.subr.bf16.mxu0 %v8128_v56 }
 0x1b4   : > { %v6853_v31 = vpop.f32.mrb[48].mxu0 }
 0x1b5   : > { %v1659_v0 = vadd.f32 %v8931_v51, %v6853_v31  ;;  %v951_v50 = vpop.f32.mrb[49].mxu0  ;;  %v7041_v1 = vpop.f32.mrb[48].mxu1 }
 0x1b6   : > { %v6854_v3 = vpop.f32.mrb[50].mxu0  ;;  %v9002_v60 = vadd.f32 %v7041_v1, %v8907_v28  ;;  %v1721_v26 = vpop.f32.mrb[49].mxu1  ;;  %7122 = vmatpush3.bf16.msra.mxu0 %v8128_v56 }
 0x1b7   : > { %v953_v32 = vpop.f32.mrb[51].mxu0  ;;  %v7042_v20 = vpop.f32.mrb[50].mxu1  ;;  %7219 = vmatprep.subr.bf16.mxu0 %v8998_v8 }
 0x1b8   : > { %v1654_v27 = vadd.f32 %v8933_v54, %v953_v32  ;;  %v1723_v33 = vpop.f32.mrb[51].mxu1 }
 0x1b9   : > { %7084 = vmatmul.mubr.bf16.gmra.mrb[76].mxu0 %v8663_v22  ;;  %v9008_v51 = vadd.f32 %v1723_v33, %v8909_v35 }
 0x1ba   : > { %7087 = vmatprep.mubr.bf16.mxu0 %v8670_v24 }
 0x1bc   : > { %v6857_v37 = vpop.f32.mrb[52].mxu0 }
 0x1bd   : > { %v1673_v28 = vadd.f32 %v8937_v55, %v6857_v37  ;;  %v965_v4 = vpop.f32.mrb[53].mxu0  ;;  %v7045_v38 = vpop.f32.mrb[52].mxu1 }
 0x1be   : > { %v6858_v6 = vpop.f32.mrb[54].mxu0  ;;  %v9013_v42 = vadd.f32 %v7045_v38, %v8913_v36  ;;  %v1735_v62 = vpop.f32.mrb[53].mxu1 }
 0x1bf   : > { %v967_v54 = vpop.f32.mrb[55].mxu0  ;;  %v7046_v45 = vpop.f32.mrb[54].mxu1 }
 0x1c0   : > { %v1668_v61 = vadd.f32 %v8942_v59, %v967_v54  ;;  %v1737_v47 = vpop.f32.mrb[55].mxu1 }
 0x1c1   : > { %7088 = vmatmul.mubr.bf16.gmra.mrb[80].mxu0 %v8694_v29  ;;  %v9018_v35 = vadd.f32 %v1737_v47, %v8915_v39 }
 0x1c2   : > { %7091 = vmatprep.mubr.bf16.mxu0 %v9021_v49 }
 0x1c4   : > { %v6861_v55 = vpop.f32.mrb[56].mxu0 }
 0x1c5   : > { %v1687_v9 = vadd.f32 %v8949_v63, %v6861_v55  ;;  %v979_v36 = vpop.f32.mrb[57].mxu0  ;;  %v7049_v2 = vpop.f32.mrb[56].mxu1 }
 0x1c6   : > { %v6862_v53 = vpop.f32.mrb[58].mxu0  ;;  %v9026_v56 = vadd.f32 %v7049_v2, %v8919_v40  ;;  %v1749_v59 = vpop.f32.mrb[57].mxu1  ;;  %v8132_v36 = vld [vmem:[%s10002_s2 + $0x218] sm:$0xff]  }
 0x1c7   : > { %v981_v48 = vpop.f32.mrb[59].mxu0  ;;  %v7050_v31 = vpop.f32.mrb[58].mxu1 }
 0x1c8   : > { %v1682_v50 = vadd.f32 %v8954_v10, %v981_v48  ;;  %v1751_v39 = vpop.f32.mrb[59].mxu1 }
 0x1c9   : > { %7092 = vmatmul.mubr.bf16.gmra.mrb[84].mxu0 %v8591_v5  ;;  %v9031_v1 = vadd.f32 %v1751_v39, %v8921_v43 }
 0x1ca   : > { %7095 = vmatprep.mubr.bf16.mxu0 %v8598_v7 }
 0x1cd   : > { %v7181_v63 = vpop.f32.mrb[60].mxu1 }
 0x1ce   : > { %v9035_v3 = vadd.f32 %v7181_v63, %v8961_v16  ;;  %v2361_v26 = vpop.f32.mrb[61].mxu1 }
 0x1cf   : > { %v7182_v40 = vpop.f32.mrb[62].mxu1 }
 0x1d0   : > { %v2363_v32 = vpop.f32.mrb[63].mxu1 }
 0x1d1   : > { %v9038_v20 = vadd.f32 %v2363_v32, %v8969_v41  ;;  %7096 = vmatmul.mubr.bf16.gmra.mrb[88].mxu0 %v8615_v11  ;;  %v8140_v32 = vld [vmem:[%s8429_s13 + $0x68] sm:$0xff] }
 0x1d2   : > { %7099 = vmatprep.mubr.bf16.mxu0 %v8623_v13 }
 0x1d5   : > { %v7185_v5 = vpop.f32.mrb[64].mxu1 }
 0x1d6   : > { %v9043_v43 = vadd.f32 %v7185_v5, %v8979_v46  ;;  %v2375_v7 = vpop.f32.mrb[65].mxu1  ;;  %v9056_v46 = vld [vmem:[%s8429_s13 + $0x20] sm:$0xff] }
 0x1d7   : > { %v7186_v10 = vpop.f32.mrb[66].mxu1  ;;  %v8141_v7 = vld [vmem:[%s8429_s13 + $0x70] sm:$0xff] }
 0x1d8   : > { %v2377_v33 = vpop.f32.mrb[67].mxu1 }
 0x1d9   : > { %v9046_v16 = vadd.f32 %v2377_v33, %v8988_v57  ;;  %7100 = vmatmul.mubr.bf16.gmra.mrb[92].mxu0 %v8641_v17 }
 0x1da   : > { %7103 = vmatprep.mubr.bf16.mxu0 %v8648_v19 }
 0x1dd   : > { %v7189_v41 = vpop.f32.mrb[68].mxu1 }
 0x1de   : > { %v9050_v11 = vadd.f32 %v7189_v41, %v1659_v0  ;;  %v2389_v13 = vpop.f32.mrb[69].mxu1  ;;  %v8130_v0 = vld [vmem:[%s10002_s2 + $0x208] sm:$0xff]  }
 0x1df   : > { %v7190_v37 = vpop.f32.mrb[70].mxu1 }
 0x1e0   : > { %v2391_v4 = vpop.f32.mrb[71].mxu1 }
 0x1e1   : > { %v9052_v38 = vadd.f32 %v2391_v4, %v1654_v27  ;;  %7104 = vmatmul.mubr.bf16.gmra.mrb[96].mxu0 %v8667_v23  ;;  %v9067_v27 = vld [vmem:[%s8429_s13 + $0x28] sm:$0xff] }
 0x1e2   : > { %7123 = vmatprep.mubr.bf16.mxu0 %v9056_v46 }
 0x1e5   : > { %v7193_v57 = vpop.f32.mrb[72].mxu1 }
 0x1e6   : > { %v9059_v6 = vadd.f32 %v7193_v57, %v1673_v28  ;;  %v2403_v17 = vpop.f32.mrb[73].mxu1  ;;  %v8131_v28 = vld [vmem:[%s10002_s2 + $0x210] sm:$0xff]  }
 0x1e7   : > { %v7194_v19 = vpop.f32.mrb[74].mxu1  ;;  %v8142_v17 = vld [vmem:[%s8429_s13 + $0x78] sm:$0xff] }
 0x1e8   : > { %v2405_v62 = vpop.f32.mrb[75].mxu1 }
 0x1e9   : > { %v9064_v54 = vadd.f32 %v2405_v62, %v1668_v61  ;;  %7124 = vmatmul.mubr.bf16.vlgmr.msra.gmra.mrb[0].mxu0 %v9067_v27  ;;  %v8145_v62 = vld [vmem:[%s8429_s13 + $0x90] sm:$0xff] }
 0x1ea   : > { %7220 = vmatpush3.bf16.msra.mxu0 %v8998_v8  ;;  %7127 = vmatprep.mubr.bf16.mxu0 %v8619_v12  ;;  %v8133_v12 = vld [vmem:[%s10002_s2 + $0x220] sm:$0xff]  }
 0x1eb   : > { %7221 = vmatprep.subr.bf16.mxu0 %v8130_v0 }
 0x1ed   : > { %v7197_v45 = vpop.f32.mrb[76].mxu1 }
 0x1ee   : > { %v9075_v47 = vadd.f32 %v7197_v45, %v1687_v9  ;;  %v2417_v55 = vpop.f32.mrb[77].mxu1  ;;  %7222 = vmatpush3.bf16.msra.mxu0 %v8130_v0  ;;  %v8134_v9 = vld [vmem:[%s10002_s2 + $0x228] sm:$0xff]   ;;  %v8146_v45 = vld [vmem:[%s8429_s13 + $0x30] sm:$0xff] }
 0x1ef   : > { %v7198_v61 = vpop.f32.mrb[78].mxu1  ;;  %7223 = vmatprep.subr.bf16.mxu0 %v8131_v28  ;;  %v8144_v0 = vld [vmem:[%s8429_s13 + $0x88] sm:$0xff]  ;;  %v8147_v55 = vld [vmem:[%s8429_s13 + $0x38] sm:$0xff] }
 0x1f0   : > { %v2419_v2 = vpop.f32.mrb[79].mxu1  ;;  %v8148_v61 = vld [vmem:[%s8429_s13 + $0x40] sm:$0xff] }
 0x1f1   : > { %v9080_v8 = vadd.f32 %v2419_v2, %v1682_v50  ;;  %7128 = vmatmul.mubr.bf16.gmra.mrb[4].mxu0 %v8634_v15  ;;  %v8135_v15 = vld [vmem:[%s10002_s2 + $0x230] sm:$0xff]  }
 0x1f2   : > { %7131 = vmatprep.mubr.bf16.mxu0 %v8644_v18  ;;  %7224 = vmatpush3.bf16.msra.mxu0 %v8131_v28  ;;  %v8136_v18 = vld [vmem:[%s10002_s2 + $0x238] sm:$0xff]  }
 0x1f3   : > { %7225 = vmatprep.subr.bf16.mxu0 %v8132_v36 }
 0x1f5   : > { %v7201_v53 = vpop.f32.mrb[80].mxu1 }
 0x1f6   : > { %7226 = vmatpush3.bf16.msra.mxu0 %v8132_v36 }
 0x1f7   : > { %7227 = vmatprep.subr.bf16.mxu0 %v8133_v12 }
 0x1f9   : > { %7132 = vmatmul.mubr.bf16.gmra.mrb[8].mxu0 %v8663_v22  ;;  %v9101_v22 = vadd.f32 %v7201_v53, %v8964_v34 }
 0x1fa   : > { %7135 = vmatprep.mubr.bf16.mxu0 %v8670_v24  ;;  %7228 = vmatpush3.bf16.msra.mxu0 %v8133_v12  ;;  %v2431_v24 = vpop.f32.mrb[81].mxu1 }
 0x1fb   : > { %7229 = vmatprep.subr.bf16.mxu0 %v8134_v9  ;;  %v7202_v59 = vpop.f32.mrb[82].mxu1 }
 0x1fc   : > { %v2433_v48 = vpop.f32.mrb[83].mxu1 }
 0x1fd   : > { %v9104_v31 = vadd.f32 %v2433_v48, %v8973_v44  ;;  %v7205_v50 = vpop.f32.mrb[84].mxu1 }
 0x1fe   : > { %7230 = vmatpush3.bf16.msra.mxu0 %v8134_v9  ;;  %v9107_v39 = vadd.f32 %v7205_v50, %v8982_v52  ;;  %v2445_v63 = vpop.f32.mrb[85].mxu1 }
 0x1ff   : > { %7231 = vmatprep.subr.bf16.mxu0 %v8135_v15  ;;  %v7206_v26 = vpop.f32.mrb[86].mxu1 }
 0x200   : > { %v2447_v40 = vpop.f32.mrb[87].mxu1 }
 0x201   : > { %7136 = vmatmul.mubr.bf16.gmra.mrb[12].mxu0 %v8694_v29  ;;  %v9111_v34 = vadd.f32 %v2447_v40, %v8992_v58 }
 0x202   : > { %7139 = vmatprep.mubr.bf16.mxu0 %v9021_v49  ;;  %7232 = vmatpush3.bf16.msra.mxu0 %v8135_v15 }
 0x203   : > { %7233 = vmatprep.subr.bf16.mxu0 %v8136_v18 }
 0x205   : > { %v7209_v5 = vpop.f32.mrb[88].mxu1 }
 0x206   : > { %7234 = vmatpush3.bf16.msra.mxu0 %v8136_v18  ;;  %v9115_v44 = vadd.f32 %v7209_v5, %v9002_v60  ;;  %v2459_v10 = vpop.f32.mrb[89].mxu1  ;;  %v8143_v60 = vld [vmem:[%s8429_s13 + $0x80] sm:$0xff] }
 0x207   : > { %v7210_v52 = vpop.f32.mrb[90].mxu1 }
 0x208   : > { %v2461_v33 = vpop.f32.mrb[91].mxu1 }
 0x209   : > { %7140 = vmatmul.mubr.bf16.gmra.mrb[16].mxu0 %v8140_v32  ;;  %v9118_v41 = vadd.f32 %v2461_v33, %v9008_v51 }
 0x20a   : > { %7143 = vmatprep.mubr.bf16.mxu0 %v8141_v7 }
 0x20d   : > { %v7213_v13 = vpop.f32.mrb[92].mxu1 }
 0x20e   : > { %v9121_v37 = vadd.f32 %v7213_v13, %v9013_v42  ;;  %v2473_v58 = vpop.f32.mrb[93].mxu1 }
 0x20f   : > { %v7214_v4 = vpop.f32.mrb[94].mxu1 }
 0x210   : > { %v2475_v57 = vpop.f32.mrb[95].mxu1 }
 0x211   : > { %7144 = vmatmul.mubr.bf16.gmra.mrb[20].mxu0 %v8142_v17  ;;  %v9125_v19 = vadd.f32 %v2475_v57, %v9018_v35 }
 0x212   : > { %7147 = vmatprep.mubr.bf16.mxu0 %v8143_v60 }
 0x215   : > { %v7217_v51 = vpop.f32.mrb[96].mxu1 }
 0x216   : > { %v9137_v42 = vadd.f32 %v7217_v51, %v9026_v56  ;;  %v2487_v35 = vpop.f32.mrb[97].mxu1  ;;  %v8150_v56 = vld [vmem:[%s8429_s13 + $0x50] sm:$0xff] }
 0x217   : > { %v7218_v28 = vpop.f32.mrb[98].mxu1 }
 0x219   : > { %7148 = vmatmul.mubr.bf16.gmra.mrb[24].mxu0 %v8144_v0 }
 0x21a   : > { %7151 = vmatprep.mubr.bf16.mxu0 %v8145_v62 }
 0x221   : > { %7152 = vmatmul.mubr.bf16.gmra.mrb[28].mxu0 %v8667_v23  ;;  %v2489_v23 = vpop.f32.mrb[99].mxu1 }
 0x222   : > { %7155 = vmatprep.mubr.bf16.mxu0 %v8673_v25  ;;  %v9140_v25 = vadd.f32 %v2489_v23, %v9031_v1  ;;  %v8151_v1 = vld [vmem:[%s8429_s13 + $0x98] sm:$0xff] }
 0x229   : > { %7156 = vmatmul.mubr.bf16.gmra.mrb[32].mxu0 %v8698_v30 }
 0x22a   : > { %7159 = vmatprep.mubr.bf16.mxu0 %v8890_v14 }
 0x231   : > { %7160 = vmatmul.mubr.bf16.gmra.mrb[36].mxu0 %v8897_v21 }
 0x232   : > { %7235 = vmatprep.mubr.bf16.mxu0 %v9056_v46  ;;  %v8149_v46 = vld [vmem:[%s8429_s13 + $0x48] sm:$0xff] }
 0x239   : > { %7236 = vmatmul.mubr.bf16.vlgmr.msra.gmra.mrb[60].mxu0 %v9067_v27  ;;  %v8152_v27 = vld [vmem:[%s8429_s13 + $0xa0] sm:$0xff] }
 0x23a   : > { %7239 = vmatprep.mubr.bf16.mxu0 %v8146_v45 }
 0x241   : > { %7240 = vmatmul.mubr.bf16.gmra.mrb[64].mxu0 %v8147_v55 }
 0x242   : > { %7243 = vmatprep.mubr.bf16.mxu0 %v8148_v61 }
 0x249   : > { %7244 = vmatmul.mubr.bf16.gmra.mrb[68].mxu0 %v8149_v46 }
 0x24a   : > { %7247 = vmatprep.mubr.bf16.mxu0 %v8150_v56 }
 0x251   : > { %7248 = vmatmul.mubr.bf16.gmra.mrb[72].mxu0 %v8694_v29 }
 0x252   : > { %7251 = vmatprep.mubr.bf16.mxu0 %v9021_v49 }
 0x259   : > { %7252 = vmatmul.mubr.bf16.gmra.mrb[76].mxu0 %v8140_v32 }
 0x25a   : > { %7255 = vmatprep.mubr.bf16.mxu0 %v8141_v7 }
 0x261   : > { %7256 = vmatmul.mubr.bf16.gmra.mrb[80].mxu0 %v8142_v17 }
 0x262   : > { %7259 = vmatprep.mubr.bf16.mxu0 %v8143_v60 }
 0x269   : > { %7260 = vmatmul.mubr.bf16.gmra.mrb[84].mxu0 %v8144_v0 }
 0x26a   : > { %7263 = vmatprep.mubr.bf16.mxu0 %v8145_v62 }
 0x271   : > { %7264 = vmatmul.mubr.bf16.gmra.mrb[88].mxu0 %v8151_v1 }
 0x272   : > { %7267 = vmatprep.mubr.bf16.mxu0 %v8152_v27 }
 0x279   : > { %7268 = vmatmul.mubr.bf16.gmra.mrb[92].mxu0 %v8698_v30 }
 0x27a   : > { %7271 = vmatprep.mubr.bf16.mxu0 %v8890_v14 }
 0x281   : > { %7272 = vmatmul.mubr.bf16.gmra.mrb[96].mxu0 %v8897_v21 }
 0x2bc   : > { %v7125_v36 = vpop.f32.mrb[0].mxu0 }
 0x2bd   : > { %v2113_v29 = vpop.f32.mrb[1].mxu0  ;;  %v2862_v12 = vrot.slane %v7125_v36, 7 }
 0x2be   : > { %v7126_v2 = vpop.f32.mrb[2].mxu0  ;;  %v2859_v9 = vrot.slane %v2113_v29, 7 }
 0x2bf   : > { %v2116_v49 = vpop.f32.mrb[3].mxu0 }
 0x2c0   : > { %v2860_v15 = vrot.slane %v2116_v49, 7 }
 0x2c2   : > { %v2861_v18 = vsel %vm2858_vm0, %v2859_v9, %v2860_v15  ;;  %v2863_v53 = vsel %vm2858_vm0, %v2860_v15, %v2862_v12 }
 0x2c3   : > { %v9158_v24 = vadd.f32 %v2861_v18, %v9038_v20  ;;  %v9161_v30 = vadd.f32 %v2863_v53, %v9035_v3 }
 0x2c4   : > { %v7129_v14 = vpop.f32.mrb[4].mxu0 }
 0x2c5   : > { %v2128_v21 = vpop.f32.mrb[5].mxu0  ;;  %v2867_v50 = vrot.slane %v7129_v14, 7 }
 0x2c6   : > { %v7130_v59 = vpop.f32.mrb[6].mxu0  ;;  %v2864_v63 = vrot.slane %v2128_v21, 7 }
 0x2c7   : > { %v2131_v48 = vpop.f32.mrb[7].mxu0 }
 0x2c8   : > { %v2865_v26 = vrot.slane %v2131_v48, 7 }
 0x2ca   : > { %v2866_v40 = vsel %vm2858_vm0, %v2864_v63, %v2865_v26  ;;  %v2868_v32 = vsel %vm2858_vm0, %v2865_v26, %v2867_v50 }
 0x2cb   : > { %v9166_v5 = vadd.f32 %v2866_v40, %v9046_v16  ;;  %v9169_v20 = vadd.f32 %v2868_v32, %v9043_v43 }
 0x2cc   : > { %v7133_v7 = vpop.f32.mrb[8].mxu0 }
 0x2cd   : > { %v2143_v3 = vpop.f32.mrb[9].mxu0  ;;  %v2872_v33 = vrot.slane %v7133_v7, 7 }
 0x2ce   : > { %v7134_v10 = vpop.f32.mrb[10].mxu0  ;;  %v2869_v13 = vrot.slane %v2143_v3, 7 }
 0x2cf   : > { %v2146_v52 = vpop.f32.mrb[11].mxu0 }
 0x2d0   : > { %v2870_v58 = vrot.slane %v2146_v52, 7 }
 0x2d2   : > { %v2871_v4 = vsel %vm2858_vm0, %v2869_v13, %v2870_v58  ;;  %v2873_v57 = vsel %vm2858_vm0, %v2870_v58, %v2872_v33 }
 0x2d3   : > { %v9174_v17 = vadd.f32 %v2871_v4, %v9052_v38  ;;  %v9177_v16 = vadd.f32 %v2873_v57, %v9050_v11 }
 0x2d4   : > { %v7137_v60 = vpop.f32.mrb[12].mxu0 }
 0x2d5   : > { %v2158_v43 = vpop.f32.mrb[13].mxu0  ;;  %v2877_v51 = vrot.slane %v7137_v60, 7 }
 0x2d6   : > { %v7138_v0 = vpop.f32.mrb[14].mxu0  ;;  %v2874_v35 = vrot.slane %v2158_v43, 7 }
 0x2d7   : > { %v2161_v62 = vpop.f32.mrb[15].mxu0 }
 0x2d8   : > { %v2875_v28 = vrot.slane %v2161_v62, 7 }
 0x2da   : > { %v2876_v23 = vsel %vm2858_vm0, %v2874_v35, %v2875_v28  ;;  %v2878_v45 = vsel %vm2858_vm0, %v2875_v28, %v2877_v51 }
 0x2db   : > { %v9182_v55 = vadd.f32 %v2876_v23, %v9064_v54  ;;  %v9185_v38 = vadd.f32 %v2878_v45, %v9059_v6 }
 0x2dc   : > { %v7141_v61 = vpop.f32.mrb[16].mxu0 }
 0x2dd   : > { %v2173_v11 = vpop.f32.mrb[17].mxu0  ;;  %v2882_v1 = vrot.slane %v7141_v61, 7 }
 0x2de   : > { %v7142_v46 = vpop.f32.mrb[18].mxu0  ;;  %v2879_v27 = vrot.slane %v2173_v11, 7 }
 0x2df   : > { %v2176_v56 = vpop.f32.mrb[19].mxu0 }
 0x2e0   : > { %v2880_v36 = vrot.slane %v2176_v56, 7 }
 0x2e2   : > { %v2881_v29 = vsel %vm2858_vm0, %v2879_v27, %v2880_v36  ;;  %v2883_v2 = vsel %vm2858_vm0, %v2880_v36, %v2882_v1 }
 0x2e3   : > { %v9190_v49 = vadd.f32 %v2881_v29, %v9080_v8  ;;  %v9193_v54 = vadd.f32 %v2883_v2, %v9075_v47 }
 0x2e4   : > { %v7145_v12 = vpop.f32.mrb[20].mxu0 }
 0x2e5   : > { %v2188_v6 = vpop.f32.mrb[21].mxu0  ;;  %v2887_v18 = vrot.slane %v7145_v12, 7 }
 0x2e6   : > { %v7146_v9 = vpop.f32.mrb[22].mxu0  ;;  %v2884_v53 = vrot.slane %v2188_v6, 7 }
 0x2e7   : > { %v2191_v15 = vpop.f32.mrb[23].mxu0 }
 0x2e8   : > { %v2885_v14 = vrot.slane %v2191_v15, 7 }
 0x2ea   : > { %v2886_v21 = vsel %vm2858_vm0, %v2884_v53, %v2885_v14  ;;  %v2888_v59 = vsel %vm2858_vm0, %v2885_v14, %v2887_v18 }
 0x2eb   : > { %v9198_v48 = vadd.f32 %v2886_v21, %v9104_v31  ;;  %v9201_v8 = vadd.f32 %v2888_v59, %v9101_v22 }
 0x2ec   : > { %v7149_v50 = vpop.f32.mrb[24].mxu0 }
 0x2ed   : > { %v2203_v47 = vpop.f32.mrb[25].mxu0  ;;  %v2892_v40 = vrot.slane %v7149_v50, 7 }
 0x2ee   : > { %v7150_v63 = vpop.f32.mrb[26].mxu0  ;;  %v2889_v32 = vrot.slane %v2203_v47, 7 }
 0x2ef   : > { %v2206_v26 = vpop.f32.mrb[27].mxu0  ;;  %v9239_v63 = vld [vmem:[%s10003_s3] ss:$0 sm:$0xff] }
 0x2f0   : > { %v2890_v7 = vrot.slane %v2206_v26, 7  ;;  %v9244_v26 = vstv %s8495_s11 }
 0x2f2   : > { %v2891_v3 = vsel %vm2858_vm0, %v2889_v32, %v2890_v7  ;;  %v2893_v10 = vsel %vm2858_vm0, %v2890_v7, %v2892_v40 }
 0x2f3   : > { %v9206_v52 = vadd.f32 %v2891_v3, %v9111_v34  ;;  %v9209_v31 = vadd.f32 %v2893_v10, %v9107_v39 }
 0x2f4   : > { %v7153_v33 = vpop.f32.mrb[28].mxu0 }
 0x2f5   : > { %v2218_v22 = vpop.f32.mrb[29].mxu0  ;;  %v2897_v4 = vrot.slane %v7153_v33, 7 }
 0x2f6   : > { %v7154_v13 = vpop.f32.mrb[30].mxu0  ;;  %v2894_v57 = vrot.slane %v2218_v22, 7 }
 0x2f7   : > { %v2221_v58 = vpop.f32.mrb[31].mxu0 }
 0x2f8   : > { %v2895_v60 = vrot.slane %v2221_v58, 7 }
 0x2fa   : > { %v2896_v43 = vsel %vm2858_vm0, %v2894_v57, %v2895_v60  ;;  %v2898_v0 = vsel %vm2858_vm0, %v2895_v60, %v2897_v4 }
 0x2fb   : > { %v9214_v62 = vadd.f32 %v2896_v43, %v9118_v41  ;;  %v9217_v34 = vadd.f32 %v2898_v0, %v9115_v44 }
 0x2fc   : > { %v7157_v51 = vpop.f32.mrb[32].mxu0 }
 0x2fd   : > { %v2233_v39 = vpop.f32.mrb[33].mxu0  ;;  %v2902_v23 = vrot.slane %v7157_v51, 7 }
 0x2fe   : > { %v7158_v35 = vpop.f32.mrb[34].mxu0  ;;  %v2899_v45 = vrot.slane %v2233_v39, 7 }
 0x2ff   : > { %v2236_v28 = vpop.f32.mrb[35].mxu0 }
 0x300   : > { %v2900_v61 = vrot.slane %v2236_v28, 7 }
 0x302   : > { %v2901_v11 = vsel %vm2858_vm0, %v2899_v45, %v2900_v61  ;;  %v2903_v46 = vsel %vm2858_vm0, %v2900_v61, %v2902_v23 }
 0x303   : > { %v9222_v56 = vadd.f32 %v2901_v11, %v9125_v19  ;;  %v9225_v41 = vadd.f32 %v2903_v46, %v9121_v37 }
 0x304   : > { %v7161_v1 = vpop.f32.mrb[36].mxu0 }
 0x305   : > { %v2248_v44 = vpop.f32.mrb[37].mxu0  ;;  %v2907_v29 = vrot.slane %v7161_v1, 7 }
 0x306   : > { %v7162_v27 = vpop.f32.mrb[38].mxu0  ;;  %v2904_v2 = vrot.slane %v2248_v44, 7 }
 0x307   : > { %v2251_v36 = vpop.f32.mrb[39].mxu0 }
 0x308   : > { %v2905_v12 = vrot.slane %v2251_v36, 7 }
 0x30a   : > { %v2906_v6 = vsel %vm2858_vm0, %v2904_v2, %v2905_v12  ;;  %v2908_v9 = vsel %vm2858_vm0, %v2905_v12, %v2907_v29 }
 0x30b   : > { %v9230_v15 = vadd.f32 %v2906_v6, %v9140_v25  ;;  %v9233_v19 = vadd.f32 %v2908_v9, %v9137_v42 }
 0x30c   : > { %v7237_v37 = vpop.f32.mrb[60].mxu0 }
 0x30d   : > { %v2599_v18 = vpop.f32.mrb[61].mxu0  ;;  %v2981_v14 = vrot.slane %v7237_v37, 1 }
 0x30e   : > { %v7238_v53 = vpop.f32.mrb[62].mxu0 }
 0x30f   : > { %v2983_v21 = vrot.slane %v7238_v53, 1  ;;  %v2601_v59 = vpop.f32.mrb[63].mxu0 }
 0x310   : > { %v2980_v50 = vrot.slane %v2601_v59, 1 }
 0x311   : > { %v2984_v47 = vsel %vm2979_vm1, %v2981_v14, %v2983_v21 }
 0x312   : > { %v3051_v25 = vadd.f32 %v2984_v47, %v9161_v30  ;;  %v2982_v42 = vsel %vm2979_vm1, %v2980_v50, %v2981_v14 }
 0x313   : > { %v3050_v40 = vadd.f32 %v2982_v42, %v9158_v24 }
 0x314   : > { %v3078_v32 = vadd.f32 %v9239_v63, %v3051_v25  ;;  %v7241_v7 = vpop.f32.mrb[64].mxu0 }
 0x315   : > { %v3077_v3 = vadd.f32 %v9239_v63, %v3050_v40  ;;  %v2614_v10 = vpop.f32.mrb[65].mxu0  ;;  %v2986_v30 = vrot.slane %v7241_v7, 1 }
 0x316   : > { %vm3098_vm2 = vcmp.gt.f32.partialorder %v3078_v32, 0.0  ;;  %v3119_v33 = vmul.f32 %v9244_v26, %v3078_v32  ;;  %v7242_v22 = vpop.f32.mrb[66].mxu0 }
 0x317   : > { %vm3097_vm3 = vcmp.gt.f32.partialorder %v3077_v3, 0.0  ;;  %v3118_v13 = vmul.f32 %v9244_v26, %v3077_v3  ;;  %v2988_v58 = vrot.slane %v7242_v22, 1  ;;  %v2616_v4 = vpop.f32.mrb[67].mxu0 }
 0x318   : > { %v3139_v57 = vsel %vm3098_vm2, %v3078_v32, %v3119_v33  ;;  %v2985_v60 = vrot.slane %v2616_v4, 1 }
 0x319   : > { %v3138_v43 = vsel %vm3097_vm3, %v3077_v3, %v3118_v13  ;;  %v2989_v24 = vsel %vm2979_vm1, %v2986_v30, %v2988_v58 }
 0x31a   : > { %v3158_v0 = vpack.c.bf16 %v3139_v57, %v3138_v43  ;;  %v3053_v51 = vadd.f32 %v2989_v24, %v9169_v20  ;;  %v2987_v39 = vsel %vm2979_vm1, %v2985_v60, %v2986_v30 }
 0x31b   : > { %v3052_v35 = vadd.f32 %v2987_v39, %v9166_v5 }
 0x31c   : > { %v3178_v28 = vrot.slane %v3158_v0, 4  ;;  %v3080_v23 = vadd.f32 %v9239_v63, %v3053_v51  ;;  %v7245_v45 = vpop.f32.mrb[68].mxu0 }
 0x31d   : > { %v3079_v61 = vadd.f32 %v9239_v63, %v3052_v35  ;;  %v2629_v11 = vpop.f32.mrb[69].mxu0  ;;  %v2991_v20 = vrot.slane %v7245_v45, 1 }
 0x31e   : > { %3198 = vst [vmem:[#allocation3 + $0x8] ss:$-4 sps:$4 sm:$0xff] %v3178_v28   ;;  %vm3100_vm4 = vcmp.gt.f32.partialorder %v3080_v23, 0.0  ;;  %v3121_v46 = vmul.f32 %v9244_v26, %v3080_v23  ;;  %v7246_v1 = vpop.f32.mrb[70].mxu0 }
 0x31f   : > { %vm3099_vm5 = vcmp.gt.f32.partialorder %v3079_v61, 0.0  ;;  %v3120_v44 = vmul.f32 %v9244_v26, %v3079_v61  ;;  %v2993_v27 = vrot.slane %v7246_v1, 1  ;;  %v2631_v36 = vpop.f32.mrb[71].mxu0 }
 0x320   : > { %v3141_v29 = vsel %vm3100_vm4, %v3080_v23, %v3121_v46  ;;  %v2990_v5 = vrot.slane %v2631_v36, 1 }
 0x321   : > { %v3140_v2 = vsel %vm3099_vm5, %v3079_v61, %v3120_v44  ;;  %v2994_v12 = vsel %vm2979_vm1, %v2991_v20, %v2993_v27 }
 0x322   : > { %v3159_v6 = vpack.c.bf16 %v3141_v29, %v3140_v2  ;;  %v3055_v9 = vadd.f32 %v2994_v12, %v9177_v16  ;;  %v2992_v37 = vsel %vm2979_vm1, %v2990_v5, %v2991_v20 }
 0x323   : > { %v3054_v18 = vadd.f32 %v2992_v37, %v9174_v17 }
 0x324   : > { %v3179_v53 = vrot.slane %v3159_v6, 4  ;;  %v3082_v14 = vadd.f32 %v9239_v63, %v3055_v9  ;;  %v7249_v21 = vpop.f32.mrb[72].mxu0 }
 0x325   : > { %v3081_v59 = vadd.f32 %v9239_v63, %v3054_v18  ;;  %v2644_v50 = vpop.f32.mrb[73].mxu0  ;;  %v2996_v16 = vrot.slane %v7249_v21, 1 }
 0x326   : > { %3200 = vst [vmem:[#allocation3 + $0x18] ss:$-4 sps:$4 sm:$0xff] %v3179_v53   ;;  %vm3102_vm6 = vcmp.gt.f32.partialorder %v3082_v14, 0.0  ;;  %v3123_v47 = vmul.f32 %v9244_v26, %v3082_v14  ;;  %v7250_v25 = vpop.f32.mrb[74].mxu0 }
 0x327   : > { %vm3101_vm7 = vcmp.gt.f32.partialorder %v3081_v59, 0.0  ;;  %v3122_v42 = vmul.f32 %v9244_v26, %v3081_v59  ;;  %v2998_v40 = vrot.slane %v7250_v25, 1  ;;  %v2646_v32 = vpop.f32.mrb[75].mxu0 }
 0x328   : > { %v3143_v7 = vsel %vm3102_vm6, %v3082_v14, %v3123_v47  ;;  %v2995_v17 = vrot.slane %v2646_v32, 1 }
 0x329   : > { %v3142_v3 = vsel %vm3101_vm7, %v3081_v59, %v3122_v42  ;;  %v2999_v10 = vsel %vm2979_vm1, %v2996_v16, %v2998_v40 }
 0x32a   : > { %v3160_v33 = vpack.c.bf16 %v3143_v7, %v3142_v3  ;;  %v3057_v22 = vadd.f32 %v2999_v10, %v9185_v38  ;;  %v2997_v13 = vsel %vm2979_vm1, %v2995_v17, %v2996_v16 }
 0x32b   : > { %v3056_v30 = vadd.f32 %v2997_v13, %v9182_v55 }
 0x32c   : > { %v3180_v58 = vrot.slane %v3160_v33, 4  ;;  %v3084_v4 = vadd.f32 %v9239_v63, %v3057_v22  ;;  %v7253_v57 = vpop.f32.mrb[76].mxu0 }
 0x32d   : > { %v3083_v60 = vadd.f32 %v9239_v63, %v3056_v30  ;;  %v2659_v43 = vpop.f32.mrb[77].mxu0  ;;  %v3001_v38 = vrot.slane %v7253_v57, 1 }
 0x32e   : > { %3202 = vst [vmem:[#allocation3 + $0x28] ss:$-4 sps:$4 sm:$0xff] %v3180_v58   ;;  %vm3104_vm8 = vcmp.gt.f32.partialorder %v3084_v4, 0.0  ;;  %v3125_v24 = vmul.f32 %v9244_v26, %v3084_v4  ;;  %v7254_v0 = vpop.f32.mrb[78].mxu0 }
 0x32f   : > { %vm3103_vm9 = vcmp.gt.f32.partialorder %v3083_v60, 0.0  ;;  %v3124_v51 = vmul.f32 %v9244_v26, %v3083_v60  ;;  %v3003_v39 = vrot.slane %v7254_v0, 1  ;;  %v2661_v35 = vpop.f32.mrb[79].mxu0 }
 0x330   : > { %v3145_v28 = vsel %vm3104_vm8, %v3084_v4, %v3125_v24  ;;  %v3000_v55 = vrot.slane %v2661_v35, 1 }
 0x331   : > { %v3144_v23 = vsel %vm3103_vm9, %v3083_v60, %v3124_v51  ;;  %v3004_v45 = vsel %vm2979_vm1, %v3001_v38, %v3003_v39 }
 0x332   : > { %v3161_v61 = vpack.c.bf16 %v3145_v28, %v3144_v23  ;;  %v3059_v11 = vadd.f32 %v3004_v45, %v9193_v54  ;;  %v3002_v46 = vsel %vm2979_vm1, %v3000_v55, %v3001_v38 }
 0x333   : > { %v3058_v1 = vadd.f32 %v3002_v46, %v9190_v49 }
 0x334   : > { %v3181_v44 = vrot.slane %v3161_v61, 4  ;;  %v3086_v20 = vadd.f32 %v9239_v63, %v3059_v11  ;;  %v7257_v27 = vpop.f32.mrb[80].mxu0 }
 0x335   : > { %v3085_v36 = vadd.f32 %v9239_v63, %v3058_v1  ;;  %v2674_v29 = vpop.f32.mrb[81].mxu0  ;;  %v3006_v54 = vrot.slane %v7257_v27, 1 }
 0x336   : > { %3204 = vst [vmem:[#allocation3 + $0x38] ss:$-4 sps:$4 sm:$0xff] %v3181_v44   ;;  %vm3106_vm10 = vcmp.gt.f32.partialorder %v3086_v20, 0.0  ;;  %v3127_v5 = vmul.f32 %v9244_v26, %v3086_v20  ;;  %v7258_v2 = vpop.f32.mrb[82].mxu0 }
 0x337   : > { %vm3105_vm11 = vcmp.gt.f32.partialorder %v3085_v36, 0.0  ;;  %v3126_v12 = vmul.f32 %v9244_v26, %v3085_v36  ;;  %v3008_v6 = vrot.slane %v7258_v2, 1  ;;  %v2676_v9 = vpop.f32.mrb[83].mxu0 }
 0x338   : > { %v3147_v37 = vsel %vm3106_vm10, %v3086_v20, %v3127_v5  ;;  %v3005_v49 = vrot.slane %v2676_v9, 1 }
 0x339   : > { %v3146_v18 = vsel %vm3105_vm11, %v3085_v36, %v3126_v12  ;;  %v3009_v53 = vsel %vm2979_vm1, %v3006_v54, %v3008_v6 }
 0x33a   : > { %v3162_v14 = vpack.c.bf16 %v3147_v37, %v3146_v18  ;;  %v3061_v21 = vadd.f32 %v3009_v53, %v9201_v8  ;;  %v3007_v59 = vsel %vm2979_vm1, %v3005_v49, %v3006_v54 }
 0x33b   : > { %v3060_v50 = vadd.f32 %v3007_v59, %v9198_v48 }
 0x33c   : > { %v3182_v47 = vrot.slane %v3162_v14, 4  ;;  %v3088_v25 = vadd.f32 %v9239_v63, %v3061_v21  ;;  %v7261_v42 = vpop.f32.mrb[84].mxu0 }
 0x33d   : > { %v3087_v16 = vadd.f32 %v9239_v63, %v3060_v50  ;;  %v2689_v40 = vpop.f32.mrb[85].mxu0  ;;  %v3011_v8 = vrot.slane %v7261_v42, 1 }
 0x33e   : > { %3206 = vst [vmem:[#allocation3 + $0x48] ss:$-4 sps:$4 sm:$0xff] %v3182_v47   ;;  %vm3108_vm12 = vcmp.gt.f32.partialorder %v3088_v25, 0.0  ;;  %v3129_v32 = vmul.f32 %v9244_v26, %v3088_v25  ;;  %v7262_v7 = vpop.f32.mrb[86].mxu0 }
 0x33f   : > { %vm3107_vm13 = vcmp.gt.f32.partialorder %v3087_v16, 0.0  ;;  %v3128_v17 = vmul.f32 %v9244_v26, %v3087_v16  ;;  %v3013_v3 = vrot.slane %v7262_v7, 1  ;;  %v2691_v10 = vpop.f32.mrb[87].mxu0 }
 0x340   : > { %v3149_v33 = vsel %vm3108_vm12, %v3088_v25, %v3129_v32  ;;  %v3010_v48 = vrot.slane %v2691_v10, 1 }
 0x341   : > { %v3148_v22 = vsel %vm3107_vm13, %v3087_v16, %v3128_v17  ;;  %v3014_v13 = vsel %vm2979_vm1, %v3011_v8, %v3013_v3 }
 0x342   : > { %v3163_v30 = vpack.c.bf16 %v3149_v33, %v3148_v22  ;;  %v3063_v58 = vadd.f32 %v3014_v13, %v9209_v31  ;;  %v3012_v4 = vsel %vm2979_vm1, %v3010_v48, %v3011_v8 }
 0x343   : > { %v3062_v57 = vadd.f32 %v3012_v4, %v9206_v52 }
 0x344   : > { %v3183_v60 = vrot.slane %v3163_v30, 4  ;;  %v3090_v43 = vadd.f32 %v9239_v63, %v3063_v58  ;;  %v7265_v24 = vpop.f32.mrb[88].mxu0 }
 0x345   : > { %v3089_v0 = vadd.f32 %v9239_v63, %v3062_v57  ;;  %v2704_v51 = vpop.f32.mrb[89].mxu0  ;;  %v3016_v31 = vrot.slane %v7265_v24, 1 }
 0x346   : > { %3208 = vst [vmem:[#allocation3 + $0x58] ss:$-4 sps:$4 sm:$0xff] %v3183_v60   ;;  %vm3110_vm14 = vcmp.gt.f32.partialorder %v3090_v43, 0.0  ;;  %v3131_v38 = vmul.f32 %v9244_v26, %v3090_v43  ;;  %v7266_v39 = vpop.f32.mrb[90].mxu0 }
 0x347   : > { %vm3109_vm15 = vcmp.gt.f32.partialorder %v3089_v0, 0.0  ;;  %v3130_v35 = vmul.f32 %v9244_v26, %v3089_v0  ;;  %v3018_v28 = vrot.slane %v7266_v39, 1  ;;  %v2706_v55 = vpop.f32.mrb[91].mxu0 }
 0x348   : > { %v3151_v23 = vsel %vm3110_vm14, %v3090_v43, %v3131_v38  ;;  %v3015_v52 = vrot.slane %v2706_v55, 1 }
 0x349   : > { %v3150_v45 = vsel %vm3109_vm15, %v3089_v0, %v3130_v35  ;;  %v3019_v61 = vsel %vm2979_vm1, %v3016_v31, %v3018_v28 }
 0x34a   : > { %v3164_v11 = vpack.c.bf16 %v3151_v23, %v3150_v45  ;;  %v3065_v46 = vadd.f32 %v3019_v61, %v9217_v34  ;;  %v3017_v1 = vsel %vm2979_vm1, %v3015_v52, %v3016_v31 }
 0x34b   : > { %v3064_v44 = vadd.f32 %v3017_v1, %v9214_v62 }
 0x34c   : > { %v3184_v20 = vrot.slane %v3164_v11, 4  ;;  %v3092_v27 = vadd.f32 %v9239_v63, %v3065_v46  ;;  %v7269_v36 = vpop.f32.mrb[92].mxu0 }
 0x34d   : > { %v3091_v29 = vadd.f32 %v9239_v63, %v3064_v44  ;;  %v2719_v5 = vpop.f32.mrb[93].mxu0  ;;  %v3021_v34 = vrot.slane %v7269_v36, 1 }
 0x34e   : > { %3210 = vst [vmem:[#allocation3 + $0x68] ss:$-4 sps:$4 sm:$0xff] %v3184_v20   ;;  %vm3112_vm2 = vcmp.gt.f32.partialorder %v3092_v27, 0.0  ;;  %v3133_v2 = vmul.f32 %v9244_v26, %v3092_v27  ;;  %v7270_v12 = vpop.f32.mrb[94].mxu0 }
 0x34f   : > { %vm3111_vm3 = vcmp.gt.f32.partialorder %v3091_v29, 0.0  ;;  %v3132_v54 = vmul.f32 %v9244_v26, %v3091_v29  ;;  %v3023_v6 = vrot.slane %v7270_v12, 1  ;;  %v2721_v9 = vpop.f32.mrb[95].mxu0 }
 0x350   : > { %v3153_v37 = vsel %vm3112_vm2, %v3092_v27, %v3133_v2  ;;  %v3020_v62 = vrot.slane %v2721_v9, 1 }
 0x351   : > { %v3152_v49 = vsel %vm3111_vm3, %v3091_v29, %v3132_v54  ;;  %v3024_v18 = vsel %vm2979_vm1, %v3021_v34, %v3023_v6 }
 0x352   : > { %v3165_v53 = vpack.c.bf16 %v3153_v37, %v3152_v49  ;;  %v3067_v14 = vadd.f32 %v3024_v18, %v9225_v41  ;;  %v3022_v21 = vsel %vm2979_vm1, %v3020_v62, %v3021_v34 }
 0x353   : > { %v3066_v59 = vadd.f32 %v3022_v21, %v9222_v56 }
 0x354   : > { %v3185_v50 = vrot.slane %v3165_v53, 4  ;;  %v3094_v47 = vadd.f32 %v9239_v63, %v3067_v14  ;;  %v7273_v25 = vpop.f32.mrb[96].mxu0 }
 0x355   : > { %v3093_v42 = vadd.f32 %v9239_v63, %v3066_v59  ;;  %v2734_v16 = vpop.f32.mrb[97].mxu0  ;;  %v3026_v41 = vrot.slane %v7273_v25, 1 }
 0x356   : > { %3212 = vst [vmem:[#allocation3 + $0x78] ss:$-4 sps:$4 sm:$0xff] %v3185_v50   ;;  %vm3114_vm4 = vcmp.gt.f32.partialorder %v3094_v47, 0.0  ;;  %v3135_v40 = vmul.f32 %v9244_v26, %v3094_v47  ;;  %v7274_v32 = vpop.f32.mrb[98].mxu0 }
 0x357   : > { %vm3113_vm5 = vcmp.gt.f32.partialorder %v3093_v42, 0.0  ;;  %v3134_v7 = vmul.f32 %v9244_v26, %v3093_v42  ;;  %v3028_v17 = vrot.slane %v7274_v32, 1  ;;  %v2736_v8 = vpop.f32.mrb[99].mxu0 }
 0x358   : > { %v3155_v3 = vsel %vm3114_vm4, %v3094_v47, %v3135_v40  ;;  %v3025_v56 = vrot.slane %v2736_v8, 1 }
 0x359   : > { %v3154_v10 = vsel %vm3113_vm5, %v3093_v42, %v3134_v7  ;;  %v3029_v33 = vsel %vm2979_vm1, %v3026_v41, %v3028_v17 }
 0x35a   : > { %v3166_v48 = vpack.c.bf16 %v3155_v3, %v3154_v10  ;;  %v3069_v22 = vadd.f32 %v3029_v33, %v9233_v19  ;;  %v3027_v13 = vsel %vm2979_vm1, %v3025_v56, %v3026_v41 }
 0x35b   : > { %v3068_v30 = vadd.f32 %v3027_v13, %v9230_v15  ;;  %v8289_v15 = vmov (!%p5802_p3), 0  }
 0x35c   : > { %v3186_v58 = vrot.slane %v3166_v48, 4  ;;  %v3096_v4 = vadd.f32 %v9239_v63, %v3069_v22  ;;  %3221 = vst [vmem:[#allocation3] sm:$0xff] (!%p5802_p3), %v8289_v15  ;;  %3222 = vst [vmem:[#allocation3 + $0x8] sm:$0xff] (!%p5802_p3), %v8289_v15 }
 0x35d   : > { %v3095_v57 = vadd.f32 %v9239_v63, %v3068_v30 }
 0x35e   : > { %3214 = vst [vmem:[#allocation3 + $0x88] ss:$-4 sps:$4 sm:$0xff] %v3186_v58   ;;  %vm3116_vm6 = vcmp.gt.f32.partialorder %v3096_v4, 0.0  ;;  %v3137_v60 = vmul.f32 %v9244_v26, %v3096_v4 }
 0x35f   : > { %vm3115_vm7 = vcmp.gt.f32.partialorder %v3095_v57, 0.0  ;;  %v3136_v43 = vmul.f32 %v9244_v26, %v3095_v57 }
 0x360   : > { %v3157_v24 = vsel %vm3116_vm6, %v3096_v4, %v3137_v60  ;;  %3220 = sbr.rel (%p5802_p3) target bundleno = 871 (0x367), region = 128 }
 0x361   : > { %v3156_v0 = vsel %vm3115_vm7, %v3095_v57, %v3136_v43 }
 0x362   : > { %v3167_v51 = vpack.c.bf16 %v3157_v24, %v3156_v0 }
 0x364   : > { %v3187_v19 = vrot.slane %v3167_v51, 4 }
 0x366   : > { %3216 = vst [vmem:[#allocation3 + $0x98] ss:$-4 sps:$4 sm:$0xff] %v3187_v19  }
 0x367 PF: > { %p6078_p7 = scmp.ne.s32.totalorder %s8269_s21, 1 }
 0x368   : > { %v8290_v63 = vmov (!%p6078_p7), 0  }
 0x369   : > { %3226 = sbr.rel (%p6078_p7) target bundleno = 880 (0x370), region = 132  ;;  %3228 = vst [vmem:[#allocation3 + $0x90] sm:$0xff] (!%p6078_p7), %v8290_v63  ;;  %3229 = vst [vmem:[#allocation3 + $0x98] sm:$0xff] (!%p6078_p7), %v8290_v63 }
 0x370 PF: > { %v8153_v26 = vld [vmem:[%s10004_s4 + $0xc0] sm:$0xff]   ;;  %v8155_v39 = vld [vmem:[%s10004_s4 + $0xc8] sm:$0xff]   ;;  %v8157_v31 = vld [vmem:[%s10004_s4 + $0xd0] sm:$0xff]   ;;  %vm5313_vm8 = vcmask 1043456  }
 0x371   : > { %v8154_v38 = vld [vmem:[%s10004_s4 + $0x40] sm:$0xff]   ;;  %7275 = vmatprep.subr.bf16.mxu1 %v8153_v26  ;;  %v8156_v35 = vld [vmem:[%s10004_s4 + $0x48] sm:$0xff]   ;;  %v8158_v28 = vld [vmem:[%s10004_s4 + $0x50] sm:$0xff]  }
 0x372   : > { %7276 = vmatpush3.bf16.msra.mxu1 %v8153_v26  ;;  %7467 = vmatprep.subr.bf16.mxu0 %v8154_v38  ;;  %v8159_v55 = vld [vmem:[%s10004_s4 + $0xd8] sm:$0xff]   ;;  %v8161_v52 = vld [vmem:[%s10004_s4 + $0xe0] sm:$0xff]   ;;  %v8163_v61 = vld [vmem:[%s10004_s4 + $0xe8] sm:$0xff]  }
 0x373   : > { %7468 = vmatpush3.bf16.msra.mxu0 %v8154_v38  ;;  %7277 = vmatprep.subr.bf16.mxu1 %v8155_v39  ;;  %v8160_v23 = vld [vmem:[%s10004_s4 + $0x58] sm:$0xff]   ;;  %v8162_v45 = vld [vmem:[%s10004_s4 + $0x60] sm:$0xff]   ;;  %v9359_v11 = vld [vmem:[#allocation3 + $0x10] sm:$0xff] }
 0x374   : > { %7469 = vmatprep.subr.bf16.mxu0 %v8156_v35  ;;  %v8164_v46 = vld [vmem:[%s10004_s4 + $0x68] sm:$0xff]   ;;  %7291 = vmatprep.mubr.bf16.mxu1 %v9359_v11  ;;  %v9365_v1 = vld [vmem:[#allocation3] sm:$0xff]  ;;  %v8165_v44 = vld [vmem:[%s10004_s4 + $0xf0] sm:$0xff]  }
 0x375   : > { %7483 = vmatprep.mubr.bf16.mxu0 %v9365_v1  ;;  %v8166_v20 = vld [vmem:[%s10004_s4 + $0x70] sm:$0xff]   ;;  %v8167_v27 = vld [vmem:[%s10004_s4 + $0xf8] sm:$0xff]   ;;  %v8169_v29 = vld [vmem:[%s10004_s4 + $0x100] sm:$0xff]  }
 0x376   : > { %7278 = vmatpush3.bf16.msra.mxu1 %v8155_v39  ;;  %v8168_v36 = vld [vmem:[%s10004_s4 + $0x78] sm:$0xff]   ;;  %v8174_v5 = vld [vmem:[%s10004_s4 + $0x1c0] sm:$0xff]   ;;  %v9388_v12 = vld [vmem:[#allocation3 + $0x8] sm:$0xff] }
 0x377   : > { %7470 = vmatpush3.bf16.msra.mxu0 %v8156_v35  ;;  %7279 = vmatprep.subr.bf16.mxu1 %v8157_v31  ;;  %v9386_v2 = vld [vmem:[#allocation3 + $0x18] sm:$0xff]  ;;  %v8170_v54 = vld [vmem:[%s10004_s4 + $0x108] sm:$0xff]   ;;  %v9393_v34 = vld [vmem:[#allocation3 + $0x20] sm:$0xff] }
 0x378   : > { %7471 = vmatprep.subr.bf16.mxu0 %v8158_v28  ;;  %v8175_v6 = vld [vmem:[%s10004_s4 + $0x1c8] sm:$0xff]   ;;  %v8171_v9 = vld [vmem:[%s10004_s4 + $0x110] sm:$0xff]   ;;  %v8172_v18 = vld [vmem:[%s10004_s4 + $0x118] sm:$0xff]  }
 0x379   : > { %v8177_v37 = vld [vmem:[%s10004_s4 + $0x1d0] sm:$0xff]   ;;  %v9408_v62 = vld [vmem:[#allocation3 + $0x28] sm:$0xff]  ;;  %v8178_v53 = vld [vmem:[%s10004_s4 + $0x1d8] sm:$0xff]  }
 0x37a   : > { %7280 = vmatpush3.bf16.msra.mxu1 %v8157_v31  ;;  %v9410_v49 = vld [vmem:[#allocation3 + $0x30] sm:$0xff]  ;;  %v8173_v14 = vld [vmem:[%s10004_s4 + $0x120] sm:$0xff]   ;;  %v9425_v21 = vld [vmem:[#allocation3 + $0x38] sm:$0xff] }
 0x37b   : > { %7472 = vmatpush3.bf16.msra.mxu0 %v8158_v28  ;;  %7281 = vmatprep.subr.bf16.mxu1 %v8159_v55  ;;  %v8180_v59 = vld [vmem:[%s10004_s4 + $0x1e0] sm:$0xff]   ;;  %v8176_v47 = vld [vmem:[%s10004_s4 + $0x128] sm:$0xff]   ;;  %v8179_v42 = vld [vmem:[%s10004_s4 + $0x130] sm:$0xff]  }
 0x37c   : > { %7473 = vmatprep.subr.bf16.mxu0 %v8160_v23  ;;  %v9430_v50 = vld [vmem:[#allocation3 + $0x40] sm:$0xff]  ;;  %v8181_v25 = vld [vmem:[%s10004_s4 + $0x1e8] sm:$0xff]   ;;  %v8183_v16 = vld [vmem:[%s10004_s4 + $0x1f0] sm:$0xff]  }
 0x37d   : > { %v9448_v40 = vld [vmem:[#allocation3 + $0x48] sm:$0xff]  ;;  %v9450_v32 = vld [vmem:[#allocation3 + $0x50] sm:$0xff]  ;;  %v8182_v7 = vld [vmem:[%s10004_s4 + $0x138] sm:$0xff]  }
 0x37e   : > { %7282 = vmatpush3.bf16.msra.mxu1 %v8159_v55  ;;  %v8184_v41 = vld [vmem:[%s10004_s4 + $0x1f8] sm:$0xff]   ;;  %v8185_v17 = vld [vmem:[%s10004_s4 + $0x140] sm:$0xff]   ;;  %v9473_v56 = vld [vmem:[#allocation3 + $0x68] sm:$0xff] }
 0x37f   : > { %7474 = vmatpush3.bf16.msra.mxu0 %v8160_v23  ;;  %7283 = vmatprep.subr.bf16.mxu1 %v8161_v52  ;;  %v9465_v8 = vld [vmem:[#allocation3 + $0x58] sm:$0xff]  ;;  %v9467_v3 = vld [vmem:[#allocation3 + $0x60] sm:$0xff]  ;;  %v9475_v10 = vld [vmem:[#allocation3 + $0x70] sm:$0xff] }
 0x380   : > { %7475 = vmatprep.subr.bf16.mxu0 %v8162_v45  ;;  %v9481_v33 = vld [vmem:[#allocation3 + $0x78] sm:$0xff]  ;;  %v9483_v48 = vld [vmem:[#allocation3 + $0x80] sm:$0xff]  ;;  %v9489_v22 = vld [vmem:[#allocation3 + $0x88] sm:$0xff] }
 0x381   : > { %v8186_v13 = vld [vmem:[%s10004_s4 + $0x148] sm:$0xff]   ;;  %v8187_v30 = vld [vmem:[%s10004_s4 + $0x150] sm:$0xff]   ;;  %v8188_v58 = vld [vmem:[%s10004_s4 + $0x158] sm:$0xff]  }
 0x382   : > { %7284 = vmatpush3.bf16.msra.mxu1 %v8161_v52  ;;  %v8189_v4 = vld [vmem:[%s10004_s4 + $0x160] sm:$0xff]   ;;  %v8190_v57 = vld [vmem:[%s10004_s4 + $0x168] sm:$0xff]   ;;  %v8191_v60 = vld [vmem:[%s10004_s4 + $0x170] sm:$0xff]  }
 0x383   : > { %7476 = vmatpush3.bf16.msra.mxu0 %v8162_v45  ;;  %7285 = vmatprep.subr.bf16.mxu1 %v8163_v61  ;;  %v8192_v43 = vld [vmem:[%s10004_s4 + $0x178] sm:$0xff]   ;;  %v8193_v24 = vld [vmem:[%s10004_s4] sm:$0xff]   ;;  %v9543_v0 = vld [vmem:[#allocation3 + $0x90] sm:$0xff] }
 0x384   : > { %7477 = vmatprep.subr.bf16.mxu0 %v8164_v46  ;;  %v9549_v51 = vld [vmem:[#allocation3 + $0x98] sm:$0xff]  ;;  %v8194_v19 = vld [vmem:[%s10004_s4 + $0x8] sm:$0xff]   ;;  %v8195_v15 = vld [vmem:[%s10004_s4 + $0x10] sm:$0xff]  }
 0x385   : > { %v8196_v63 = vld [vmem:[%s10004_s4 + $0x18] sm:$0xff]   ;;  %v8197_v26 = vld [vmem:[%s10004_s4 + $0x20] sm:$0xff]   ;;  %v8198_v38 = vld [vmem:[%s10004_s4 + $0x28] sm:$0xff]  }
 0x386   : > { %7286 = vmatpush3.bf16.msra.mxu1 %v8163_v61  ;;  %v8199_v39 = vld [vmem:[%s10004_s4 + $0x30] sm:$0xff]   ;;  %v8200_v35 = vld [vmem:[%s10004_s4 + $0x38] sm:$0xff]   ;;  %v8201_v31 = vld [vmem:[%s10004_s4 + $0x80] sm:$0xff]  }
 0x387   : > { %7478 = vmatpush3.bf16.msra.mxu0 %v8164_v46  ;;  %7287 = vmatprep.subr.bf16.mxu1 %v8165_v44  ;;  %v8202_v28 = vld [vmem:[%s10004_s4 + $0x88] sm:$0xff]   ;;  %v8203_v55 = vld [vmem:[%s10004_s4 + $0x90] sm:$0xff]   ;;  %v8204_v23 = vld [vmem:[%s10004_s4 + $0x98] sm:$0xff]  }
 0x388   : > { %7479 = vmatprep.subr.bf16.mxu0 %v8166_v20  ;;  %v8205_v52 = vld [vmem:[%s10004_s4 + $0xa0] sm:$0xff]   ;;  %v8206_v45 = vld [vmem:[%s10004_s4 + $0xa8] sm:$0xff]   ;;  %v8207_v61 = vld [vmem:[%s10004_s4 + $0xb0] sm:$0xff]  }
 0x38a   : > { %7288 = vmatpush3.bf16.msra.mxu1 %v8165_v44 }
 0x38b   : > { %7480 = vmatpush3.bf16.msra.mxu0 %v8166_v20  ;;  %7289 = vmatprep.subr.bf16.mxu1 %v8167_v27 }
 0x38c   : > { %7481 = vmatprep.subr.bf16.mxu0 %v8168_v36 }
 0x38e   : > { %7290 = vmatpush3.bf16.msra.mxu1 %v8167_v27  ;;  %v8208_v27 = vld [vmem:[%s10004_s4 + $0xb8] sm:$0xff]  }
 0x38f   : > { %7482 = vmatpush3.bf16.msra.mxu0 %v8168_v36  ;;  %7323 = vmatprep.subr.bf16.mxu1 %v8169_v29 }
 0x390   : > { %7611 = vmatprep.subr.bf16.mxu0 %v8174_v5 }
 0x391   : > { %7292 = vmatmul.mubr.bf16.vlgmr.msra.gmra.mrb[100].mxu1 %v9386_v2 }
 0x392   : > { %7324 = vmatpush3.bf16.msra.mxu1 %v8169_v29  ;;  %7484 = vmatmul.mubr.bf16.vlgmr.msra.gmra.mrb[100].mxu0 %v9388_v12  ;;  %v8209_v29 = vld [vmem:[%s10004_s4 + $0x180] sm:$0xff]  }
 0x393   : > { %7295 = vmatprep.mubr.bf16.mxu1 %v9393_v34  ;;  %7325 = vmatprep.subr.bf16.mxu1 %v8170_v54 }
 0x394   : > { %7487 = vmatprep.mubr.bf16.mxu0 %v9359_v11  ;;  %7612 = vmatpush3.bf16.msra.mxu0 %v8174_v5 }
 0x395   : > { %7613 = vmatprep.subr.bf16.mxu0 %v8175_v6 }
 0x396   : > { %7326 = vmatpush3.bf16.msra.mxu1 %v8170_v54 }
 0x397   : > { %7327 = vmatprep.subr.bf16.mxu1 %v8171_v9 }
 0x398   : > { %7614 = vmatpush3.bf16.msra.mxu0 %v8175_v6 }
 0x399   : > { %7296 = vmatmul.mubr.bf16.gmra.mrb[104].mxu1 %v9408_v62  ;;  %7615 = vmatprep.subr.bf16.mxu0 %v8177_v37 }
 0x39a   : > { %7488 = vmatmul.mubr.bf16.gmra.mrb[104].mxu0 %v9386_v2  ;;  %7299 = vmatprep.mubr.bf16.mxu1 %v9410_v49 }
 0x39b   : > { %7328 = vmatpush3.bf16.msra.mxu1 %v8171_v9  ;;  %7491 = vmatprep.mubr.bf16.mxu0 %v9393_v34 }
 0x39c   : > { %7329 = vmatprep.subr.bf16.mxu1 %v8172_v18  ;;  %7616 = vmatpush3.bf16.msra.mxu0 %v8177_v37 }
 0x39d   : > { %7617 = vmatprep.subr.bf16.mxu0 %v8178_v53 }
 0x39f   : > { %7330 = vmatpush3.bf16.msra.mxu1 %v8172_v18 }
 0x3a0   : > { %7331 = vmatprep.subr.bf16.mxu1 %v8173_v14  ;;  %7618 = vmatpush3.bf16.msra.mxu0 %v8178_v53 }
 0x3a1   : > { %7300 = vmatmul.mubr.bf16.gmra.mrb[108].mxu1 %v9425_v21  ;;  %7619 = vmatprep.subr.bf16.mxu0 %v8180_v59 }
 0x3a2   : > { %7492 = vmatmul.mubr.bf16.gmra.mrb[108].mxu0 %v9408_v62  ;;  %7303 = vmatprep.mubr.bf16.mxu1 %v9430_v50 }
 0x3a3   : > { %7495 = vmatprep.mubr.bf16.mxu0 %v9410_v49  ;;  %7332 = vmatpush3.bf16.msra.mxu1 %v8173_v14 }
 0x3a4   : > { %7333 = vmatprep.subr.bf16.mxu1 %v8176_v47  ;;  %7620 = vmatpush3.bf16.msra.mxu0 %v8180_v59 }
 0x3a5   : > { %7621 = vmatprep.subr.bf16.mxu0 %v8181_v25 }
 0x3a7   : > { %7334 = vmatpush3.bf16.msra.mxu1 %v8176_v47 }
 0x3a8   : > { %7335 = vmatprep.subr.bf16.mxu1 %v8179_v42  ;;  %7622 = vmatpush3.bf16.msra.mxu0 %v8181_v25 }
 0x3a9   : > { %7304 = vmatmul.mubr.bf16.gmra.mrb[112].mxu1 %v9448_v40  ;;  %7623 = vmatprep.subr.bf16.mxu0 %v8183_v16 }
 0x3aa   : > { %7496 = vmatmul.mubr.bf16.gmra.mrb[112].mxu0 %v9425_v21  ;;  %7307 = vmatprep.mubr.bf16.mxu1 %v9450_v32 }
 0x3ab   : > { %7499 = vmatprep.mubr.bf16.mxu0 %v9430_v50  ;;  %7336 = vmatpush3.bf16.msra.mxu1 %v8179_v42 }
 0x3ac   : > { %7337 = vmatprep.subr.bf16.mxu1 %v8182_v7  ;;  %7624 = vmatpush3.bf16.msra.mxu0 %v8183_v16 }
 0x3ad   : > { %7625 = vmatprep.subr.bf16.mxu0 %v8184_v41 }
 0x3af   : > { %7338 = vmatpush3.bf16.msra.mxu1 %v8182_v7 }
 0x3b0   : > { %7626 = vmatpush3.bf16.msra.mxu0 %v8184_v41  ;;  %7371 = vmatprep.subr.bf16.mxu1 %v8185_v17 }
 0x3b1   : > { %7308 = vmatmul.mubr.bf16.gmra.mrb[116].mxu1 %v9465_v8 }
 0x3b2   : > { %7500 = vmatmul.mubr.bf16.gmra.mrb[116].mxu0 %v9448_v40  ;;  %7311 = vmatprep.mubr.bf16.mxu1 %v9467_v3 }
 0x3b3   : > { %7503 = vmatprep.mubr.bf16.mxu0 %v9450_v32 }
 0x3b9   : > { %7312 = vmatmul.mubr.bf16.gmra.mrb[120].mxu1 %v9473_v56 }
 0x3ba   : > { %7504 = vmatmul.mubr.bf16.gmra.mrb[120].mxu0 %v9465_v8  ;;  %7315 = vmatprep.mubr.bf16.mxu1 %v9475_v10 }
 0x3bb   : > { %7507 = vmatprep.mubr.bf16.mxu0 %v9467_v3 }
 0x3c1   : > { %7316 = vmatmul.mubr.bf16.gmra.mrb[124].mxu1 %v9481_v33 }
 0x3c2   : > { %7508 = vmatmul.mubr.bf16.gmra.mrb[124].mxu0 %v9473_v56  ;;  %7319 = vmatprep.mubr.bf16.mxu1 %v9483_v48 }
 0x3c3   : > { %7511 = vmatprep.mubr.bf16.mxu0 %v9475_v10 }
 0x3c9   : > { %7320 = vmatmul.mubr.bf16.gmra.mrb[128].mxu1 %v9489_v22 }
 0x3ca   : > { %7512 = vmatmul.mubr.bf16.gmra.mrb[128].mxu0 %v9481_v33  ;;  %7339 = vmatprep.mubr.bf16.mxu1 %v9359_v11 }
 0x3cb   : > { %7627 = vmatprep.mubr.bf16.mxu0 %v9393_v34 }
 0x3d1   : > { %7340 = vmatmul.mubr.bf16.vlgmr.msra.gmra.mrb[132].mxu1 %v9386_v2 }
 0x3d2   : > { %7372 = vmatpush3.bf16.msra.mxu1 %v8185_v17  ;;  %7628 = vmatmul.mubr.bf16.vlgmr.msra.gmra.mrb[132].mxu0 %v9408_v62 }
 0x3d3   : > { %7343 = vmatprep.mubr.bf16.mxu1 %v9393_v34  ;;  %7373 = vmatprep.subr.bf16.mxu1 %v8186_v13 }
 0x3d4   : > { %7631 = vmatprep.mubr.bf16.mxu0 %v9410_v49 }
 0x3d6   : > { %7374 = vmatpush3.bf16.msra.mxu1 %v8186_v13 }
 0x3d7   : > { %7375 = vmatprep.subr.bf16.mxu1 %v8187_v30 }
 0x3d9   : > { %7344 = vmatmul.mubr.bf16.gmra.mrb[136].mxu1 %v9408_v62 }
 0x3da   : > { %7632 = vmatmul.mubr.bf16.gmra.mrb[136].mxu0 %v9425_v21  ;;  %7347 = vmatprep.mubr.bf16.mxu1 %v9410_v49 }
 0x3db   : > { %7376 = vmatpush3.bf16.msra.mxu1 %v8187_v30  ;;  %7635 = vmatprep.mubr.bf16.mxu0 %v9430_v50 }
 0x3dc   : > { %7377 = vmatprep.subr.bf16.mxu1 %v8188_v58 }
 0x3df   : > { %7378 = vmatpush3.bf16.msra.mxu1 %v8188_v58  ;;  %v8210_v58 = vld [vmem:[%s10004_s4 + $0x188] sm:$0xff]  }
 0x3e0   : > { %7379 = vmatprep.subr.bf16.mxu1 %v8189_v4 }
 0x3e1   : > { %7348 = vmatmul.mubr.bf16.gmra.mrb[140].mxu1 %v9425_v21 }
 0x3e2   : > { %7636 = vmatmul.mubr.bf16.gmra.mrb[140].mxu0 %v9448_v40  ;;  %7351 = vmatprep.mubr.bf16.mxu1 %v9430_v50 }
 0x3e3   : > { %7639 = vmatprep.mubr.bf16.mxu0 %v9450_v32  ;;  %7380 = vmatpush3.bf16.msra.mxu1 %v8189_v4 }
 0x3e4   : > { %7381 = vmatprep.subr.bf16.mxu1 %v8190_v57 }
 0x3e7   : > { %7382 = vmatpush3.bf16.msra.mxu1 %v8190_v57 }
 0x3e8   : > { %7383 = vmatprep.subr.bf16.mxu1 %v8191_v60 }
 0x3e9   : > { %7352 = vmatmul.mubr.bf16.gmra.mrb[144].mxu1 %v9448_v40 }
 0x3ea   : > { %7640 = vmatmul.mubr.bf16.gmra.mrb[144].mxu0 %v9465_v8  ;;  %7355 = vmatprep.mubr.bf16.mxu1 %v9450_v32 }
 0x3eb   : > { %7643 = vmatprep.mubr.bf16.mxu0 %v9467_v3  ;;  %7384 = vmatpush3.bf16.msra.mxu1 %v8191_v60 }
 0x3ec   : > { %7385 = vmatprep.subr.bf16.mxu1 %v8192_v43 }
 0x3ef   : > { %7386 = vmatpush3.bf16.msra.mxu1 %v8192_v43 }
 0x3f0   : > { %7419 = vmatprep.subr.bf16.mxu1 %v8193_v24 }
 0x3f1   : > { %7356 = vmatmul.mubr.bf16.gmra.mrb[148].mxu1 %v9465_v8 }
 0x3f2   : > { %7644 = vmatmul.mubr.bf16.gmra.mrb[148].mxu0 %v9473_v56  ;;  %7359 = vmatprep.mubr.bf16.mxu1 %v9467_v3 }
 0x3f3   : > { %7647 = vmatprep.mubr.bf16.mxu0 %v9475_v10 }
 0x3f9   : > { %7360 = vmatmul.mubr.bf16.gmra.mrb[152].mxu1 %v9473_v56 }
 0x3fa   : > { %7648 = vmatmul.mubr.bf16.gmra.mrb[152].mxu0 %v9481_v33  ;;  %7363 = vmatprep.mubr.bf16.mxu1 %v9475_v10 }
 0x3fb   : > { %7651 = vmatprep.mubr.bf16.mxu0 %v9483_v48 }
 0x401   : > { %7364 = vmatmul.mubr.bf16.gmra.mrb[156].mxu1 %v9481_v33 }
 0x402   : > { %7652 = vmatmul.mubr.bf16.gmra.mrb[156].mxu0 %v9489_v22  ;;  %7367 = vmatprep.mubr.bf16.mxu1 %v9483_v48 }
 0x403   : > { %7655 = vmatprep.mubr.bf16.mxu0 %v9543_v0 }
 0x409   : > { %7368 = vmatmul.mubr.bf16.gmra.mrb[160].mxu1 %v9489_v22 }
 0x40a   : > { %7656 = vmatmul.mubr.bf16.gmra.mrb[160].mxu0 %v9549_v51  ;;  %7387 = vmatprep.mubr.bf16.mxu1 %v9359_v11 }
 0x411   : > { %7388 = vmatmul.mubr.bf16.vlgmr.msra.gmra.mrb[164].mxu1 %v9386_v2 }
 0x412   : > { %7420 = vmatpush3.bf16.msra.mxu1 %v8193_v24  ;;  %7391 = vmatprep.mubr.bf16.mxu1 %v9393_v34 }
 0x413   : > { %7421 = vmatprep.subr.bf16.mxu1 %v8194_v19 }
 0x416   : > { %7422 = vmatpush3.bf16.msra.mxu1 %v8194_v19  ;;  %v8212_v19 = vld [vmem:[%s10004_s4 + $0x198] sm:$0xff]  }
 0x417   : > { %7423 = vmatprep.subr.bf16.mxu1 %v8195_v15 }
 0x419   : > { %7392 = vmatmul.mubr.bf16.gmra.mrb[168].mxu1 %v9408_v62 }
 0x41a   : > { %7395 = vmatprep.mubr.bf16.mxu1 %v9410_v49  ;;  %7424 = vmatpush3.bf16.msra.mxu1 %v8195_v15 }
 0x41b   : > { %7425 = vmatprep.subr.bf16.mxu1 %v8196_v63 }
 0x41e   : > { %7426 = vmatpush3.bf16.msra.mxu1 %v8196_v63 }
 0x41f   : > { %7427 = vmatprep.subr.bf16.mxu1 %v8197_v26 }
 0x421   : > { %7396 = vmatmul.mubr.bf16.gmra.mrb[172].mxu1 %v9425_v21 }
 0x422   : > { %7399 = vmatprep.mubr.bf16.mxu1 %v9430_v50  ;;  %7428 = vmatpush3.bf16.msra.mxu1 %v8197_v26 }
 0x423   : > { %7429 = vmatprep.subr.bf16.mxu1 %v8198_v38 }
 0x426   : > { %7430 = vmatpush3.bf16.msra.mxu1 %v8198_v38  ;;  %v8214_v38 = vld [vmem:[%s10004_s4 + $0x1a8] sm:$0xff]  }
 0x427   : > { %7431 = vmatprep.subr.bf16.mxu1 %v8199_v39 }
 0x429   : > { %7400 = vmatmul.mubr.bf16.gmra.mrb[176].mxu1 %v9448_v40 }
 0x42a   : > { %7403 = vmatprep.mubr.bf16.mxu1 %v9450_v32  ;;  %7432 = vmatpush3.bf16.msra.mxu1 %v8199_v39 }
 0x42b   : > { %7433 = vmatprep.subr.bf16.mxu1 %v8200_v35 }
 0x42e   : > { %7434 = vmatpush3.bf16.msra.mxu1 %v8200_v35 }
 0x42f   : > { %7515 = vmatprep.subr.bf16.mxu1 %v8201_v31 }
 0x431   : > { %7404 = vmatmul.mubr.bf16.gmra.mrb[180].mxu1 %v9465_v8 }
 0x432   : > { %7407 = vmatprep.mubr.bf16.mxu1 %v9467_v3 }
 0x439   : > { %7408 = vmatmul.mubr.bf16.gmra.mrb[184].mxu1 %v9473_v56 }
 0x43a   : > { %7411 = vmatprep.mubr.bf16.mxu1 %v9475_v10 }
 0x441   : > { %7412 = vmatmul.mubr.bf16.gmra.mrb[188].mxu1 %v9481_v33 }
 0x442   : > { %7415 = vmatprep.mubr.bf16.mxu1 %v9483_v48 }
 0x449   : > { %7416 = vmatmul.mubr.bf16.gmra.mrb[192].mxu1 %v9489_v22 }
 0x44a   : > { %7435 = vmatprep.mubr.bf16.mxu1 %v9365_v1 }
 0x451   : > { %7436 = vmatmul.mubr.bf16.vlgmr.msra.gmra.mrb[100].mxu1 %v9388_v12 }
 0x452   : > { %7516 = vmatpush3.bf16.msra.mxu1 %v8201_v31  ;;  %7439 = vmatprep.mubr.bf16.mxu1 %v9359_v11 }
 0x453   : > { %7517 = vmatprep.subr.bf16.mxu1 %v8202_v28 }
 0x456   : > { %7518 = vmatpush3.bf16.msra.mxu1 %v8202_v28 }
 0x457   : > { %7519 = vmatprep.subr.bf16.mxu1 %v8203_v55 }
 0x459   : > { %7440 = vmatmul.mubr.bf16.gmra.mrb[104].mxu1 %v9386_v2 }
 0x45a   : > { %7443 = vmatprep.mubr.bf16.mxu1 %v9393_v34  ;;  %7520 = vmatpush3.bf16.msra.mxu1 %v8203_v55 }
 0x45b   : > { %7521 = vmatprep.subr.bf16.mxu1 %v8204_v23 }
 0x45e   : > { %7522 = vmatpush3.bf16.msra.mxu1 %v8204_v23 }
 0x45f   : > { %7523 = vmatprep.subr.bf16.mxu1 %v8205_v52 }
 0x461   : > { %7444 = vmatmul.mubr.bf16.gmra.mrb[108].mxu1 %v9408_v62 }
 0x462   : > { %7447 = vmatprep.mubr.bf16.mxu1 %v9410_v49  ;;  %7524 = vmatpush3.bf16.msra.mxu1 %v8205_v52 }
 0x463   : > { %7525 = vmatprep.subr.bf16.mxu1 %v8206_v45 }
 0x465   : > { %v9618_v46 = vpop.f32.mrb[100].mxu0 }
 0x466   : > { %7526 = vmatpush3.bf16.msra.mxu1 %v8206_v45  ;;  %v4242_v44 = vpop.f32.mrb[101].mxu0 }
 0x467   : > { %7527 = vmatprep.subr.bf16.mxu1 %v8207_v61  ;;  %v7486_v20 = vpop.f32.mrb[102].mxu0 }
 0x468   : > { %v9623_v36 = vpop.f32.mrb[103].mxu0  ;;  %v8216_v20 = vld [vmem:[%s10004_s4 + $0x1b8] sm:$0xff]  }
 0x469   : > { %7448 = vmatmul.mubr.bf16.gmra.mrb[112].mxu1 %v9425_v21 }
 0x46a   : > { %7451 = vmatprep.mubr.bf16.mxu1 %v9430_v50  ;;  %7528 = vmatpush3.bf16.msra.mxu1 %v8207_v61 }
 0x46b   : > { %7529 = vmatprep.subr.bf16.mxu1 %v8208_v27 }
 0x46d   : > { %v9630_v5 = vpop.f32.mrb[104].mxu0 }
 0x46e   : > { %7530 = vmatpush3.bf16.msra.mxu1 %v8208_v27  ;;  %v4256_v54 = vpop.f32.mrb[105].mxu0 }
 0x46f   : > { %v7490_v6 = vpop.f32.mrb[106].mxu0  ;;  %7563 = vmatprep.subr.bf16.mxu1 %v8209_v29  ;;  %v9704_v54 = vld [vmem:[%s10004_s4 + $0x200] sm:$0xff]  }
 0x470   : > { %v9632_v9 = vpop.f32.mrb[107].mxu0 }
 0x471   : > { %7452 = vmatmul.mubr.bf16.gmra.mrb[116].mxu1 %v9448_v40 }
 0x472   : > { %7455 = vmatprep.mubr.bf16.mxu1 %v9450_v32 }
 0x475   : > { %v9636_v37 = vpop.f32.mrb[108].mxu0 }
 0x476   : > { %v4270_v18 = vpop.f32.mrb[109].mxu0 }
 0x477   : > { %v7494_v53 = vpop.f32.mrb[110].mxu0 }
 0x478   : > { %v9638_v14 = vpop.f32.mrb[111].mxu0 }
 0x479   : > { %7456 = vmatmul.mubr.bf16.gmra.mrb[120].mxu1 %v9465_v8 }
 0x47a   : > { %7459 = vmatprep.mubr.bf16.mxu1 %v9467_v3 }
 0x47d   : > { %v9642_v59 = vpop.f32.mrb[112].mxu0 }
 0x47e   : > { %v4284_v47 = vpop.f32.mrb[113].mxu0 }
 0x47f   : > { %v7498_v25 = vpop.f32.mrb[114].mxu0 }
 0x480   : > { %v9644_v42 = vpop.f32.mrb[115].mxu0 }
 0x481   : > { %7460 = vmatmul.mubr.bf16.gmra.mrb[124].mxu1 %v9473_v56 }
 0x482   : > { %7463 = vmatprep.mubr.bf16.mxu1 %v9475_v10 }
 0x485   : > { %v9648_v16 = vpop.f32.mrb[116].mxu0 }
 0x486   : > { %v4298_v7 = vpop.f32.mrb[117].mxu0 }
 0x487   : > { %v7502_v41 = vpop.f32.mrb[118].mxu0 }
 0x488   : > { %v9650_v17 = vpop.f32.mrb[119].mxu0 }
 0x489   : > { %7464 = vmatmul.mubr.bf16.gmra.mrb[128].mxu1 %v9481_v33 }
 0x48a   : > { %7531 = vmatprep.mubr.bf16.mxu1 %v9365_v1  ;;  %v8211_v1 = vld [vmem:[%s10004_s4 + $0x190] sm:$0xff]  }
 0x48d   : > { %v9654_v13 = vpop.f32.mrb[120].mxu0 }
 0x48e   : > { %v4312_v30 = vpop.f32.mrb[121].mxu0 }
 0x48f   : > { %v7506_v4 = vpop.f32.mrb[122].mxu0 }
 0x490   : > { %v9659_v57 = vpop.f32.mrb[123].mxu0 }
 0x491   : > { %7532 = vmatmul.mubr.bf16.vlgmr.msra.gmra.mrb[164].mxu1 %v9388_v12 }
 0x492   : > { %7564 = vmatpush3.bf16.msra.mxu1 %v8209_v29  ;;  %7535 = vmatprep.mubr.bf16.mxu1 %v9359_v11  ;;  %v8213_v11 = vld [vmem:[%s10004_s4 + $0x1a0] sm:$0xff]  }
 0x493   : > { %7565 = vmatprep.subr.bf16.mxu1 %v8210_v58 }
 0x495   : > { %v9666_v60 = vpop.f32.mrb[124].mxu0 }
 0x496   : > { %7566 = vmatpush3.bf16.msra.mxu1 %v8210_v58  ;;  %v4326_v43 = vpop.f32.mrb[125].mxu0 }
 0x497   : > { %v7510_v24 = vpop.f32.mrb[126].mxu0  ;;  %7567 = vmatprep.subr.bf16.mxu1 %v8211_v1 }
 0x498   : > { %v9671_v15 = vpop.f32.mrb[127].mxu0 }
 0x499   : > { %7536 = vmatmul.mubr.bf16.gmra.mrb[168].mxu1 %v9386_v2  ;;  %v8215_v2 = vld [vmem:[%s10004_s4 + $0x1b0] sm:$0xff]  }
 0x49a   : > { %7539 = vmatprep.mubr.bf16.mxu1 %v9393_v34  ;;  %7568 = vmatpush3.bf16.msra.mxu1 %v8211_v1 }
 0x49b   : > { %7569 = vmatprep.subr.bf16.mxu1 %v8212_v19 }
 0x49d   : > { %v9678_v12 = vpop.f32.mrb[128].mxu0 }
 0x49e   : > { %v4340_v63 = vpop.f32.mrb[129].mxu0  ;;  %7570 = vmatpush3.bf16.msra.mxu1 %v8212_v19 }
 0x49f   : > { %v7514_v26 = vpop.f32.mrb[130].mxu0  ;;  %7571 = vmatprep.subr.bf16.mxu1 %v8213_v11 }
 0x4a0   : > { %v9683_v39 = vpop.f32.mrb[131].mxu0 }
 0x4a1   : > { %7540 = vmatmul.mubr.bf16.gmra.mrb[172].mxu1 %v9408_v62 }
 0x4a2   : > { %7543 = vmatprep.mubr.bf16.mxu1 %v9410_v49  ;;  %7572 = vmatpush3.bf16.msra.mxu1 %v8213_v11 }
 0x4a3   : > { %7573 = vmatprep.subr.bf16.mxu1 %v8214_v38 }
 0x4a4   : > { %v7341_v35 = vpop.f32.mrb[132].mxu1 }
 0x4a5   : > { %v4250_v31 = vadd.f32 %v9618_v46, %v7341_v35  ;;  %v3630_v28 = vpop.f32.mrb[133].mxu1  ;;  %v7629_v55 = vpop.f32.mrb[132].mxu0 }
 0x4a6   : > { %v7342_v23 = vpop.f32.mrb[134].mxu1  ;;  %v4888_v52 = vpop.f32.mrb[133].mxu0  ;;  %7574 = vmatpush3.bf16.msra.mxu1 %v8214_v38 }
 0x4a7   : > { %v9691_v45 = vadd.f32 %v7629_v55, %v4250_v31  ;;  %v3632_v61 = vpop.f32.mrb[135].mxu1  ;;  %v7630_v44 = vpop.f32.mrb[134].mxu0  ;;  %7575 = vmatprep.subr.bf16.mxu1 %v8215_v2 }
 0x4a8   : > { %v4245_v27 = vadd.f32 %v9623_v36, %v3632_v61  ;;  %v4890_v29 = vpop.f32.mrb[135].mxu0 }
 0x4a9   : > { %7544 = vmatmul.mubr.bf16.gmra.mrb[176].mxu1 %v9425_v21 }
 0x4aa   : > { %v9698_v46 = vadd.f32 %v4890_v29, %v4245_v27  ;;  %7547 = vmatprep.mubr.bf16.mxu1 %v9430_v50  ;;  %7576 = vmatpush3.bf16.msra.mxu1 %v8215_v2 }
 0x4ab   : > { %7577 = vmatprep.subr.bf16.mxu1 %v8216_v20 }
 0x4ac   : > { %v7345_v6 = vpop.f32.mrb[136].mxu1 }
 0x4ad   : > { %v4264_v18 = vadd.f32 %v9630_v5, %v7345_v6  ;;  %v3644_v53 = vpop.f32.mrb[137].mxu1  ;;  %v7633_v47 = vpop.f32.mrb[136].mxu0 }
 0x4ae   : > { %v7346_v36 = vpop.f32.mrb[138].mxu1  ;;  %v4902_v25 = vpop.f32.mrb[137].mxu0  ;;  %7578 = vmatpush3.bf16.msra.mxu1 %v8216_v20 }
 0x4af   : > { %v9707_v7 = vadd.f32 %v7633_v47, %v4264_v18  ;;  %v3646_v41 = vpop.f32.mrb[139].mxu1  ;;  %v7634_v30 = vpop.f32.mrb[138].mxu0  ;;  %7659 = vmatprep.subr.bf16.mxu1 %v9704_v54 }
 0x4b0   : > { %v4259_v58 = vadd.f32 %v9632_v9, %v3646_v41  ;;  %v4904_v4 = vpop.f32.mrb[139].mxu0 }
 0x4b1   : > { %7548 = vmatmul.mubr.bf16.gmra.mrb[180].mxu1 %v9448_v40 }
 0x4b2   : > { %v9712_v1 = vadd.f32 %v4904_v4, %v4259_v58  ;;  %7551 = vmatprep.mubr.bf16.mxu1 %v9450_v32 }
 0x4b4   : > { %v7349_v5 = vpop.f32.mrb[140].mxu1 }
 0x4b5   : > { %v4278_v43 = vadd.f32 %v9636_v37, %v7349_v5  ;;  %v3658_v24 = vpop.f32.mrb[141].mxu1  ;;  %v7637_v19 = vpop.f32.mrb[140].mxu0 }
 0x4b6   : > { %v7350_v11 = vpop.f32.mrb[142].mxu1  ;;  %v4916_v63 = vpop.f32.mrb[141].mxu0 }
 0x4b7   : > { %v9716_v26 = vadd.f32 %v7637_v19, %v4278_v43  ;;  %v3660_v38 = vpop.f32.mrb[143].mxu1  ;;  %v7638_v2 = vpop.f32.mrb[142].mxu0 }
 0x4b8   : > { %v4273_v9 = vadd.f32 %v9638_v14, %v3660_v38  ;;  %v4918_v35 = vpop.f32.mrb[143].mxu0 }
 0x4b9   : > { %7552 = vmatmul.mubr.bf16.gmra.mrb[184].mxu1 %v9465_v8 }
 0x4ba   : > { %v9720_v31 = vadd.f32 %v4918_v35, %v4273_v9  ;;  %7555 = vmatprep.mubr.bf16.mxu1 %v9467_v3 }
 0x4bc   : > { %v7353_v28 = vpop.f32.mrb[144].mxu1 }
 0x4bd   : > { %v4292_v37 = vadd.f32 %v9642_v59, %v7353_v28  ;;  %v3672_v55 = vpop.f32.mrb[145].mxu1  ;;  %v7641_v23 = vpop.f32.mrb[144].mxu0 }
 0x4be   : > { %v7354_v52 = vpop.f32.mrb[146].mxu1  ;;  %v4930_v61 = vpop.f32.mrb[145].mxu0 }
 0x4bf   : > { %v9724_v44 = vadd.f32 %v7641_v23, %v4292_v37  ;;  %v3674_v20 = vpop.f32.mrb[147].mxu1  ;;  %v7642_v27 = vpop.f32.mrb[146].mxu0 }
 0x4c0   : > { %v4287_v14 = vadd.f32 %v9644_v42, %v3674_v20  ;;  %v4932_v29 = vpop.f32.mrb[147].mxu0 }
 0x4c1   : > { %7556 = vmatmul.mubr.bf16.gmra.mrb[188].mxu1 %v9473_v56 }
 0x4c2   : > { %v9728_v6 = vadd.f32 %v4932_v29, %v4287_v14  ;;  %7559 = vmatprep.mubr.bf16.mxu1 %v9475_v10 }
 0x4c4   : > { %v7357_v18 = vpop.f32.mrb[148].mxu1 }
 0x4c5   : > { %v4306_v59 = vadd.f32 %v9648_v16, %v7357_v18  ;;  %v3686_v53 = vpop.f32.mrb[149].mxu1  ;;  %v7645_v47 = vpop.f32.mrb[148].mxu0 }
 0x4c6   : > { %v7358_v36 = vpop.f32.mrb[150].mxu1  ;;  %v4944_v25 = vpop.f32.mrb[149].mxu0 }
 0x4c7   : > { %v9732_v41 = vadd.f32 %v7645_v47, %v4306_v59  ;;  %v3688_v30 = vpop.f32.mrb[151].mxu1  ;;  %v7646_v58 = vpop.f32.mrb[150].mxu0  ;;  %v8221_v59 = vld [vmem:[%s10004_s4 + $0x220] sm:$0xff]  }
 0x4c8   : > { %v4301_v42 = vadd.f32 %v9650_v17, %v3688_v30  ;;  %v4946_v4 = vpop.f32.mrb[151].mxu0  ;;  %v8218_v17 = vld [vmem:[%s10004_s4 + $0x208] sm:$0xff]  }
 0x4c9   : > { %7560 = vmatmul.mubr.bf16.gmra.mrb[192].mxu1 %v9481_v33 }
 0x4ca   : > { %v9736_v5 = vadd.f32 %v4946_v4, %v4301_v42  ;;  %7579 = vmatprep.mubr.bf16.mxu1 %v9393_v34 }
 0x4cc   : > { %v7361_v43 = vpop.f32.mrb[152].mxu1 }
 0x4cd   : > { %v4320_v16 = vadd.f32 %v9654_v13, %v7361_v43  ;;  %v3700_v24 = vpop.f32.mrb[153].mxu1  ;;  %v7649_v19 = vpop.f32.mrb[152].mxu0  ;;  %v8219_v13 = vld [vmem:[%s10004_s4 + $0x210] sm:$0xff]   ;;  %v8222_v43 = vld [vmem:[%s10004_s4 + $0x228] sm:$0xff]  }
 0x4ce   : > { %v7362_v11 = vpop.f32.mrb[154].mxu1  ;;  %v4958_v63 = vpop.f32.mrb[153].mxu0 }
 0x4cf   : > { %v9740_v38 = vadd.f32 %v7649_v19, %v4320_v16  ;;  %v3702_v2 = vpop.f32.mrb[155].mxu1  ;;  %v7650_v9 = vpop.f32.mrb[154].mxu0  ;;  %v8223_v19 = vld [vmem:[%s10004_s4 + $0x230] sm:$0xff]   ;;  %v8224_v11 = vld [vmem:[%s10004_s4 + $0x238] sm:$0xff]  }
 0x4d0   : > { %v4315_v35 = vadd.f32 %v9659_v57, %v3702_v2  ;;  %v4960_v28 = vpop.f32.mrb[155].mxu0 }
 0x4d1   : > { %7580 = vmatmul.mubr.bf16.vlgmr.msra.gmra.mrb[100].mxu1 %v9408_v62 }
 0x4d2   : > { %v9747_v34 = vadd.f32 %v4960_v28, %v4315_v35  ;;  %7660 = vmatpush3.bf16.msra.mxu1 %v9704_v54  ;;  %7583 = vmatprep.mubr.bf16.mxu1 %v9410_v49  ;;  %v8220_v54 = vld [vmem:[%s10004_s4 + $0x218] sm:$0xff]  }
 0x4d3   : > { %7661 = vmatprep.subr.bf16.mxu1 %v8218_v17 }
 0x4d4   : > { %v7365_v37 = vpop.f32.mrb[156].mxu1 }
 0x4d5   : > { %v4334_v55 = vadd.f32 %v9666_v60, %v7365_v37  ;;  %v3714_v23 = vpop.f32.mrb[157].mxu1  ;;  %v7653_v52 = vpop.f32.mrb[156].mxu0 }
 0x4d6   : > { %v7366_v57 = vpop.f32.mrb[158].mxu1  ;;  %v4972_v61 = vpop.f32.mrb[157].mxu0  ;;  %7662 = vmatpush3.bf16.msra.mxu1 %v8218_v17 }
 0x4d7   : > { %v9755_v20 = vadd.f32 %v7653_v52, %v4334_v55  ;;  %v3716_v27 = vpop.f32.mrb[159].mxu1  ;;  %v7654_v14 = vpop.f32.mrb[158].mxu0  ;;  %7663 = vmatprep.subr.bf16.mxu1 %v8219_v13 }
 0x4d8   : > { %v4329_v29 = vadd.f32 %v9671_v15, %v3716_v27  ;;  %v4974_v18 = vpop.f32.mrb[159].mxu0 }
 0x4d9   : > { %7584 = vmatmul.mubr.bf16.gmra.mrb[104].mxu1 %v9425_v21 }
 0x4da   : > { %v9762_v60 = vadd.f32 %v4974_v18, %v4329_v29  ;;  %7587 = vmatprep.mubr.bf16.mxu1 %v9430_v50  ;;  %7664 = vmatpush3.bf16.msra.mxu1 %v8219_v13 }
 0x4db   : > { %7665 = vmatprep.subr.bf16.mxu1 %v8220_v54 }
 0x4dc   : > { %v7369_v53 = vpop.f32.mrb[160].mxu1 }
 0x4dd   : > { %v4348_v47 = vadd.f32 %v9678_v12, %v7369_v53  ;;  %v3728_v36 = vpop.f32.mrb[161].mxu1  ;;  %v7657_v25 = vpop.f32.mrb[160].mxu0 }
 0x4de   : > { %v7370_v30 = vpop.f32.mrb[162].mxu1  ;;  %v4986_v15 = vpop.f32.mrb[161].mxu0  ;;  %7666 = vmatpush3.bf16.msra.mxu1 %v8220_v54 }
 0x4df   : > { %v9769_v58 = vadd.f32 %v7657_v25, %v4348_v47  ;;  %v3730_v42 = vpop.f32.mrb[163].mxu1  ;;  %v7658_v4 = vpop.f32.mrb[162].mxu0  ;;  %7667 = vmatprep.subr.bf16.mxu1 %v8221_v59 }
 0x4e0   : > { %v4343_v16 = vadd.f32 %v9683_v39, %v3730_v42  ;;  %v4988_v24 = vpop.f32.mrb[163].mxu0  ;;  %v8225_v39 = vld [vmem:[#allocation3 + $0x20] sm:$0xff] }
 0x4e1   : > { %7588 = vmatmul.mubr.bf16.gmra.mrb[108].mxu1 %v9448_v40 }
 0x4e2   : > { %v9776_v12 = vadd.f32 %v4988_v24, %v4343_v16  ;;  %7591 = vmatprep.mubr.bf16.mxu1 %v9450_v32  ;;  %7668 = vmatpush3.bf16.msra.mxu1 %v8221_v59 }
 0x4e3   : > { %7669 = vmatprep.subr.bf16.mxu1 %v8222_v43 }
 0x4e6   : > { %7670 = vmatpush3.bf16.msra.mxu1 %v8222_v43 }
 0x4e7   : > { %7671 = vmatprep.subr.bf16.mxu1 %v8223_v19 }
 0x4e9   : > { %7592 = vmatmul.mubr.bf16.gmra.mrb[112].mxu1 %v9465_v8 }
 0x4ea   : > { %7595 = vmatprep.mubr.bf16.mxu1 %v9467_v3  ;;  %7672 = vmatpush3.bf16.msra.mxu1 %v8223_v19 }
 0x4eb   : > { %7673 = vmatprep.subr.bf16.mxu1 %v8224_v11 }
 0x4ee   : > { %7674 = vmatpush3.bf16.msra.mxu1 %v8224_v11 }
 0x4f1   : > { %7596 = vmatmul.mubr.bf16.gmra.mrb[116].mxu1 %v9473_v56 }
 0x4f2   : > { %7599 = vmatprep.mubr.bf16.mxu1 %v9475_v10 }
 0x4f9   : > { %7600 = vmatmul.mubr.bf16.gmra.mrb[120].mxu1 %v9481_v33 }
 0x4fa   : > { %7603 = vmatprep.mubr.bf16.mxu1 %v9483_v48 }
 0x501   : > { %7604 = vmatmul.mubr.bf16.gmra.mrb[124].mxu1 %v9489_v22 }
 0x502   : > { %7607 = vmatprep.mubr.bf16.mxu1 %v9543_v0 }
 0x509   : > { %7608 = vmatmul.mubr.bf16.gmra.mrb[128].mxu1 %v9549_v51 }
 0x50a   : > { %7675 = vmatprep.mubr.bf16.mxu1 %v8225_v39 }
 0x511   : > { %7676 = vmatmul.mubr.bf16.vlgmr.msra.gmra.mrb[164].mxu1 %v9408_v62 }
 0x512   : > { %7679 = vmatprep.mubr.bf16.mxu1 %v9410_v49 }
 0x519   : > { %7680 = vmatmul.mubr.bf16.gmra.mrb[168].mxu1 %v9425_v21 }
 0x51a   : > { %7683 = vmatprep.mubr.bf16.mxu1 %v9430_v50 }
 0x521   : > { %7684 = vmatmul.mubr.bf16.gmra.mrb[172].mxu1 %v9448_v40 }
 0x522   : > { %7687 = vmatprep.mubr.bf16.mxu1 %v9450_v32 }
 0x529   : > { %7688 = vmatmul.mubr.bf16.gmra.mrb[176].mxu1 %v9465_v8 }
 0x52a   : > { %7691 = vmatprep.mubr.bf16.mxu1 %v9467_v3 }
 0x531   : > { %7692 = vmatmul.mubr.bf16.gmra.mrb[180].mxu1 %v9473_v56 }
 0x532   : > { %7695 = vmatprep.mubr.bf16.mxu1 %v9475_v10 }
 0x539   : > { %7696 = vmatmul.mubr.bf16.gmra.mrb[184].mxu1 %v9481_v33 }
 0x53a   : > { %7699 = vmatprep.mubr.bf16.mxu1 %v9483_v48 }
 0x541   : > { %7700 = vmatmul.mubr.bf16.gmra.mrb[188].mxu1 %v9489_v22 }
 0x542   : > { %7703 = vmatprep.mubr.bf16.mxu1 %v9543_v0 }
 0x549   : > { %7704 = vmatmul.mubr.bf16.gmra.mrb[192].mxu1 %v9549_v51 }
 0x5a4   : > { %v7581_v62 = vpop.f32.mrb[100].mxu1 }
 0x5a5   : > { %v4670_v49 = vpop.f32.mrb[101].mxu1  ;;  %v5389_v40 = vrot.slane %v7581_v62, 7 }
 0x5a6   : > { %v7582_v21 = vpop.f32.mrb[102].mxu1  ;;  %v5386_v32 = vrot.slane %v4670_v49, 7 }
 0x5a7   : > { %v4673_v50 = vpop.f32.mrb[103].mxu1 }
 0x5a8   : > { %v5387_v8 = vrot.slane %v4673_v50, 7 }
 0x5aa   : > { %v5388_v3 = vsel %vm2858_vm0, %v5386_v32, %v5387_v8  ;;  %v5390_v56 = vsel %vm2858_vm0, %v5387_v8, %v5389_v40 }
 0x5ab   : > { %v9812_v10 = vadd.f32 %v5388_v3, %v9698_v46  ;;  %v9815_v33 = vadd.f32 %v5390_v56, %v9691_v45 }
 0x5ac   : > { %v7585_v48 = vpop.f32.mrb[104].mxu1 }
 0x5ad   : > { %v4685_v22 = vpop.f32.mrb[105].mxu1  ;;  %v5394_v63 = vrot.slane %v7585_v48, 7 }
 0x5ae   : > { %v7586_v0 = vpop.f32.mrb[106].mxu1  ;;  %v5391_v2 = vrot.slane %v4685_v22, 7 }
 0x5af   : > { %v4688_v51 = vpop.f32.mrb[107].mxu1 }
 0x5b0   : > { %v5392_v9 = vrot.slane %v4688_v51, 7 }
 0x5b2   : > { %v5393_v17 = vsel %vm2858_vm0, %v5391_v2, %v5392_v9  ;;  %v5395_v35 = vsel %vm2858_vm0, %v5392_v9, %v5394_v63 }
 0x5b3   : > { %v9820_v28 = vadd.f32 %v5393_v17, %v9712_v1  ;;  %v9823_v46 = vadd.f32 %v5395_v35, %v9707_v7 }
 0x5b4   : > { %v7589_v13 = vpop.f32.mrb[108].mxu1 }
 0x5b5   : > { %v4700_v45 = vpop.f32.mrb[109].mxu1  ;;  %v5399_v23 = vrot.slane %v7589_v13, 7 }
 0x5b6   : > { %v7590_v37 = vpop.f32.mrb[110].mxu1  ;;  %v5396_v52 = vrot.slane %v4700_v45, 7 }
 0x5b7   : > { %v4703_v55 = vpop.f32.mrb[111].mxu1 }
 0x5b8   : > { %v5397_v57 = vrot.slane %v4703_v55, 7  ;;  %v6279_v55 = vld [vmem:[%s8429_s13 + $0x20] sm:$0xf0] }
 0x5ba   : > { %v5398_v61 = vsel %vm2858_vm0, %v5396_v52, %v5397_v57  ;;  %v5400_v27 = vsel %vm2858_vm0, %v5397_v57, %v5399_v23 }
 0x5bb   : > { %v9828_v14 = vadd.f32 %v5398_v61, %v9720_v31  ;;  %v9831_v1 = vadd.f32 %v5400_v27, %v9716_v26  ;;  %v6280_v61 = vld [vmem:[%s8429_s13 + $0x28] sm:$0xf] }
 0x5bc   : > { %v7593_v54 = vpop.f32.mrb[112].mxu1 }
 0x5bd   : > { %v4715_v7 = vpop.f32.mrb[113].mxu1  ;;  %v5404_v59 = vrot.slane %v7593_v54, 7 }
 0x5be   : > { %v7594_v29 = vpop.f32.mrb[114].mxu1  ;;  %v5401_v53 = vrot.slane %v4715_v7, 7  ;;  %v5314_v7 = vrot.slane %v6279_v55, 4 }
 0x5bf   : > { %v4718_v18 = vpop.f32.mrb[115].mxu1  ;;  %v5315_v29 = vrot.slane %v6280_v61, 4 }
 0x5c0   : > { %v5402_v47 = vrot.slane %v4718_v18, 7 }
 0x5c2   : > { %v5403_v36 = vsel %vm2858_vm0, %v5401_v53, %v5402_v47  ;;  %v5405_v25 = vsel %vm2858_vm0, %v5402_v47, %v5404_v59 }
 0x5c3   : > { %v9836_v30 = vadd.f32 %v5403_v36, %v9728_v6  ;;  %v9839_v31 = vadd.f32 %v5405_v25, %v9724_v44  ;;  %v5316_v36 = vsel %vm5313_vm8, %v5314_v7, %v5315_v29 }
 0x5c4   : > { %v7597_v15 = vpop.f32.mrb[116].mxu1 }
 0x5c5   : > { %v4730_v26 = vpop.f32.mrb[117].mxu1  ;;  %v5409_v43 = vrot.slane %v7597_v15, 7 }
 0x5c6   : > { %v7598_v42 = vpop.f32.mrb[118].mxu1  ;;  %v5406_v16 = vrot.slane %v4730_v26, 7 }
 0x5c7   : > { %v4733_v4 = vpop.f32.mrb[119].mxu1  ;;  %v6281_v42 = vld [vmem:[%s8429_s13 + $0x30] sm:$0xf0] }
 0x5c8   : > { %v5407_v24 = vrot.slane %v4733_v4, 7 }
 0x5ca   : > { %v5408_v19 = vsel %vm2858_vm0, %v5406_v16, %v5407_v24  ;;  %v5410_v11 = vsel %vm2858_vm0, %v5407_v24, %v5409_v43  ;;  %v5347_v43 = vunpack.c.h.bf16 %v5316_v36 }
 0x5cb   : > { %v9844_v39 = vadd.f32 %v5408_v19, %v9736_v5  ;;  %v9847_v6 = vadd.f32 %v5410_v11, %v9732_v41  ;;  %v5346_v19 = vunpack.c.l.bf16 %v5316_v36 }
 0x5cc   : > { %v7601_v62 = vpop.f32.mrb[120].mxu1 }
 0x5cd   : > { %v4745_v44 = vpop.f32.mrb[121].mxu1  ;;  %v5414_v50 = vrot.slane %v7601_v62, 7  ;;  %v5317_v62 = vrot.slane %v6281_v42, 4 }
 0x5ce   : > { %v7602_v49 = vpop.f32.mrb[122].mxu1  ;;  %v5411_v40 = vrot.slane %v4745_v44, 7 }
 0x5cf   : > { %v4748_v21 = vpop.f32.mrb[123].mxu1 }
 0x5d0   : > { %v5412_v32 = vrot.slane %v4748_v21, 7 }
 0x5d2   : > { %v5413_v8 = vsel %vm2858_vm0, %v5411_v40, %v5412_v32  ;;  %v5415_v3 = vsel %vm2858_vm0, %v5412_v32, %v5414_v50  ;;  %v9889_v50 = vstv %s8497_s12 }
 0x5d3   : > { %v9852_v56 = vadd.f32 %v5413_v8, %v9747_v34  ;;  %v9855_v5 = vadd.f32 %v5415_v3, %v9740_v38  ;;  %v6283_v8 = vld [vmem:[%s8429_s13 + $0x40] sm:$0xf0] }
 0x5d4   : > { %v7605_v41 = vpop.f32.mrb[124].mxu1 }
 0x5d5   : > { %v4760_v48 = vpop.f32.mrb[125].mxu1  ;;  %v5419_v51 = vrot.slane %v7605_v41, 7 }
 0x5d6   : > { %v7606_v22 = vpop.f32.mrb[126].mxu1  ;;  %v5416_v63 = vrot.slane %v4760_v48, 7  ;;  %v6284_v48 = vld [vmem:[%s8429_s13 + $0x48] sm:$0xf] }
 0x5d7   : > { %v4763_v0 = vpop.f32.mrb[127].mxu1 }
 0x5d8   : > { %v5417_v2 = vrot.slane %v4763_v0, 7 }
 0x5da   : > { %v5418_v9 = vsel %vm2858_vm0, %v5416_v63, %v5417_v2  ;;  %v5420_v17 = vsel %vm2858_vm0, %v5417_v2, %v5419_v51 }
 0x5db   : > { %v9860_v35 = vadd.f32 %v5418_v9, %v9762_v60  ;;  %v9863_v34 = vadd.f32 %v5420_v17, %v9755_v20  ;;  %v5320_v9 = vrot.slane %v6283_v8, 4 }
 0x5dc   : > { %v7609_v38 = vpop.f32.mrb[128].mxu1 }
 0x5dd   : > { %v4775_v13 = vpop.f32.mrb[129].mxu1  ;;  %v5424_v23 = vrot.slane %v7609_v38, 7 }
 0x5de   : > { %v7610_v45 = vpop.f32.mrb[130].mxu1  ;;  %v5421_v52 = vrot.slane %v4775_v13, 7  ;;  %v5321_v13 = vrot.slane %v6284_v48, 4 }
 0x5df   : > { %v4778_v37 = vpop.f32.mrb[131].mxu1 }
 0x5e0   : > { %v5422_v57 = vrot.slane %v4778_v37, 7 }
 0x5e2   : > { %v5423_v27 = vsel %vm2858_vm0, %v5421_v52, %v5422_v57  ;;  %v5425_v54 = vsel %vm2858_vm0, %v5422_v57, %v5424_v23 }
 0x5e3   : > { %v9870_v60 = vadd.f32 %v5423_v27, %v9776_v12  ;;  %v9873_v20 = vadd.f32 %v5425_v54, %v9769_v58  ;;  %v6282_v12 = vld [vmem:[%s8429_s13 + $0x38] sm:$0xf]  ;;  %v9882_v58 = vld [vmem:[%s10005_s5] ss:$0 sm:$0xff] }
 0x5e4   : > { %v7677_v18 = vpop.f32.mrb[164].mxu1  ;;  %v5318_v44 = vrot.slane %v6282_v12, 4 }
 0x5e5   : > { %v5098_v59 = vpop.f32.mrb[165].mxu1  ;;  %v5483_v47 = vrot.slane %v7677_v18, 1  ;;  %v5322_v18 = vsel %vm5313_vm8, %v5320_v9, %v5321_v13 }
 0x5e6   : > { %v7678_v53 = vpop.f32.mrb[166].mxu1  ;;  %v5319_v0 = vsel %vm5313_vm8, %v5317_v62, %v5318_v44  ;;  %v5351_v42 = vunpack.c.h.bf16 %v5322_v18 }
 0x5e7   : > { %v5485_v25 = vrot.slane %v7678_v53, 1  ;;  %v5100_v15 = vpop.f32.mrb[167].mxu1  ;;  %v5349_v37 = vunpack.c.h.bf16 %v5319_v0  ;;  %v5348_v57 = vunpack.c.l.bf16 %v5319_v0 }
 0x5e8   : > { %v5482_v26 = vrot.slane %v5100_v15, 1 }
 0x5e9   : > { %v5486_v4 = vsel %vm2979_vm1, %v5483_v47, %v5485_v25 }
 0x5ea   : > { %v5539_v16 = vadd.f32 %v5486_v4, %v9815_v33  ;;  %v5484_v24 = vsel %vm2979_vm1, %v5482_v26, %v5483_v47  ;;  %v6286_v26 = vld [vmem:[%s8429_s13 + $0x58] sm:$0xf] }
 0x5eb   : > { %v5538_v11 = vadd.f32 %v5484_v24, %v9812_v10  ;;  %v5324_v62 = vrot.slane %v6286_v26, 4 }
 0x5ec   : > { %v5562_v49 = vadd.f32 %v9882_v58, %v5539_v16  ;;  %v7681_v21 = vpop.f32.mrb[168].mxu1 }
 0x5ed   : > { %v5561_v40 = vadd.f32 %v9882_v58, %v5538_v11  ;;  %v5113_v32 = vpop.f32.mrb[169].mxu1  ;;  %v5488_v22 = vrot.slane %v7681_v21, 1 }
 0x5ee   : > { %v5578_v3 = vadd.f32 %v5562_v49, %v5347_v43  ;;  %v7682_v41 = vpop.f32.mrb[170].mxu1  ;;  %v5350_v49 = vunpack.c.l.bf16 %v5322_v18  ;;  %v6289_v18 = vld [vmem:[%s8429_s13 + $0x70] sm:$0xf0] }
 0x5ef   : > { %v5577_v33 = vadd.f32 %v5561_v40, %v5346_v19  ;;  %v5490_v10 = vrot.slane %v7682_v41, 1  ;;  %v5115_v51 = vpop.f32.mrb[171].mxu1 }
 0x5f0   : > { %vm5594_vm0 = vcmp.gt.f32.partialorder %v5578_v3, 0.0  ;;  %v5611_v63 = vmul.f32 %v9889_v50, %v5578_v3  ;;  %v5487_v2 = vrot.slane %v5115_v51, 1 }
 0x5f1   : > { %vm5593_vm9 = vcmp.gt.f32.partialorder %v5577_v33, 0.0  ;;  %v5610_v17 = vmul.f32 %v9889_v50, %v5577_v33  ;;  %v5491_v38 = vsel %vm2979_vm1, %v5488_v22, %v5490_v10 }
 0x5f2   : > { %v5627_v45 = vsel %vm5594_vm0, %v5578_v3, %v5611_v63  ;;  %v5541_v55 = vadd.f32 %v5491_v38, %v9823_v46  ;;  %v5489_v23 = vsel %vm2979_vm1, %v5487_v2, %v5488_v22  ;;  %v6285_v46 = vld [vmem:[%s8429_s13 + $0x50] sm:$0xf0]  ;;  %v6287_v63 = vld [vmem:[%s8429_s13 + $0x60] sm:$0xf0]  ;;  %v6288_v2 = vld [vmem:[%s8429_s13 + $0x68] sm:$0xf] }
 0x5f3   : > { %5643 = vst [vmem:[%s8391_s7 + $0x8] sm:$0xff] %v5627_v45  ;;  %v5626_v52 = vsel %vm5593_vm9, %v5577_v33, %v5610_v17  ;;  %v5540_v61 = vadd.f32 %v5489_v23, %v9820_v28  ;;  %v5323_v16 = vrot.slane %v6285_v46, 4 }
 0x5f4   : > { %5642 = vst [vmem:[%s8391_s7] sm:$0xff] %v5626_v52  ;;  %v5564_v27 = vadd.f32 %v9882_v58, %v5541_v55  ;;  %v7685_v54 = vpop.f32.mrb[172].mxu1 }
 0x5f5   : > { %v5563_v7 = vadd.f32 %v9882_v58, %v5540_v61  ;;  %v5128_v29 = vpop.f32.mrb[173].mxu1  ;;  %v5493_v36 = vrot.slane %v7685_v54, 1  ;;  %v5327_v61 = vrot.slane %v6288_v2, 4 }
 0x5f6   : > { %v5580_v59 = vadd.f32 %v5564_v27, %v5349_v37  ;;  %v7686_v53 = vpop.f32.mrb[174].mxu1 }
 0x5f7   : > { %v5579_v47 = vadd.f32 %v5563_v7, %v5348_v57  ;;  %v5495_v25 = vrot.slane %v7686_v53, 1  ;;  %v5130_v15 = vpop.f32.mrb[175].mxu1  ;;  %v5326_v57 = vrot.slane %v6287_v63, 4  ;;  %v6290_v53 = vld [vmem:[%s8429_s13 + $0x78] sm:$0xf] }
 0x5f8   : > { %vm5596_vm10 = vcmp.gt.f32.partialorder %v5580_v59, 0.0  ;;  %v5613_v28 = vmul.f32 %v9889_v50, %v5580_v59  ;;  %v5492_v12 = vrot.slane %v5130_v15, 1 }
 0x5f9   : > { %vm5595_vm11 = vcmp.gt.f32.partialorder %v5579_v47, 0.0  ;;  %v5612_v4 = vmul.f32 %v9889_v50, %v5579_v47  ;;  %v5496_v43 = vsel %vm2979_vm1, %v5493_v36, %v5495_v25 }
 0x5fa   : > { %v5629_v24 = vsel %vm5596_vm10, %v5580_v59, %v5613_v28  ;;  %v5543_v19 = vadd.f32 %v5496_v43, %v9831_v1  ;;  %v5494_v11 = vsel %vm2979_vm1, %v5492_v12, %v5493_v36  ;;  %v5325_v1 = vsel %vm5313_vm8, %v5323_v16, %v5324_v62 }
 0x5fb   : > { %5645 = vst [vmem:[%s8391_s7 + $0x18] sm:$0xff] %v5629_v24  ;;  %v5628_v44 = vsel %vm5595_vm11, %v5579_v47, %v5612_v4  ;;  %v5542_v21 = vadd.f32 %v5494_v11, %v9828_v14  ;;  %v5353_v17 = vunpack.c.h.bf16 %v5325_v1  ;;  %v5352_v37 = vunpack.c.l.bf16 %v5325_v1 }
 0x5fc   : > { %5644 = vst [vmem:[%s8391_s7 + $0x10] sm:$0xff] %v5628_v44  ;;  %v5566_v40 = vadd.f32 %v9882_v58, %v5543_v19  ;;  %v7689_v32 = vpop.f32.mrb[176].mxu1  ;;  %v5328_v36 = vsel %vm5313_vm8, %v5326_v57, %v5327_v61  ;;  %v5329_v28 = vrot.slane %v6289_v18, 4  ;;  %v5330_v4 = vrot.slane %v6290_v53, 4  ;;  %v6293_v53 = vld [vmem:[%s8429_s13 + $0x90] sm:$0xf0] }
 0x5fd   : > { %v5565_v8 = vadd.f32 %v9882_v58, %v5542_v21  ;;  %v5143_v3 = vpop.f32.mrb[177].mxu1  ;;  %v5498_v22 = vrot.slane %v7689_v32, 1  ;;  %v5355_v16 = vunpack.c.h.bf16 %v5328_v36  ;;  %v5354_v62 = vunpack.c.l.bf16 %v5328_v36 }
 0x5fe   : > { %v5582_v41 = vadd.f32 %v5566_v40, %v5351_v42  ;;  %v7690_v48 = vpop.f32.mrb[178].mxu1 }
 0x5ff   : > { %v5581_v33 = vadd.f32 %v5565_v8, %v5350_v49  ;;  %v5500_v0 = vrot.slane %v7690_v48, 1  ;;  %v5145_v10 = vpop.f32.mrb[179].mxu1  ;;  %v5331_v8 = vsel %vm5313_vm8, %v5329_v28, %v5330_v4  ;;  %v5335_v4 = vrot.slane %v6293_v53, 4 }
 0x600   : > { %vm5598_vm12 = vcmp.gt.f32.partialorder %v5582_v41, 0.0  ;;  %v5615_v14 = vmul.f32 %v9889_v50, %v5582_v41  ;;  %v5497_v51 = vrot.slane %v5145_v10, 1  ;;  %v5357_v10 = vunpack.c.h.bf16 %v5331_v8 }
 0x601   : > { %vm5597_vm13 = vcmp.gt.f32.partialorder %v5581_v33, 0.0  ;;  %v5614_v9 = vmul.f32 %v9889_v50, %v5581_v33  ;;  %v5501_v38 = vsel %vm2979_vm1, %v5498_v22, %v5500_v0  ;;  %v6292_v0 = vld [vmem:[%s8429_s13 + $0x88] sm:$0xf] }
 0x602   : > { %v5631_v13 = vsel %vm5598_vm12, %v5582_v41, %v5615_v14  ;;  %v5545_v45 = vadd.f32 %v5501_v38, %v9839_v31  ;;  %v5499_v55 = vsel %vm2979_vm1, %v5497_v51, %v5498_v22 }
 0x603   : > { %5647 = vst [vmem:[%s8391_s7 + $0x28] sm:$0xff] %v5631_v13  ;;  %v5630_v23 = vsel %vm5597_vm13, %v5581_v33, %v5614_v9  ;;  %v5544_v52 = vadd.f32 %v5499_v55, %v9836_v30  ;;  %v5333_v13 = vrot.slane %v6292_v0, 4 }
 0x604   : > { %5646 = vst [vmem:[%s8391_s7 + $0x20] sm:$0xff] %v5630_v23  ;;  %v5568_v27 = vadd.f32 %v9882_v58, %v5545_v45  ;;  %v7693_v54 = vpop.f32.mrb[180].mxu1 }
 0x605   : > { %v5567_v7 = vadd.f32 %v9882_v58, %v5544_v52  ;;  %v5158_v29 = vpop.f32.mrb[181].mxu1  ;;  %v5503_v47 = vrot.slane %v7693_v54, 1 }
 0x606   : > { %v5584_v59 = vadd.f32 %v5568_v27, %v5353_v17  ;;  %v7694_v31 = vpop.f32.mrb[182].mxu1 }
 0x607   : > { %v5583_v46 = vadd.f32 %v5567_v7, %v5352_v37  ;;  %v5505_v25 = vrot.slane %v7694_v31, 1  ;;  %v5160_v30 = vpop.f32.mrb[183].mxu1  ;;  %v5356_v37 = vunpack.c.l.bf16 %v5331_v8 }
 0x608   : > { %vm5600_vm14 = vcmp.gt.f32.partialorder %v5584_v59, 0.0  ;;  %v5617_v15 = vmul.f32 %v9889_v50, %v5584_v59  ;;  %v5502_v26 = vrot.slane %v5160_v30, 1 }
 0x609   : > { %vm5599_vm15 = vcmp.gt.f32.partialorder %v5583_v46, 0.0  ;;  %v5616_v42 = vmul.f32 %v9889_v50, %v5583_v46  ;;  %v5506_v12 = vsel %vm2979_vm1, %v5503_v47, %v5505_v25 }
 0x60a   : > { %v5633_v43 = vsel %vm5600_vm14, %v5584_v59, %v5617_v15  ;;  %v5547_v24 = vadd.f32 %v5506_v12, %v9847_v6  ;;  %v5504_v19 = vsel %vm2979_vm1, %v5502_v26, %v5503_v47  ;;  %v6291_v6 = vld [vmem:[%s8429_s13 + $0x80] sm:$0xf0] }
 0x60b   : > { %5649 = vst [vmem:[%s8391_s7 + $0x38] sm:$0xff] %v5633_v43  ;;  %v5632_v11 = vsel %vm5599_vm15, %v5583_v46, %v5616_v42  ;;  %v5546_v44 = vadd.f32 %v5504_v19, %v9844_v39  ;;  %v5332_v2 = vrot.slane %v6291_v6, 4  ;;  %v6294_v46 = vld [vmem:[%s8429_s13 + $0x98] sm:$0xf] }
 0x60c   : > { %5648 = vst [vmem:[%s8391_s7 + $0x30] sm:$0xff] %v5632_v11  ;;  %v5570_v49 = vadd.f32 %v9882_v58, %v5547_v24  ;;  %v7697_v21 = vpop.f32.mrb[184].mxu1  ;;  %v5336_v43 = vrot.slane %v6294_v46, 4 }
 0x60d   : > { %v5569_v40 = vadd.f32 %v9882_v58, %v5546_v44  ;;  %v5173_v32 = vpop.f32.mrb[185].mxu1  ;;  %v5508_v1 = vrot.slane %v7697_v21, 1 }
 0x60e   : > { %v5586_v3 = vadd.f32 %v5570_v49, %v5355_v16  ;;  %v7698_v41 = vpop.f32.mrb[186].mxu1  ;;  %v5337_v21 = vsel %vm5313_vm8, %v5335_v4, %v5336_v43 }
 0x60f   : > { %v5585_v48 = vadd.f32 %v5569_v40, %v5354_v62  ;;  %v5510_v33 = vrot.slane %v7698_v41, 1  ;;  %v5175_v22 = vpop.f32.mrb[187].mxu1  ;;  %v5360_v0 = vunpack.c.l.bf16 %v5337_v21 }
 0x610   : > { %vm5602_vm2 = vcmp.gt.f32.partialorder %v5586_v3, 0.0  ;;  %v5619_v39 = vmul.f32 %v9889_v50, %v5586_v3  ;;  %v5507_v14 = vrot.slane %v5175_v22, 1 }
 0x611   : > { %vm5601_vm3 = vcmp.gt.f32.partialorder %v5585_v48, 0.0  ;;  %v5618_v51 = vmul.f32 %v9889_v50, %v5585_v48  ;;  %v5511_v63 = vsel %vm2979_vm1, %v5508_v1, %v5510_v33 }
 0x612   : > { %v5635_v9 = vsel %vm5602_vm2, %v5586_v3, %v5619_v39  ;;  %v5549_v17 = vadd.f32 %v5511_v63, %v9855_v5  ;;  %v5509_v38 = vsel %vm2979_vm1, %v5507_v14, %v5508_v1  ;;  %v5334_v5 = vsel %vm5313_vm8, %v5332_v2, %v5333_v13 }
 0x613   : > { %5651 = vst [vmem:[%s8391_s7 + $0x48] sm:$0xff] %v5635_v9  ;;  %v5634_v45 = vsel %vm5601_vm3, %v5585_v48, %v5618_v51  ;;  %v5548_v55 = vadd.f32 %v5509_v38, %v9852_v56  ;;  %v5359_v36 = vunpack.c.h.bf16 %v5334_v5  ;;  %v5358_v26 = vunpack.c.l.bf16 %v5334_v5 }
 0x614   : > { %5650 = vst [vmem:[%s8391_s7 + $0x40] sm:$0xff] %v5634_v45  ;;  %v5572_v23 = vadd.f32 %v9882_v58, %v5549_v17  ;;  %v7701_v52 = vpop.f32.mrb[188].mxu1  ;;  %v5361_v48 = vunpack.c.h.bf16 %v5337_v21 }
 0x615   : > { %v5571_v57 = vadd.f32 %v9882_v58, %v5548_v55  ;;  %v5188_v61 = vpop.f32.mrb[189].mxu1  ;;  %v5513_v29 = vrot.slane %v7701_v52, 1 }
 0x616   : > { %v5588_v27 = vadd.f32 %v5572_v23, %v5357_v10  ;;  %v7702_v54 = vpop.f32.mrb[190].mxu1 }
 0x617   : > { %v5587_v7 = vadd.f32 %v5571_v57, %v5356_v37  ;;  %v5515_v18 = vrot.slane %v7702_v54, 1  ;;  %v5190_v59 = vpop.f32.mrb[191].mxu1 }
 0x618   : > { %vm5604_vm4 = vcmp.gt.f32.partialorder %v5588_v27, 0.0  ;;  %v5621_v56 = vmul.f32 %v9889_v50, %v5588_v27  ;;  %v5512_v31 = vrot.slane %v5190_v59, 1 }
 0x619   : > { %vm5603_vm5 = vcmp.gt.f32.partialorder %v5587_v7, 0.0  ;;  %v5620_v47 = vmul.f32 %v9889_v50, %v5587_v7  ;;  %v5516_v25 = vsel %vm2979_vm1, %v5513_v29, %v5515_v18 }
 0x61a   : > { %v5637_v30 = vsel %vm5604_vm4, %v5588_v27, %v5621_v56  ;;  %v5551_v15 = vadd.f32 %v5516_v25, %v9863_v34  ;;  %v5514_v28 = vsel %vm2979_vm1, %v5512_v31, %v5513_v29 }
 0x61b   : > { %5653 = vst [vmem:[%s8391_s7 + $0x58] sm:$0xff] %v5637_v30  ;;  %v5636_v42 = vsel %vm5603_vm5, %v5587_v7, %v5620_v47  ;;  %v5550_v12 = vadd.f32 %v5514_v28, %v9860_v35 }
 0x61c   : > { %5652 = vst [vmem:[%s8391_s7 + $0x50] sm:$0xff] %v5636_v42  ;;  %v5574_v16 = vadd.f32 %v9882_v58, %v5551_v15  ;;  %v7705_v24 = vpop.f32.mrb[192].mxu1 }
 0x61d   : > { %v5573_v19 = vadd.f32 %v9882_v58, %v5550_v12  ;;  %v5203_v11 = vpop.f32.mrb[193].mxu1  ;;  %v5518_v49 = vrot.slane %v7705_v24, 1 }
 0x61e   : > { %v5590_v62 = vadd.f32 %v5574_v16, %v5359_v36  ;;  %v7706_v44 = vpop.f32.mrb[194].mxu1 }
 0x61f   : > { %v5589_v34 = vadd.f32 %v5573_v19, %v5358_v26  ;;  %v5520_v40 = vrot.slane %v7706_v44, 1  ;;  %v5205_v32 = vpop.f32.mrb[195].mxu1 }
 0x620   : > { %vm5606_vm6 = vcmp.gt.f32.partialorder %v5590_v62, 0.0  ;;  %v5623_v35 = vmul.f32 %v9889_v50, %v5590_v62  ;;  %v5517_v8 = vrot.slane %v5205_v32, 1 }
 0x621   : > { %vm5605_vm7 = vcmp.gt.f32.partialorder %v5589_v34, 0.0  ;;  %v5622_v3 = vmul.f32 %v9889_v50, %v5589_v34  ;;  %v5521_v41 = vsel %vm2979_vm1, %v5518_v49, %v5520_v40 }
 0x622   : > { %v5639_v6 = vsel %vm5606_vm6, %v5590_v62, %v5623_v35  ;;  %v5553_v1 = vadd.f32 %v5521_v41, %v9873_v20  ;;  %v5519_v33 = vsel %vm2979_vm1, %v5517_v8, %v5518_v49 }
 0x623   : > { %5655 = vst [vmem:[%s8391_s7 + $0x68] sm:$0xff] %v5639_v6  ;;  %v5638_v22 = vsel %vm5605_vm7, %v5589_v34, %v5622_v3  ;;  %v5552_v39 = vadd.f32 %v5519_v33, %v9870_v60 }
 0x624   : > { %5654 = vst [vmem:[%s8391_s7 + $0x60] sm:$0xff] %v5638_v22  ;;  %v5576_v10 = vadd.f32 %v9882_v58, %v5553_v1 }
 0x625   : > { %v5575_v14 = vadd.f32 %v9882_v58, %v5552_v39 }
 0x626   : > { %v5592_v51 = vadd.f32 %v5576_v10, %v5361_v48 }
 0x627   : > { %v5591_v63 = vadd.f32 %v5575_v14, %v5360_v0 }
 0x628   : > { %vm5608_vm8 = vcmp.gt.f32.partialorder %v5592_v51, 0.0  ;;  %v5625_v2 = vmul.f32 %v9889_v50, %v5592_v51 }
 0x629   : > { %vm5607_vm0 = vcmp.gt.f32.partialorder %v5591_v63, 0.0  ;;  %v5624_v20 = vmul.f32 %v9889_v50, %v5591_v63 }
 0x62a   : > { %v5641_v9 = vsel %vm5608_vm8, %v5592_v51, %v5625_v2 }
 0x62b   : > { %5657 = vst [vmem:[%s8391_s7 + $0x78] sm:$0xff] %v5641_v9  ;;  %v5640_v17 = vsel %vm5607_vm0, %v5591_v63, %v5624_v20 }
 0x62c   : > { %5656 = vst [vmem:[%s8391_s7 + $0x70] sm:$0xff] %v5640_v17 }
 0x62d PF: > { %s17_s25 = sadd.s32 1, %s8285_s25   ;;  %s10009_s21 = smov %s8277_s23 }
 0x62e   : > { %p14_p8 = scmp.ge.s32.totalorder %s17_s25, 6   ;;  %s10010_s22 = smov %s8281_s24 }
 0x62f   : > { %s10011_s23 = smov %s10014_s27  ;;  %s10012_s24 = smov %s10018_s28 }
 0x630   :  { %16 = sbr.rel (!%p14_p8) target bundleno = 3 (0x3), region = 204 }
 0x637   :  { %5690 = vsyncpa [#allocation6], 1 }
 0x638   :  { %5692 = vsyncpa [#allocation6 + $0x1], 1 }
 0x639   :  { %5693 = vsyncmov [#allocation4] }
 0x63c   :  { %s5694_s7 = vpop.sfrf %5693 }
 0x63d   :  { %p6298_p9 = scmp.ne.s32.totalorder %s5694_s7, 0 }
 0x63f   :  { %5698 = shalt.err (%p6298_p9)  }
 0x640   :  { %5700 = vsyncmov [#allocation4 + $0x1] }
 0x643   :  { %s5701_s13 = vpop.sfrf %5700 }
 0x644   :  { %p6299_p10 = scmp.ne.s32.totalorder %s5701_s13, 0 }
 0x646   :  { %5705 = shalt.err (%p6299_p10)  }

</bundles_post_ra>
